<compile_context>
chip_gen: v5e
topology: v5e:2x2
jax: 0.10.0
libtpu: 0.0.40
codegen_flags: <defaults>
</compile_context>

<pallas_src>
import functools

import jax
import jax.numpy as jnp
from jax.experimental import pallas as pl
from jax.experimental.pallas import tpu as pltpu

EPS = 1e-5  # InstanceNorm3d default


def _round_up(a, b):
    return (a + b - 1) // b * b


def _conv_block3d_kernel(xf_ref, wt_ref, mask_ref, g_ref, bt_ref, o_ref, *,
                         Hp, Wp, halo, Lout, inv_count):
    # xf_ref:   (1, Cin_p, Lin)     zero-padded input, spatial flattened + halo, one batch item
    # wt_ref:   (27, Cout_p, Cin_p) per-tap weight matrices (tap = kd*9 + kh*3 + kw)
    # mask_ref: (1, Lout)           1.0 at valid (interior) spatial positions, else 0.0
    # g_ref/bt_ref: (Cout_p, 1)     InstanceNorm affine gamma/beta
    # o_ref:    (1, Cout_p, Lout)   conv+IN+ReLU on the padded grid (cropped in the wrapper)
    acc = None
    for kd in range(3):
        for kh in range(3):
            for kw in range(3):
                t = kd * 9 + kh * 3 + kw
                # Flat-shift: on the flattened padded grid, tap (kd,kh,kw) is a constant
                # lane offset.  Border positions read "wrapped" neighbouring data -> garbage,
                # but they are masked out of the statistics and cropped away in the wrapper.
                s = halo + (kd - 1) * Hp * Wp + (kh - 1) * Wp + (kw - 1)
                slab = xf_ref[0, :, pl.ds(s, Lout)]                    # (Cin_p, Lout)
                c = jnp.dot(wt_ref[t], slab,
                            preferred_element_type=jnp.float32)        # (Cout_p, Lout)
                acc = c if acc is None else acc + c

    m = mask_ref[...]                        # (1, Lout)
    accm = acc * m                           # zero out invalid / border positions

    # InstanceNorm3d: per-channel biased mean/var over the D*H*W valid positions, single pass
    # via sum and sum-of-squares (f32).  Conv bias is omitted: it cancels in (x - mean).
    s1 = jnp.sum(accm, axis=1, keepdims=True)            # (Cout_p, 1)
    s2 = jnp.sum(accm * accm, axis=1, keepdims=True)     # (Cout_p, 1)
    mean = s1 * inv_count
    var = jnp.maximum(s2 * inv_count - mean * mean, 0.0)
    scale = jax.lax.rsqrt(var + EPS) * g_ref[...]        # gamma folded into inv-std
    shift = bt_ref[...] - mean * scale
    o_ref[0] = jnp.maximum(accm * scale + shift, 0.0).astype(o_ref.dtype)


def conv_block3d(x, weight, bias, gamma, beta):
    """x: (N, Cin, D, H, W) f32.  weight: (Cout, Cin, 3, 3, 3).  Returns (N, Cout, D, H, W).

    `bias` is accepted for API parity with the PyTorch module but is mathematically a no-op
    (cancelled by the InstanceNorm mean subtraction), so it is not sent to the kernel.
    """
    del bias
    N, Cin, D, H, W = x.shape
    Cout = weight.shape[0]
    Dp, Hp, Wp = D + 2, H + 2, W + 2
    L = Dp * Hp * Wp                       # flattened padded spatial size
    DHW = D * H * W                        # number of valid output positions
    halo = Hp * Wp + Wp + 1                # max |tap offset| on the flattened grid
    Lout = _round_up(L, 128)               # lane-dense output length
    Lin = _round_up(Lout + 2 * halo, 128)  # input length incl. halo on both sides
    Cin_p = _round_up(Cin, 8)
    Cout_p = _round_up(Cout, 8)

    # --- glue (cheap, no 27x blowup): pad spatially, flatten, add halo, pad channels ---
    xpad = jnp.pad(x.astype(jnp.float32),
                   ((0, 0), (0, 0), (1, 1), (1, 1), (1, 1)))                # (N, Cin, Dp, Hp, Wp)
    xflat = xpad.reshape(N, Cin, L)
    xf = jnp.pad(xflat, ((0, 0), (0, Cin_p - Cin), (halo, Lin - L - halo)))  # (N, Cin_p, Lin)

    # weight (Cout, Cin, kd, kh, kw) -> (27, Cout_p, Cin_p), tap index t = kd*9 + kh*3 + kw
    wt = jnp.transpose(weight.astype(jnp.float32), (2, 3, 4, 0, 1)).reshape(27, Cout, Cin)
    wt = jnp.pad(wt, ((0, 0), (0, Cout_p - Cout), (0, Cin_p - Cin)))

    # validity mask over the padded grid (interior positions only)
    idx = jnp.arange(Lout)
    d_ = idx // (Hp * Wp)
    rem = idx % (Hp * Wp)
    h_ = rem // Wp
    w_ = rem % Wp
    valid = (idx < L) & (d_ >= 1) & (d_ <= D) & (h_ >= 1) & (h_ <= H) & (w_ >= 1) & (w_ <= W)
    mask = valid.astype(jnp.float32).reshape(1, Lout)

    g2 = jnp.pad(gamma.astype(jnp.float32), (0, Cout_p - Cout)).reshape(Cout_p, 1)
    bt2 = jnp.pad(beta.astype(jnp.float32), (0, Cout_p - Cout)).reshape(Cout_p, 1)

    kernel = functools.partial(_conv_block3d_kernel, Hp=Hp, Wp=Wp, halo=halo,
                               Lout=Lout, inv_count=1.0 / DHW)

    cost = pl.CostEstimate(
        flops=int(2 * N * 27 * Cout_p * Cin_p * Lout),
        transcendentals=int(N * Cout_p),
        bytes_accessed=int(4 * (N * Cin_p * Lin + 27 * Cout_p * Cin_p
                                + Lout + 2 * Cout_p + N * Cout_p * Lout)),
    )

    out = pl.pallas_call(
        kernel,
        out_shape=jax.ShapeDtypeStruct((N, Cout_p, Lout), jnp.float32),
        grid_spec=pltpu.PrefetchScalarGridSpec(
            num_scalar_prefetch=0,
            grid=(N,),
            in_specs=[
                pl.BlockSpec((1, Cin_p, Lin), lambda n: (n, 0, 0)),
                pl.BlockSpec((27, Cout_p, Cin_p), lambda n: (0, 0, 0)),
                pl.BlockSpec((1, Lout), lambda n: (0, 0)),
                pl.BlockSpec((Cout_p, 1), lambda n: (0, 0)),
                pl.BlockSpec((Cout_p, 1), lambda n: (0, 0)),
            ],
            out_specs=pl.BlockSpec((1, Cout_p, Lout), lambda n: (n, 0, 0)),
        ),
        compiler_params=pltpu.CompilerParams(
            dimension_semantics=("parallel",),
            vmem_limit_bytes=64 * 1024 * 1024,
        ),
        cost_estimate=cost,
    )(xf, wt, mask, g2, bt2)

    # Crop padded grid + padded channels; (N, Cout, flat-padded-grid) maps straight to NCDHW.
    out = out[:, :Cout, :L].reshape(N, Cout, Dp, Hp, Wp)
    return out[:, :, 1:1 + D, 1:1 + H, 1:1 + W]


def _reference(x, weight, bias, gamma, beta):
    """Pure-JAX reference matching the PyTorch conv_block3D forward."""
    conv = jax.lax.conv_general_dilated(
        x, weight, window_strides=(1, 1, 1),
        padding=((1, 1), (1, 1), (1, 1)),
        dimension_numbers=("NCDHW", "OIDHW", "NCDHW"))
    conv = conv + bias[None, :, None, None, None]
    mean = jnp.mean(conv, axis=(2, 3, 4), keepdims=True)
    var = jnp.mean((conv - mean) ** 2, axis=(2, 3, 4), keepdims=True)
    y = (conv - mean) * jax.lax.rsqrt(var + EPS)
    y = y * gamma[None, :, None, None, None] + beta[None, :, None, None, None]
    return jnp.maximum(y, 0.0)


if __name__ == "__main__":
    # Small shapes consistent with the module: N=2, in_channels=4, out_channels=8, D=H=W=8.
    N, Cin, Cout, D, H, W = 2, 4, 8, 8, 8, 8

    key = jax.random.PRNGKey(0)
    kx, kw, kb, kg, kbt = jax.random.split(key, 5)
    x = jax.random.normal(kx, (N, Cin, D, H, W), dtype=jnp.float32)
    weight = 0.1 * jax.random.normal(kw, (Cout, Cin, 3, 3, 3), dtype=jnp.float32)
    bias = 0.1 * jax.random.normal(kb, (Cout,), dtype=jnp.float32)
    gamma = 1.0 + 0.1 * jax.random.normal(kg, (Cout,), dtype=jnp.float32)
    beta = 0.1 * jax.random.normal(kbt, (Cout,), dtype=jnp.float32)

    out = conv_block3d(x, weight, bias, gamma, beta)
    out = jax.block_until_ready(out)

    ref = jax.block_until_ready(_reference(x, weight, bias, gamma, beta))
    assert out.shape == (N, Cout, D, H, W)
    assert jnp.allclose(out, ref, atol=2e-4, rtol=2e-4), (
        f"max abs err {jnp.max(jnp.abs(out - ref))}")

    print("KERNEL_OK")
</pallas_src>

<mosaic_0001>
module attributes {stable_mosaic.version = 11 : i64} {
  func.func @_conv_block3d_kernel(%arg0: i32, %arg1: memref<1x8x1280xf32, #tpu.memory_space<vmem>>, %arg2: memref<27x8x8xf32, #tpu.memory_space<vmem>>, %arg3: memref<1x1024xf32, #tpu.memory_space<vmem>>, %arg4: memref<8x1xf32, #tpu.memory_space<vmem>>, %arg5: memref<8x1xf32, #tpu.memory_space<vmem>>, %arg6: memref<1x8x1024xf32, #tpu.memory_space<vmem>>) attributes {dimension_semantics = [#tpu.dimension_semantics<parallel>], iteration_bounds = array<i64: 2>, scalar_prefetch = 0 : i64, scratch_operands = 0 : i64, tpu.core_type = #tpu.core_type<tc>, window_params = [{transform_indices = @transform_0, window_bounds = array<i64: 1, 8, 1280>}, {pipeline_mode = #tpu.pipeline_mode<synchronous>, transform_indices = @transform_1, window_bounds = array<i64: 27, 8, 8>}, {pipeline_mode = #tpu.pipeline_mode<synchronous>, transform_indices = @transform_2, window_bounds = array<i64: 1, 1024>}, {pipeline_mode = #tpu.pipeline_mode<synchronous>, transform_indices = @transform_3, window_bounds = array<i64: 8, 1>}, {pipeline_mode = #tpu.pipeline_mode<synchronous>, transform_indices = @transform_4, window_bounds = array<i64: 8, 1>}, {transform_indices = @transform_5, window_bounds = array<i64: 1, 8, 1024>}]} {
    %c0 = arith.constant 0 : index
    %c0_0 = arith.constant 0 : index
    %c0_1 = arith.constant 0 : index
    %0 = vector.load %arg1[%c0, %c0_0, %c0_1] : memref<1x8x1280xf32, #tpu.memory_space<vmem>>, vector<1x8x1024xf32>
    %1 = vector.shape_cast %0 : vector<1x8x1024xf32> to vector<8x1024xf32>
    %c0_2 = arith.constant 0 : index
    %c0_3 = arith.constant 0 : index
    %c0_4 = arith.constant 0 : index
    %2 = vector.load %arg2[%c0_2, %c0_3, %c0_4] : memref<27x8x8xf32, #tpu.memory_space<vmem>>, vector<1x8x8xf32>
    %3 = vector.shape_cast %2 : vector<1x8x8xf32> to vector<8x8xf32>
    %cst = arith.constant dense<0.000000e+00> : vector<8x1024xf32>
    %4 = tpu.matmul %3, %1, %cst {dimension_numbers = #tpu.dot_dimension_numbers<[1], [0], [0], [1], [0, 0, 1, 1], [], []>} : vector<8x8xf32>, vector<8x1024xf32>, vector<8x1024xf32> -> vector<8x1024xf32>
    %c0_5 = arith.constant 0 : index
    %c0_6 = arith.constant 0 : index
    %c1 = arith.constant 1 : index
    %5 = vector.load %arg1[%c0_5, %c0_6, %c1] : memref<1x8x1280xf32, #tpu.memory_space<vmem>>, vector<1x8x1024xf32>
    %6 = vector.shape_cast %5 : vector<1x8x1024xf32> to vector<8x1024xf32>
    %c1_7 = arith.constant 1 : index
    %c0_8 = arith.constant 0 : index
    %c0_9 = arith.constant 0 : index
    %7 = vector.load %arg2[%c1_7, %c0_8, %c0_9] : memref<27x8x8xf32, #tpu.memory_space<vmem>>, vector<1x8x8xf32>
    %8 = vector.shape_cast %7 : vector<1x8x8xf32> to vector<8x8xf32>
    %cst_10 = arith.constant dense<0.000000e+00> : vector<8x1024xf32>
    %9 = tpu.matmul %8, %6, %cst_10 {dimension_numbers = #tpu.dot_dimension_numbers<[1], [0], [0], [1], [0, 0, 1, 1], [], []>} : vector<8x8xf32>, vector<8x1024xf32>, vector<8x1024xf32> -> vector<8x1024xf32>
    %10 = arith.addf %4, %9 : vector<8x1024xf32>
    %c0_11 = arith.constant 0 : index
    %c0_12 = arith.constant 0 : index
    %c2 = arith.constant 2 : index
    %11 = vector.load %arg1[%c0_11, %c0_12, %c2] : memref<1x8x1280xf32, #tpu.memory_space<vmem>>, vector<1x8x1024xf32>
    %12 = vector.shape_cast %11 : vector<1x8x1024xf32> to vector<8x1024xf32>
    %c2_13 = arith.constant 2 : index
    %c0_14 = arith.constant 0 : index
    %c0_15 = arith.constant 0 : index
    %13 = vector.load %arg2[%c2_13, %c0_14, %c0_15] : memref<27x8x8xf32, #tpu.memory_space<vmem>>, vector<1x8x8xf32>
    %14 = vector.shape_cast %13 : vector<1x8x8xf32> to vector<8x8xf32>
    %cst_16 = arith.constant dense<0.000000e+00> : vector<8x1024xf32>
    %15 = tpu.matmul %14, %12, %cst_16 {dimension_numbers = #tpu.dot_dimension_numbers<[1], [0], [0], [1], [0, 0, 1, 1], [], []>} : vector<8x8xf32>, vector<8x1024xf32>, vector<8x1024xf32> -> vector<8x1024xf32>
    %16 = arith.addf %10, %15 : vector<8x1024xf32>
    %c0_17 = arith.constant 0 : index
    %c0_18 = arith.constant 0 : index
    %c10 = arith.constant 10 : index
    %17 = vector.load %arg1[%c0_17, %c0_18, %c10] : memref<1x8x1280xf32, #tpu.memory_space<vmem>>, vector<1x8x1024xf32>
    %18 = vector.shape_cast %17 : vector<1x8x1024xf32> to vector<8x1024xf32>
    %c3 = arith.constant 3 : index
    %c0_19 = arith.constant 0 : index
    %c0_20 = arith.constant 0 : index
    %19 = vector.load %arg2[%c3, %c0_19, %c0_20] : memref<27x8x8xf32, #tpu.memory_space<vmem>>, vector<1x8x8xf32>
    %20 = vector.shape_cast %19 : vector<1x8x8xf32> to vector<8x8xf32>
    %cst_21 = arith.constant dense<0.000000e+00> : vector<8x1024xf32>
    %21 = tpu.matmul %20, %18, %cst_21 {dimension_numbers = #tpu.dot_dimension_numbers<[1], [0], [0], [1], [0, 0, 1, 1], [], []>} : vector<8x8xf32>, vector<8x1024xf32>, vector<8x1024xf32> -> vector<8x1024xf32>
    %22 = arith.addf %16, %21 : vector<8x1024xf32>
    %c0_22 = arith.constant 0 : index
    %c0_23 = arith.constant 0 : index
    %c11 = arith.constant 11 : index
    %23 = vector.load %arg1[%c0_22, %c0_23, %c11] : memref<1x8x1280xf32, #tpu.memory_space<vmem>>, vector<1x8x1024xf32>
    %24 = vector.shape_cast %23 : vector<1x8x1024xf32> to vector<8x1024xf32>
    %c4 = arith.constant 4 : index
    %c0_24 = arith.constant 0 : index
    %c0_25 = arith.constant 0 : index
    %25 = vector.load %arg2[%c4, %c0_24, %c0_25] : memref<27x8x8xf32, #tpu.memory_space<vmem>>, vector<1x8x8xf32>
    %26 = vector.shape_cast %25 : vector<1x8x8xf32> to vector<8x8xf32>
    %cst_26 = arith.constant dense<0.000000e+00> : vector<8x1024xf32>
    %27 = tpu.matmul %26, %24, %cst_26 {dimension_numbers = #tpu.dot_dimension_numbers<[1], [0], [0], [1], [0, 0, 1, 1], [], []>} : vector<8x8xf32>, vector<8x1024xf32>, vector<8x1024xf32> -> vector<8x1024xf32>
    %28 = arith.addf %22, %27 : vector<8x1024xf32>
    %c0_27 = arith.constant 0 : index
    %c0_28 = arith.constant 0 : index
    %c12 = arith.constant 12 : index
    %29 = vector.load %arg1[%c0_27, %c0_28, %c12] : memref<1x8x1280xf32, #tpu.memory_space<vmem>>, vector<1x8x1024xf32>
    %30 = vector.shape_cast %29 : vector<1x8x1024xf32> to vector<8x1024xf32>
    %c5 = arith.constant 5 : index
    %c0_29 = arith.constant 0 : index
    %c0_30 = arith.constant 0 : index
    %31 = vector.load %arg2[%c5, %c0_29, %c0_30] : memref<27x8x8xf32, #tpu.memory_space<vmem>>, vector<1x8x8xf32>
    %32 = vector.shape_cast %31 : vector<1x8x8xf32> to vector<8x8xf32>
    %cst_31 = arith.constant dense<0.000000e+00> : vector<8x1024xf32>
    %33 = tpu.matmul %32, %30, %cst_31 {dimension_numbers = #tpu.dot_dimension_numbers<[1], [0], [0], [1], [0, 0, 1, 1], [], []>} : vector<8x8xf32>, vector<8x1024xf32>, vector<8x1024xf32> -> vector<8x1024xf32>
    %34 = arith.addf %28, %33 : vector<8x1024xf32>
    %c0_32 = arith.constant 0 : index
    %c0_33 = arith.constant 0 : index
    %c20 = arith.constant 20 : index
    %35 = vector.load %arg1[%c0_32, %c0_33, %c20] : memref<1x8x1280xf32, #tpu.memory_space<vmem>>, vector<1x8x1024xf32>
    %36 = vector.shape_cast %35 : vector<1x8x1024xf32> to vector<8x1024xf32>
    %c6 = arith.constant 6 : index
    %c0_34 = arith.constant 0 : index
    %c0_35 = arith.constant 0 : index
    %37 = vector.load %arg2[%c6, %c0_34, %c0_35] : memref<27x8x8xf32, #tpu.memory_space<vmem>>, vector<1x8x8xf32>
    %38 = vector.shape_cast %37 : vector<1x8x8xf32> to vector<8x8xf32>
    %cst_36 = arith.constant dense<0.000000e+00> : vector<8x1024xf32>
    %39 = tpu.matmul %38, %36, %cst_36 {dimension_numbers = #tpu.dot_dimension_numbers<[1], [0], [0], [1], [0, 0, 1, 1], [], []>} : vector<8x8xf32>, vector<8x1024xf32>, vector<8x1024xf32> -> vector<8x1024xf32>
    %40 = arith.addf %34, %39 : vector<8x1024xf32>
    %c0_37 = arith.constant 0 : index
    %c0_38 = arith.constant 0 : index
    %c21 = arith.constant 21 : index
    %41 = vector.load %arg1[%c0_37, %c0_38, %c21] : memref<1x8x1280xf32, #tpu.memory_space<vmem>>, vector<1x8x1024xf32>
    %42 = vector.shape_cast %41 : vector<1x8x1024xf32> to vector<8x1024xf32>
    %c7 = arith.constant 7 : index
    %c0_39 = arith.constant 0 : index
    %c0_40 = arith.constant 0 : index
    %43 = vector.load %arg2[%c7, %c0_39, %c0_40] : memref<27x8x8xf32, #tpu.memory_space<vmem>>, vector<1x8x8xf32>
    %44 = vector.shape_cast %43 : vector<1x8x8xf32> to vector<8x8xf32>
    %cst_41 = arith.constant dense<0.000000e+00> : vector<8x1024xf32>
    %45 = tpu.matmul %44, %42, %cst_41 {dimension_numbers = #tpu.dot_dimension_numbers<[1], [0], [0], [1], [0, 0, 1, 1], [], []>} : vector<8x8xf32>, vector<8x1024xf32>, vector<8x1024xf32> -> vector<8x1024xf32>
    %46 = arith.addf %40, %45 : vector<8x1024xf32>
    %c0_42 = arith.constant 0 : index
    %c0_43 = arith.constant 0 : index
    %c22 = arith.constant 22 : index
    %47 = vector.load %arg1[%c0_42, %c0_43, %c22] : memref<1x8x1280xf32, #tpu.memory_space<vmem>>, vector<1x8x1024xf32>
    %48 = vector.shape_cast %47 : vector<1x8x1024xf32> to vector<8x1024xf32>
    %c8 = arith.constant 8 : index
    %c0_44 = arith.constant 0 : index
    %c0_45 = arith.constant 0 : index
    %49 = vector.load %arg2[%c8, %c0_44, %c0_45] : memref<27x8x8xf32, #tpu.memory_space<vmem>>, vector<1x8x8xf32>
    %50 = vector.shape_cast %49 : vector<1x8x8xf32> to vector<8x8xf32>
    %cst_46 = arith.constant dense<0.000000e+00> : vector<8x1024xf32>
    %51 = tpu.matmul %50, %48, %cst_46 {dimension_numbers = #tpu.dot_dimension_numbers<[1], [0], [0], [1], [0, 0, 1, 1], [], []>} : vector<8x8xf32>, vector<8x1024xf32>, vector<8x1024xf32> -> vector<8x1024xf32>
    %52 = arith.addf %46, %51 : vector<8x1024xf32>
    %c0_47 = arith.constant 0 : index
    %c0_48 = arith.constant 0 : index
    %c100 = arith.constant 100 : index
    %53 = vector.load %arg1[%c0_47, %c0_48, %c100] : memref<1x8x1280xf32, #tpu.memory_space<vmem>>, vector<1x8x1024xf32>
    %54 = vector.shape_cast %53 : vector<1x8x1024xf32> to vector<8x1024xf32>
    %c9 = arith.constant 9 : index
    %c0_49 = arith.constant 0 : index
    %c0_50 = arith.constant 0 : index
    %55 = vector.load %arg2[%c9, %c0_49, %c0_50] : memref<27x8x8xf32, #tpu.memory_space<vmem>>, vector<1x8x8xf32>
    %56 = vector.shape_cast %55 : vector<1x8x8xf32> to vector<8x8xf32>
    %cst_51 = arith.constant dense<0.000000e+00> : vector<8x1024xf32>
    %57 = tpu.matmul %56, %54, %cst_51 {dimension_numbers = #tpu.dot_dimension_numbers<[1], [0], [0], [1], [0, 0, 1, 1], [], []>} : vector<8x8xf32>, vector<8x1024xf32>, vector<8x1024xf32> -> vector<8x1024xf32>
    %58 = arith.addf %52, %57 : vector<8x1024xf32>
    %c0_52 = arith.constant 0 : index
    %c0_53 = arith.constant 0 : index
    %c101 = arith.constant 101 : index
    %59 = vector.load %arg1[%c0_52, %c0_53, %c101] : memref<1x8x1280xf32, #tpu.memory_space<vmem>>, vector<1x8x1024xf32>
    %60 = vector.shape_cast %59 : vector<1x8x1024xf32> to vector<8x1024xf32>
    %c10_54 = arith.constant 10 : index
    %c0_55 = arith.constant 0 : index
    %c0_56 = arith.constant 0 : index
    %61 = vector.load %arg2[%c10_54, %c0_55, %c0_56] : memref<27x8x8xf32, #tpu.memory_space<vmem>>, vector<1x8x8xf32>
    %62 = vector.shape_cast %61 : vector<1x8x8xf32> to vector<8x8xf32>
    %cst_57 = arith.constant dense<0.000000e+00> : vector<8x1024xf32>
    %63 = tpu.matmul %62, %60, %cst_57 {dimension_numbers = #tpu.dot_dimension_numbers<[1], [0], [0], [1], [0, 0, 1, 1], [], []>} : vector<8x8xf32>, vector<8x1024xf32>, vector<8x1024xf32> -> vector<8x1024xf32>
    %64 = arith.addf %58, %63 : vector<8x1024xf32>
    %c0_58 = arith.constant 0 : index
    %c0_59 = arith.constant 0 : index
    %c102 = arith.constant 102 : index
    %65 = vector.load %arg1[%c0_58, %c0_59, %c102] : memref<1x8x1280xf32, #tpu.memory_space<vmem>>, vector<1x8x1024xf32>
    %66 = vector.shape_cast %65 : vector<1x8x1024xf32> to vector<8x1024xf32>
    %c11_60 = arith.constant 11 : index
    %c0_61 = arith.constant 0 : index
    %c0_62 = arith.constant 0 : index
    %67 = vector.load %arg2[%c11_60, %c0_61, %c0_62] : memref<27x8x8xf32, #tpu.memory_space<vmem>>, vector<1x8x8xf32>
    %68 = vector.shape_cast %67 : vector<1x8x8xf32> to vector<8x8xf32>
    %cst_63 = arith.constant dense<0.000000e+00> : vector<8x1024xf32>
    %69 = tpu.matmul %68, %66, %cst_63 {dimension_numbers = #tpu.dot_dimension_numbers<[1], [0], [0], [1], [0, 0, 1, 1], [], []>} : vector<8x8xf32>, vector<8x1024xf32>, vector<8x1024xf32> -> vector<8x1024xf32>
    %70 = arith.addf %64, %69 : vector<8x1024xf32>
    %c0_64 = arith.constant 0 : index
    %c0_65 = arith.constant 0 : index
    %c110 = arith.constant 110 : index
    %71 = vector.load %arg1[%c0_64, %c0_65, %c110] : memref<1x8x1280xf32, #tpu.memory_space<vmem>>, vector<1x8x1024xf32>
    %72 = vector.shape_cast %71 : vector<1x8x1024xf32> to vector<8x1024xf32>
    %c12_66 = arith.constant 12 : index
    %c0_67 = arith.constant 0 : index
    %c0_68 = arith.constant 0 : index
    %73 = vector.load %arg2[%c12_66, %c0_67, %c0_68] : memref<27x8x8xf32, #tpu.memory_space<vmem>>, vector<1x8x8xf32>
    %74 = vector.shape_cast %73 : vector<1x8x8xf32> to vector<8x8xf32>
    %cst_69 = arith.constant dense<0.000000e+00> : vector<8x1024xf32>
    %75 = tpu.matmul %74, %72, %cst_69 {dimension_numbers = #tpu.dot_dimension_numbers<[1], [0], [0], [1], [0, 0, 1, 1], [], []>} : vector<8x8xf32>, vector<8x1024xf32>, vector<8x1024xf32> -> vector<8x1024xf32>
    %76 = arith.addf %70, %75 : vector<8x1024xf32>
    %c0_70 = arith.constant 0 : index
    %c0_71 = arith.constant 0 : index
    %c111 = arith.constant 111 : index
    %77 = vector.load %arg1[%c0_70, %c0_71, %c111] : memref<1x8x1280xf32, #tpu.memory_space<vmem>>, vector<1x8x1024xf32>
    %78 = vector.shape_cast %77 : vector<1x8x1024xf32> to vector<8x1024xf32>
    %c13 = arith.constant 13 : index
    %c0_72 = arith.constant 0 : index
    %c0_73 = arith.constant 0 : index
    %79 = vector.load %arg2[%c13, %c0_72, %c0_73] : memref<27x8x8xf32, #tpu.memory_space<vmem>>, vector<1x8x8xf32>
    %80 = vector.shape_cast %79 : vector<1x8x8xf32> to vector<8x8xf32>
    %cst_74 = arith.constant dense<0.000000e+00> : vector<8x1024xf32>
    %81 = tpu.matmul %80, %78, %cst_74 {dimension_numbers = #tpu.dot_dimension_numbers<[1], [0], [0], [1], [0, 0, 1, 1], [], []>} : vector<8x8xf32>, vector<8x1024xf32>, vector<8x1024xf32> -> vector<8x1024xf32>
    %82 = arith.addf %76, %81 : vector<8x1024xf32>
    %c0_75 = arith.constant 0 : index
    %c0_76 = arith.constant 0 : index
    %c112 = arith.constant 112 : index
    %83 = vector.load %arg1[%c0_75, %c0_76, %c112] : memref<1x8x1280xf32, #tpu.memory_space<vmem>>, vector<1x8x1024xf32>
    %84 = vector.shape_cast %83 : vector<1x8x1024xf32> to vector<8x1024xf32>
    %c14 = arith.constant 14 : index
    %c0_77 = arith.constant 0 : index
    %c0_78 = arith.constant 0 : index
    %85 = vector.load %arg2[%c14, %c0_77, %c0_78] : memref<27x8x8xf32, #tpu.memory_space<vmem>>, vector<1x8x8xf32>
    %86 = vector.shape_cast %85 : vector<1x8x8xf32> to vector<8x8xf32>
    %cst_79 = arith.constant dense<0.000000e+00> : vector<8x1024xf32>
    %87 = tpu.matmul %86, %84, %cst_79 {dimension_numbers = #tpu.dot_dimension_numbers<[1], [0], [0], [1], [0, 0, 1, 1], [], []>} : vector<8x8xf32>, vector<8x1024xf32>, vector<8x1024xf32> -> vector<8x1024xf32>
    %88 = arith.addf %82, %87 : vector<8x1024xf32>
    %c0_80 = arith.constant 0 : index
    %c0_81 = arith.constant 0 : index
    %c120 = arith.constant 120 : index
    %89 = vector.load %arg1[%c0_80, %c0_81, %c120] : memref<1x8x1280xf32, #tpu.memory_space<vmem>>, vector<1x8x1024xf32>
    %90 = vector.shape_cast %89 : vector<1x8x1024xf32> to vector<8x1024xf32>
    %c15 = arith.constant 15 : index
    %c0_82 = arith.constant 0 : index
    %c0_83 = arith.constant 0 : index
    %91 = vector.load %arg2[%c15, %c0_82, %c0_83] : memref<27x8x8xf32, #tpu.memory_space<vmem>>, vector<1x8x8xf32>
    %92 = vector.shape_cast %91 : vector<1x8x8xf32> to vector<8x8xf32>
    %cst_84 = arith.constant dense<0.000000e+00> : vector<8x1024xf32>
    %93 = tpu.matmul %92, %90, %cst_84 {dimension_numbers = #tpu.dot_dimension_numbers<[1], [0], [0], [1], [0, 0, 1, 1], [], []>} : vector<8x8xf32>, vector<8x1024xf32>, vector<8x1024xf32> -> vector<8x1024xf32>
    %94 = arith.addf %88, %93 : vector<8x1024xf32>
    %c0_85 = arith.constant 0 : index
    %c0_86 = arith.constant 0 : index
    %c121 = arith.constant 121 : index
    %95 = vector.load %arg1[%c0_85, %c0_86, %c121] : memref<1x8x1280xf32, #tpu.memory_space<vmem>>, vector<1x8x1024xf32>
    %96 = vector.shape_cast %95 : vector<1x8x1024xf32> to vector<8x1024xf32>
    %c16 = arith.constant 16 : index
    %c0_87 = arith.constant 0 : index
    %c0_88 = arith.constant 0 : index
    %97 = vector.load %arg2[%c16, %c0_87, %c0_88] : memref<27x8x8xf32, #tpu.memory_space<vmem>>, vector<1x8x8xf32>
    %98 = vector.shape_cast %97 : vector<1x8x8xf32> to vector<8x8xf32>
    %cst_89 = arith.constant dense<0.000000e+00> : vector<8x1024xf32>
    %99 = tpu.matmul %98, %96, %cst_89 {dimension_numbers = #tpu.dot_dimension_numbers<[1], [0], [0], [1], [0, 0, 1, 1], [], []>} : vector<8x8xf32>, vector<8x1024xf32>, vector<8x1024xf32> -> vector<8x1024xf32>
    %100 = arith.addf %94, %99 : vector<8x1024xf32>
    %c0_90 = arith.constant 0 : index
    %c0_91 = arith.constant 0 : index
    %c122 = arith.constant 122 : index
    %101 = vector.load %arg1[%c0_90, %c0_91, %c122] : memref<1x8x1280xf32, #tpu.memory_space<vmem>>, vector<1x8x1024xf32>
    %102 = vector.shape_cast %101 : vector<1x8x1024xf32> to vector<8x1024xf32>
    %c17 = arith.constant 17 : index
    %c0_92 = arith.constant 0 : index
    %c0_93 = arith.constant 0 : index
    %103 = vector.load %arg2[%c17, %c0_92, %c0_93] : memref<27x8x8xf32, #tpu.memory_space<vmem>>, vector<1x8x8xf32>
    %104 = vector.shape_cast %103 : vector<1x8x8xf32> to vector<8x8xf32>
    %cst_94 = arith.constant dense<0.000000e+00> : vector<8x1024xf32>
    %105 = tpu.matmul %104, %102, %cst_94 {dimension_numbers = #tpu.dot_dimension_numbers<[1], [0], [0], [1], [0, 0, 1, 1], [], []>} : vector<8x8xf32>, vector<8x1024xf32>, vector<8x1024xf32> -> vector<8x1024xf32>
    %106 = arith.addf %100, %105 : vector<8x1024xf32>
    %c0_95 = arith.constant 0 : index
    %c0_96 = arith.constant 0 : index
    %c200 = arith.constant 200 : index
    %107 = vector.load %arg1[%c0_95, %c0_96, %c200] : memref<1x8x1280xf32, #tpu.memory_space<vmem>>, vector<1x8x1024xf32>
    %108 = vector.shape_cast %107 : vector<1x8x1024xf32> to vector<8x1024xf32>
    %c18 = arith.constant 18 : index
    %c0_97 = arith.constant 0 : index
    %c0_98 = arith.constant 0 : index
    %109 = vector.load %arg2[%c18, %c0_97, %c0_98] : memref<27x8x8xf32, #tpu.memory_space<vmem>>, vector<1x8x8xf32>
    %110 = vector.shape_cast %109 : vector<1x8x8xf32> to vector<8x8xf32>
    %cst_99 = arith.constant dense<0.000000e+00> : vector<8x1024xf32>
    %111 = tpu.matmul %110, %108, %cst_99 {dimension_numbers = #tpu.dot_dimension_numbers<[1], [0], [0], [1], [0, 0, 1, 1], [], []>} : vector<8x8xf32>, vector<8x1024xf32>, vector<8x1024xf32> -> vector<8x1024xf32>
    %112 = arith.addf %106, %111 : vector<8x1024xf32>
    %c0_100 = arith.constant 0 : index
    %c0_101 = arith.constant 0 : index
    %c201 = arith.constant 201 : index
    %113 = vector.load %arg1[%c0_100, %c0_101, %c201] : memref<1x8x1280xf32, #tpu.memory_space<vmem>>, vector<1x8x1024xf32>
    %114 = vector.shape_cast %113 : vector<1x8x1024xf32> to vector<8x1024xf32>
    %c19 = arith.constant 19 : index
    %c0_102 = arith.constant 0 : index
    %c0_103 = arith.constant 0 : index
    %115 = vector.load %arg2[%c19, %c0_102, %c0_103] : memref<27x8x8xf32, #tpu.memory_space<vmem>>, vector<1x8x8xf32>
    %116 = vector.shape_cast %115 : vector<1x8x8xf32> to vector<8x8xf32>
    %cst_104 = arith.constant dense<0.000000e+00> : vector<8x1024xf32>
    %117 = tpu.matmul %116, %114, %cst_104 {dimension_numbers = #tpu.dot_dimension_numbers<[1], [0], [0], [1], [0, 0, 1, 1], [], []>} : vector<8x8xf32>, vector<8x1024xf32>, vector<8x1024xf32> -> vector<8x1024xf32>
    %118 = arith.addf %112, %117 : vector<8x1024xf32>
    %c0_105 = arith.constant 0 : index
    %c0_106 = arith.constant 0 : index
    %c202 = arith.constant 202 : index
    %119 = vector.load %arg1[%c0_105, %c0_106, %c202] : memref<1x8x1280xf32, #tpu.memory_space<vmem>>, vector<1x8x1024xf32>
    %120 = vector.shape_cast %119 : vector<1x8x1024xf32> to vector<8x1024xf32>
    %c20_107 = arith.constant 20 : index
    %c0_108 = arith.constant 0 : index
    %c0_109 = arith.constant 0 : index
    %121 = vector.load %arg2[%c20_107, %c0_108, %c0_109] : memref<27x8x8xf32, #tpu.memory_space<vmem>>, vector<1x8x8xf32>
    %122 = vector.shape_cast %121 : vector<1x8x8xf32> to vector<8x8xf32>
    %cst_110 = arith.constant dense<0.000000e+00> : vector<8x1024xf32>
    %123 = tpu.matmul %122, %120, %cst_110 {dimension_numbers = #tpu.dot_dimension_numbers<[1], [0], [0], [1], [0, 0, 1, 1], [], []>} : vector<8x8xf32>, vector<8x1024xf32>, vector<8x1024xf32> -> vector<8x1024xf32>
    %124 = arith.addf %118, %123 : vector<8x1024xf32>
    %c0_111 = arith.constant 0 : index
    %c0_112 = arith.constant 0 : index
    %c210 = arith.constant 210 : index
    %125 = vector.load %arg1[%c0_111, %c0_112, %c210] : memref<1x8x1280xf32, #tpu.memory_space<vmem>>, vector<1x8x1024xf32>
    %126 = vector.shape_cast %125 : vector<1x8x1024xf32> to vector<8x1024xf32>
    %c21_113 = arith.constant 21 : index
    %c0_114 = arith.constant 0 : index
    %c0_115 = arith.constant 0 : index
    %127 = vector.load %arg2[%c21_113, %c0_114, %c0_115] : memref<27x8x8xf32, #tpu.memory_space<vmem>>, vector<1x8x8xf32>
    %128 = vector.shape_cast %127 : vector<1x8x8xf32> to vector<8x8xf32>
    %cst_116 = arith.constant dense<0.000000e+00> : vector<8x1024xf32>
    %129 = tpu.matmul %128, %126, %cst_116 {dimension_numbers = #tpu.dot_dimension_numbers<[1], [0], [0], [1], [0, 0, 1, 1], [], []>} : vector<8x8xf32>, vector<8x1024xf32>, vector<8x1024xf32> -> vector<8x1024xf32>
    %130 = arith.addf %124, %129 : vector<8x1024xf32>
    %c0_117 = arith.constant 0 : index
    %c0_118 = arith.constant 0 : index
    %c211 = arith.constant 211 : index
    %131 = vector.load %arg1[%c0_117, %c0_118, %c211] : memref<1x8x1280xf32, #tpu.memory_space<vmem>>, vector<1x8x1024xf32>
    %132 = vector.shape_cast %131 : vector<1x8x1024xf32> to vector<8x1024xf32>
    %c22_119 = arith.constant 22 : index
    %c0_120 = arith.constant 0 : index
    %c0_121 = arith.constant 0 : index
    %133 = vector.load %arg2[%c22_119, %c0_120, %c0_121] : memref<27x8x8xf32, #tpu.memory_space<vmem>>, vector<1x8x8xf32>
    %134 = vector.shape_cast %133 : vector<1x8x8xf32> to vector<8x8xf32>
    %cst_122 = arith.constant dense<0.000000e+00> : vector<8x1024xf32>
    %135 = tpu.matmul %134, %132, %cst_122 {dimension_numbers = #tpu.dot_dimension_numbers<[1], [0], [0], [1], [0, 0, 1, 1], [], []>} : vector<8x8xf32>, vector<8x1024xf32>, vector<8x1024xf32> -> vector<8x1024xf32>
    %136 = arith.addf %130, %135 : vector<8x1024xf32>
    %c0_123 = arith.constant 0 : index
    %c0_124 = arith.constant 0 : index
    %c212 = arith.constant 212 : index
    %137 = vector.load %arg1[%c0_123, %c0_124, %c212] : memref<1x8x1280xf32, #tpu.memory_space<vmem>>, vector<1x8x1024xf32>
    %138 = vector.shape_cast %137 : vector<1x8x1024xf32> to vector<8x1024xf32>
    %c23 = arith.constant 23 : index
    %c0_125 = arith.constant 0 : index
    %c0_126 = arith.constant 0 : index
    %139 = vector.load %arg2[%c23, %c0_125, %c0_126] : memref<27x8x8xf32, #tpu.memory_space<vmem>>, vector<1x8x8xf32>
    %140 = vector.shape_cast %139 : vector<1x8x8xf32> to vector<8x8xf32>
    %cst_127 = arith.constant dense<0.000000e+00> : vector<8x1024xf32>
    %141 = tpu.matmul %140, %138, %cst_127 {dimension_numbers = #tpu.dot_dimension_numbers<[1], [0], [0], [1], [0, 0, 1, 1], [], []>} : vector<8x8xf32>, vector<8x1024xf32>, vector<8x1024xf32> -> vector<8x1024xf32>
    %142 = arith.addf %136, %141 : vector<8x1024xf32>
    %c0_128 = arith.constant 0 : index
    %c0_129 = arith.constant 0 : index
    %c220 = arith.constant 220 : index
    %143 = vector.load %arg1[%c0_128, %c0_129, %c220] : memref<1x8x1280xf32, #tpu.memory_space<vmem>>, vector<1x8x1024xf32>
    %144 = vector.shape_cast %143 : vector<1x8x1024xf32> to vector<8x1024xf32>
    %c24 = arith.constant 24 : index
    %c0_130 = arith.constant 0 : index
    %c0_131 = arith.constant 0 : index
    %145 = vector.load %arg2[%c24, %c0_130, %c0_131] : memref<27x8x8xf32, #tpu.memory_space<vmem>>, vector<1x8x8xf32>
    %146 = vector.shape_cast %145 : vector<1x8x8xf32> to vector<8x8xf32>
    %cst_132 = arith.constant dense<0.000000e+00> : vector<8x1024xf32>
    %147 = tpu.matmul %146, %144, %cst_132 {dimension_numbers = #tpu.dot_dimension_numbers<[1], [0], [0], [1], [0, 0, 1, 1], [], []>} : vector<8x8xf32>, vector<8x1024xf32>, vector<8x1024xf32> -> vector<8x1024xf32>
    %148 = arith.addf %142, %147 : vector<8x1024xf32>
    %c0_133 = arith.constant 0 : index
    %c0_134 = arith.constant 0 : index
    %c221 = arith.constant 221 : index
    %149 = vector.load %arg1[%c0_133, %c0_134, %c221] : memref<1x8x1280xf32, #tpu.memory_space<vmem>>, vector<1x8x1024xf32>
    %150 = vector.shape_cast %149 : vector<1x8x1024xf32> to vector<8x1024xf32>
    %c25 = arith.constant 25 : index
    %c0_135 = arith.constant 0 : index
    %c0_136 = arith.constant 0 : index
    %151 = vector.load %arg2[%c25, %c0_135, %c0_136] : memref<27x8x8xf32, #tpu.memory_space<vmem>>, vector<1x8x8xf32>
    %152 = vector.shape_cast %151 : vector<1x8x8xf32> to vector<8x8xf32>
    %cst_137 = arith.constant dense<0.000000e+00> : vector<8x1024xf32>
    %153 = tpu.matmul %152, %150, %cst_137 {dimension_numbers = #tpu.dot_dimension_numbers<[1], [0], [0], [1], [0, 0, 1, 1], [], []>} : vector<8x8xf32>, vector<8x1024xf32>, vector<8x1024xf32> -> vector<8x1024xf32>
    %154 = arith.addf %148, %153 : vector<8x1024xf32>
    %c0_138 = arith.constant 0 : index
    %c0_139 = arith.constant 0 : index
    %c222 = arith.constant 222 : index
    %155 = vector.load %arg1[%c0_138, %c0_139, %c222] : memref<1x8x1280xf32, #tpu.memory_space<vmem>>, vector<1x8x1024xf32>
    %156 = vector.shape_cast %155 : vector<1x8x1024xf32> to vector<8x1024xf32>
    %c26 = arith.constant 26 : index
    %c0_140 = arith.constant 0 : index
    %c0_141 = arith.constant 0 : index
    %157 = vector.load %arg2[%c26, %c0_140, %c0_141] : memref<27x8x8xf32, #tpu.memory_space<vmem>>, vector<1x8x8xf32>
    %158 = vector.shape_cast %157 : vector<1x8x8xf32> to vector<8x8xf32>
    %cst_142 = arith.constant dense<0.000000e+00> : vector<8x1024xf32>
    %159 = tpu.matmul %158, %156, %cst_142 {dimension_numbers = #tpu.dot_dimension_numbers<[1], [0], [0], [1], [0, 0, 1, 1], [], []>} : vector<8x8xf32>, vector<8x1024xf32>, vector<8x1024xf32> -> vector<8x1024xf32>
    %160 = arith.addf %154, %159 : vector<8x1024xf32>
    %c0_143 = arith.constant 0 : index
    %c0_144 = arith.constant 0 : index
    %161 = vector.load %arg3[%c0_143, %c0_144] : memref<1x1024xf32, #tpu.memory_space<vmem>>, vector<1x1024xf32>
    %162 = vector.broadcast %161 : vector<1x1024xf32> to vector<8x1024xf32>
    %163 = arith.mulf %160, %162 : vector<8x1024xf32>
    %cst_145 = arith.constant dense<0.000000e+00> : vector<8xf32>
    %164 = vector.multi_reduction <add>, %163, %cst_145 [1] : vector<8x1024xf32> to vector<8xf32>
    %165 = vector.shape_cast %164 : vector<8xf32> to vector<8x1xf32>
    %166 = arith.mulf %163, %163 : vector<8x1024xf32>
    %cst_146 = arith.constant dense<0.000000e+00> : vector<8xf32>
    %167 = vector.multi_reduction <add>, %166, %cst_146 [1] : vector<8x1024xf32> to vector<8xf32>
    %168 = vector.shape_cast %167 : vector<8xf32> to vector<8x1xf32>
    %cst_147 = arith.constant 0.001953125 : f32
    %169 = vector.broadcast %cst_147 : f32 to vector<8x1xf32>
    %170 = arith.mulf %165, %169 : vector<8x1xf32>
    %cst_148 = arith.constant 0.001953125 : f32
    %171 = vector.broadcast %cst_148 : f32 to vector<8x1xf32>
    %172 = arith.mulf %168, %171 : vector<8x1xf32>
    %173 = arith.mulf %170, %170 : vector<8x1xf32>
    %174 = arith.subf %172, %173 : vector<8x1xf32>
    %cst_149 = arith.constant 0.000000e+00 : f32
    %175 = vector.broadcast %cst_149 : f32 to vector<8x1xf32>
    %176 = arith.maximumf %174, %175 : vector<8x1xf32>
    %cst_150 = arith.constant 9.99999974E-6 : f32
    %177 = vector.broadcast %cst_150 : f32 to vector<8x1xf32>
    %178 = arith.addf %176, %177 : vector<8x1xf32>
    %179 = math.rsqrt %178 : vector<8x1xf32>
    %c0_151 = arith.constant 0 : index
    %c0_152 = arith.constant 0 : index
    %180 = vector.load %arg4[%c0_151, %c0_152] : memref<8x1xf32, #tpu.memory_space<vmem>>, vector<8x1xf32>
    %181 = arith.mulf %179, %180 : vector<8x1xf32>
    %c0_153 = arith.constant 0 : index
    %c0_154 = arith.constant 0 : index
    %182 = vector.load %arg5[%c0_153, %c0_154] : memref<8x1xf32, #tpu.memory_space<vmem>>, vector<8x1xf32>
    %183 = arith.mulf %170, %181 : vector<8x1xf32>
    %184 = arith.subf %182, %183 : vector<8x1xf32>
    %185 = vector.broadcast %181 : vector<8x1xf32> to vector<8x1024xf32>
    %186 = arith.mulf %163, %185 : vector<8x1024xf32>
    %187 = vector.broadcast %184 : vector<8x1xf32> to vector<8x1024xf32>
    %188 = arith.addf %186, %187 : vector<8x1024xf32>
    %cst_155 = arith.constant 0.000000e+00 : f32
    %189 = vector.broadcast %cst_155 : f32 to vector<8x1024xf32>
    %190 = arith.maximumf %188, %189 : vector<8x1024xf32>
    %c0_156 = arith.constant 0 : index
    %c0_157 = arith.constant 0 : index
    %c0_158 = arith.constant 0 : index
    %191 = vector.load %arg6[%c0_156, %c0_157, %c0_158] : memref<1x8x1024xf32, #tpu.memory_space<vmem>>, vector<1x8x1024xf32>
    %192 = vector.shape_cast %191 : vector<1x8x1024xf32> to vector<8x1024xf32>
    %193 = vector.shape_cast %190 : vector<8x1024xf32> to vector<1x8x1024xf32>
    tpu.vector_store %arg6[%c0_156, %c0_157, %c0_158], %193 {strides = array<i32>} : memref<1x8x1024xf32, #tpu.memory_space<vmem>>, vector<1x8x1024xf32>,
    return
  }
  func.func @transform_0(%arg0: i32) -> (i32, i32, i32) {
    %c0_i32 = arith.constant 0 : i32
    %c0_i32_0 = arith.constant 0 : i32
    %c0_i32_1 = arith.constant 0 : i32
    return %arg0, %c0_i32, %c0_i32_0 : i32, i32, i32
  }
  func.func @transform_1(%arg0: i32) -> (i32, i32, i32) {
    %c0_i32 = arith.constant 0 : i32
    %c0_i32_0 = arith.constant 0 : i32
    %c0_i32_1 = arith.constant 0 : i32
    %c0_i32_2 = arith.constant 0 : i32
    return %c0_i32, %c0_i32_0, %c0_i32_1 : i32, i32, i32
  }
  func.func @transform_2(%arg0: i32) -> (i32, i32) {
    %c0_i32 = arith.constant 0 : i32
    %c0_i32_0 = arith.constant 0 : i32
    %c0_i32_1 = arith.constant 0 : i32
    return %c0_i32, %c0_i32_0 : i32, i32
  }
  func.func @transform_3(%arg0: i32) -> (i32, i32) {
    %c0_i32 = arith.constant 0 : i32
    %c0_i32_0 = arith.constant 0 : i32
    %c0_i32_1 = arith.constant 0 : i32
    return %c0_i32, %c0_i32_0 : i32, i32
  }
  func.func @transform_4(%arg0: i32) -> (i32, i32) {
    %c0_i32 = arith.constant 0 : i32
    %c0_i32_0 = arith.constant 0 : i32
    %c0_i32_1 = arith.constant 0 : i32
    return %c0_i32, %c0_i32_0 : i32, i32
  }
  func.func @transform_5(%arg0: i32) -> (i32, i32, i32) {
    %c0_i32 = arith.constant 0 : i32
    %c0_i32_0 = arith.constant 0 : i32
    %c0_i32_1 = arith.constant 0 : i32
    return %arg0, %c0_i32, %c0_i32_0 : i32, i32, i32
  }
}

</mosaic_0001>

<bundles_post_ra>
// kernel: tpu_custom_call.1
= control target key start
LH: loop header
LB: loop body
LE: loop exit
PB: predicated region body
PF: predicated region fallthrough
CT: control target
= control target key end

     0   :  { %10 = vsyncpa [#allocation3], 0  ;;  %s8491_s0 = inlined_call_operand.vmem [shape: f32[2,8,1280], index: 0, kind: input, shape index: {}]   ;;  %s8492_s1 = inlined_call_operand.vmem [shape: f32[27,8,8], index: 1, kind: input, shape index: {}]   ;;  %s8493_s2 = inlined_call_operand.vmem [shape: f32[1,1024], index: 2, kind: input, shape index: {}]   ;;  %s8494_s3 = inlined_call_operand.vmem [shape: f32[8,1], index: 3, kind: input, shape index: {}]   ;;  %s8495_s4 = inlined_call_operand.vmem [shape: f32[8,1], index: 4, kind: input, shape index: {}]   ;;  %s8496_s5 = inlined_call_operand.hbm [shape: f32[2,8,1024], index: 5, kind: output, shape index: {}]  }
   0x1   :  { %12 = vsyncpa [#allocation3 + $0x1], 0  ;;  %s6989_s18 = smov 0   ;;  %s6991_s19 = smov 0  }
   0x2   :  { %s6993_s20 = smov 0   ;;  %s6995_s21 = smov 0  }
   0x3 LB: > { %s7010_s22 = sadd.s32 4294967295, %s6930_s21   ;;  %s6014_s23 = sadd.s32 4294967294, %s6930_s21   ;;  %s6930_s21 = sphi %s6995_s21, %s8528_s21   ;;  %s6926_s20 = sphi %s6993_s20, %s8527_s20   ;;  %s6922_s19 = sphi %s6991_s19, %s8526_s19   ;;  %s6918_s18 = sphi %s6989_s18, %s8525_s18  }
   0x4   : > { %s7014_s24 = sadd.s32 1, %s6930_s21   ;;  %s135_s25 = sadd.s32 1, %s6926_s20 }
   0x5   : > { %s132_s26 = ssub.s32 %s6930_s21, %s7014_s24  ;;  %p145_p0 = scmp.ne.s32.totalorder %s6926_s20, %s6922_s19 }
   0x6   : > { %p133_p1 = scmp.eq.s32.totalorder %s132_s26, 0  ;;  %p146_p2 = scmp.eq.s32.totalorder %s7010_s22, 1 }
   0x7   : > { %p151_p3 = scmp.ne.s32.totalorder %s6922_s19, %s6918_s18  ;;  %p152_p4 = scmp.eq.s32.totalorder %s6014_s23, 1 }
   0x8   : > { %s7025_s27 = scalar_select %p133_p1, %s6926_s20, %s135_s25  }
   0x9   : > { %p7027_p5 = por %p146_p2, %p145_p0  ;;  %p7031_p6 = por %p152_p4, %p151_p3 }
   0xa   : > { %p6017_p7 = scmp.ge.s32.totalorder %s6930_s21, 1  ;;  %p190_p8 = scmp.lt.s32.totalorder %s6930_s21, 3 }
   0xc   : > { %p191_p9 = pnand %p6017_p7, %p190_p8 }
   0xe   : > { %194 = sbr.rel (%p191_p9) target bundleno = 1005 (0x3ed), region = 40 }
  0x13   : > { %p218_p10 = scmp.lt.s32.totalorder %s7010_s22, 1  ;;  %s6932_s10 = smov 127   ;;  %vm262_vm0 = vcmask 1039360   ;;  %v6020_v21 = vld [vmem:[%s8492_s1 + $0x8] sm:$0xff]  ;;  %vm279_vm1 = vcmask 64512   ;;  %vm626_vm2 = vcmask 1031168  }
  0x14   : > { %s6933_s11 = smov 126   ;;  %s6934_s12 = smov 118   ;;  %v231_v42 = vld [vmem:[%s8492_s1] sm:$0xff]  ;;  %vm834_vm3 = vcmask 965632   ;;  %v6037_v61 = vld [vmem:[%s8492_s1 + $0x10] sm:$0xff]  ;;  %vm1042_vm4 = vcmask 957440  }
  0x15   : > { %s219_s30 = scalar_select %p218_p10, %s7010_s22, 1  ;;  %vm1250_vm5 = vcmask 949248   ;;  %vm1458_vm6 = vcmask 883712   ;;  %vm1666_vm7 = vcmask 875520   ;;  %vm1874_vm8 = vcmask 867328  }
  0x16   : > { %s6935_s13 = smov 117   ;;  %s6936_s14 = smov 116   ;;  %vm2082_vm9 = vcmask 228352   ;;  %vm2290_vm10 = vcmask 220160   ;;  %vm2498_vm11 = vcmask 211968   ;;  %vm2706_vm12 = vcmask 146432  }
  0x17   : > { %s6268_s6 = smul.u32 80, %s219_s30  ;;  %s6937_s15 = smov 108   ;;  %vm2914_vm13 = vcmask 138240   ;;  %vm3122_vm14 = vcmask 130048   ;;  %vm3537_vm15 = vcmask 56320  }
  0x18   : > { %s6938_s16 = smov 107   ;;  %s6939_s17 = smov 106  }
  0x19   : > { %s7042_s9 = scalar_lea.vmem %s8491_s0, %s6268_s6  ;;  %s6940_s23 = smov 28  }
  0x1a   : > { %v7045_v0 = vld [vmem:[%s7042_s9 + $0x20] sm:$0xff]  ;;  %v7048_v1 = vld [vmem:[%s7042_s9 + $0x28] sm:$0xff]  ;;  %v7068_v7 = vld [vmem:[%s7042_s9 + $0x30] sm:$0xff]  ;;  %s6941_s30 = smov 27   ;;  %s6942_s8 = smov 26  }
  0x1b   : > { %v7051_v2 = vld [vmem:[%s7042_s9] sm:$0xff]  ;;  %v6345_v3 = vpack.i.bf16 %v7048_v1, %v7045_v0  ;;  %v7056_v4 = vld [vmem:[%s7042_s9 + $0x8] sm:$0xff]  ;;  %v7071_v8 = vld [vmem:[%s7042_s9 + $0x38] sm:$0xff]  ;;  %v7094_v13 = vpack.i.bf16 %v7068_v7, %v7045_v0  ;;  %s215_s25 = sand.u32 1, %s6922_s19  }
  0x1c   : > { %v7060_v5 = vpack.i.bf16 %v7056_v4, %v7051_v2  ;;  %v7063_v6 = vld [vmem:[%s7042_s9 + $0x40] sm:$0xff]  ;;  %v7074_v9 = vld [vmem:[%s7042_s9 + $0x10] sm:$0xff]  ;;  %v7077_v10 = vld [vmem:[%s7042_s9 + $0x18] sm:$0xff]  ;;  %v6350_v11 = vpack.i.bf16 %v7071_v8, %v7068_v7  ;;  %v7101_v14 = vpack.i.bf16 %v7048_v1, %v7071_v8  ;;  %s6018_s26 = sshll.u32 %s215_s25, 6 }
  0x1d   : > { %6346 = vrot.lane.b32.xlu1 %v6345_v3, %s6932_s10  ;;  %260 = vrot.lane.b32.xlu2 %v7063_v6, %s6932_s10  ;;  %v7083_v12 = vpack.i.bf16 %v7077_v10, %v7074_v9 }
  0x1e   : > { %6336 = vrot.lane.b32.xlu0 %v7060_v5, %s6932_s10 }
  0x25   : > { %6351 = vrot.lane.b32.xlu1 %v6350_v11, %s6932_s10  ;;  %6356 = vrot.lane.b32.xlu2 %v7060_v5, %s6933_s11 }
  0x26   : > { %6341 = vrot.lane.b32.xlu0 %v7083_v12, %s6932_s10  ;;  %s217_s10 = scalar_lea.vmem [#allocation2], %s6018_s26 }
  0x2d   : > { %6366 = vrot.lane.b32.xlu1 %v6345_v3, %s6933_s11  ;;  %6371 = vrot.lane.b32.xlu2 %v6350_v11, %s6933_s11 }
  0x2e   : > { %6361 = vrot.lane.b32.xlu0 %v7083_v12, %s6933_s11 }
  0x35   : > { %6376 = vrot.lane.b32.xlu1 %v7060_v5, %s6934_s12  ;;  %6381 = vrot.lane.b32.xlu2 %v7083_v12, %s6934_s12 }
  0x36   : > { %624 = vrot.lane.b32.xlu0 %v7063_v6, %s6933_s11 }
  0x3d   : > { %6391 = vrot.lane.b32.xlu1 %v6350_v11, %s6934_s12  ;;  %832 = vrot.lane.b32.xlu2 %v7063_v6, %s6934_s12 }
  0x3e   : > { %6386 = vrot.lane.b32.xlu0 %v6345_v3, %s6934_s12  ;;  %s6943_s12 = smov 18  }
  0x45   : > { %6401 = vrot.lane.b32.xlu1 %v7060_v5, %s6935_s13  ;;  %6406 = vrot.lane.b32.xlu2 %v7094_v13, %s6935_s13 }
  0x46   : > { %6396 = vrot.lane.b32.xlu0 %v7083_v12, %s6935_s13 }
  0x4d   : > { %1040 = vrot.lane.b32.xlu1 %v7063_v6, %s6935_s13  ;;  %6416 = vrot.lane.b32.xlu2 %v7083_v12, %s6936_s14 }
  0x4e   : > { %6411 = vrot.lane.b32.xlu0 %v7101_v14, %s6935_s13 }
  0x55   : > { %6426 = vrot.lane.b32.xlu1 %v7094_v13, %s6936_s14  ;;  %6431 = vrot.lane.b32.xlu2 %v7101_v14, %s6936_s14 }
  0x56   : > { %6421 = vrot.lane.b32.xlu0 %v7060_v5, %s6936_s14 }
  0x5d   : > { %6436 = vrot.lane.b32.xlu1 %v7083_v12, %s6937_s15  ;;  %6441 = vrot.lane.b32.xlu2 %v7060_v5, %s6937_s15 }
  0x5e   : > { %1248 = vrot.lane.b32.xlu0 %v7063_v6, %s6936_s14 }
  0x65   : > { %6451 = vrot.lane.b32.xlu1 %v7101_v14, %s6937_s15  ;;  %1456 = vrot.lane.b32.xlu2 %v7063_v6, %s6937_s15 }
  0x66   : > { %6446 = vrot.lane.b32.xlu0 %v7094_v13, %s6937_s15  ;;  %s6944_s15 = smov 17  }
  0x6d   : > { %6461 = vrot.lane.b32.xlu1 %v7060_v5, %s6938_s16  ;;  %6466 = vrot.lane.b32.xlu2 %v7094_v13, %s6938_s16 }
  0x6e   : > { %6456 = vrot.lane.b32.xlu0 %v7083_v12, %s6938_s16 }
  0x75   : > { %1664 = vrot.lane.b32.xlu1 %v7063_v6, %s6938_s16  ;;  %6476 = vrot.lane.b32.xlu2 %v7083_v12, %s6939_s17 }
  0x76   : > { %6471 = vrot.lane.b32.xlu0 %v7101_v14, %s6938_s16  ;;  %s6888_s16 = scalar_lea.hbm %s8496_s5, 128 }
  0x77   : > { %v261_v24 = vpop.permute.xlu2 %260 }
  0x7d   : > { %6486 = vrot.lane.b32.xlu1 %v7094_v13, %s6939_s17  ;;  %6491 = vrot.lane.b32.xlu2 %v7101_v14, %s6939_s17 }
  0x7e   : > { %6481 = vrot.lane.b32.xlu0 %v7060_v5, %s6939_s17 }
  0x7f   : > { %v6357_v35 = vpop.permute.xlu2 %6356 }
  0x80   : > { %v6359_v40 = vunpack.i.h.bf16 %v6357_v35  ;;  %v6358_v41 = vunpack.i.l.bf16 %v6357_v35 }
  0x82   : > { %v627_v44 = vsel %vm626_vm2, %v6358_v41, %v6359_v40 }
  0x85   : > { %6496 = vrot.lane.b32.xlu1 %v7083_v12, %s6940_s23  ;;  %6501 = vrot.lane.b32.xlu2 %v7060_v5, %s6940_s23 }
  0x86   : > { %1872 = vrot.lane.b32.xlu0 %v7063_v6, %s6939_s17 }
  0x87   : > { %v6372_v43 = vpop.permute.xlu2 %6371 }
  0x88   : > { %v6373_v56 = vunpack.i.l.bf16 %v6372_v43  ;;  %v6374_v58 = vunpack.i.h.bf16 %v6372_v43 }
  0x8d   : > { %6511 = vrot.lane.b32.xlu1 %v7101_v14, %s6940_s23  ;;  %2080 = vrot.lane.b32.xlu2 %v7063_v6, %s6940_s23 }
  0x8e   : > { %6506 = vrot.lane.b32.xlu0 %v7094_v13, %s6940_s23  ;;  %s6945_s23 = smov 16  }
  0x8f   : > { %v6347_v15 = vpop.permute.xlu1 %6346  ;;  %v6382_v52 = vpop.permute.xlu2 %6381 }
  0x90   : > { %v6349_v16 = vunpack.i.h.bf16 %v6347_v15  ;;  %v6348_v17 = vunpack.i.l.bf16 %v6347_v15  ;;  %v6337_v18 = vpop.permute.xlu0 %6336 }
  0x91   : > { %v6339_v19 = vunpack.i.h.bf16 %v6337_v18  ;;  %v6338_v20 = vunpack.i.l.bf16 %v6337_v18 }
  0x92   : > { %v267_v23 = vsel %vm262_vm0, %v6348_v17, %v6349_v16 }
  0x93   : > { %v263_v22 = vsel %vm262_vm0, %v6338_v20, %v6339_v19 }
  0x94   : > { %298 = vmatpush.msra.mxu0 %v263_v22 }
  0x95   : > { %6021 = vmatmul.msk.f32.vlgmr.msra.gmra.mxu0 %vm279_vm1, %v6020_v21  ;;  %6521 = vrot.lane.b32.xlu1 %v7060_v5, %s6941_s30 }
  0x96   : > { %378 = vmatpush.msrb.mxu0 %v267_v23  ;;  %6516 = vrot.lane.b32.xlu0 %v7083_v12, %s6941_s30 }
  0x97   : > { %v6352_v25 = vpop.permute.xlu1 %6351  ;;  %v833_v3 = vpop.permute.xlu2 %832  ;;  %6526 = vrot.lane.b32.xlu2 %v7094_v13, %s6941_s30 }
  0x98   : > { %461 = vmatpush.msra.mxu0 %v7051_v2  ;;  %v6353_v26 = vunpack.i.l.bf16 %v6352_v25  ;;  %v6342_v27 = vpop.permute.xlu0 %6341  ;;  %v6354_v28 = vunpack.i.h.bf16 %v6352_v25 }
  0x99   : > { %v6344_v29 = vunpack.i.h.bf16 %v6342_v27  ;;  %v6343_v30 = vunpack.i.l.bf16 %v6342_v27 }
  0x9a   : > { %v268_v34 = vsel %vm262_vm0, %v6349_v16, %v6353_v26  ;;  %v269_v36 = vsel %vm262_vm0, %v6353_v26, %v6354_v28  ;;  %v270_v37 = vsel %vm262_vm0, %v6354_v28, %v261_v24  ;;  %v6046_v24 = vld [vmem:[%s8492_s1 + $0x18] sm:$0xff] }
  0x9b   : > { %v264_v31 = vsel %vm262_vm0, %v6339_v19, %v6343_v30  ;;  %v265_v32 = vsel %vm262_vm0, %v6343_v30, %v6344_v29  ;;  %v266_v33 = vsel %vm262_vm0, %v6344_v29, %v6348_v17  ;;  %vm3745_vm0 = vcmask 48128  }
  0x9c   : > { %318 = vmatpush.msra.mxu1 %v264_v31  ;;  %338 = vmatpush.msra.mxu2 %v265_v32 }
  0x9d   : > { %358 = vmatpush.msra.mxu3 %v266_v33  ;;  %6022 = vmatmul.msk.f32.vlgmr.msra.gmra.mxu1 %vm279_vm1, %v6020_v21 }
  0x9e   : > { %6023 = vmatmul.msk.f32.vlgmr.msra.gmra.mxu2 %vm279_vm1, %v6020_v21  ;;  %6024 = vmatmul.msk.f32.vlgmr.msra.gmra.mxu3 %vm279_vm1, %v6020_v21 }
  0x9f   : > { %6025 = vmatmul.msk.f32.vlgmr.msrb.gmra.mxu0 %vm279_vm1, %v6020_v21  ;;  %398 = vmatpush.msrb.mxu1 %v268_v34  ;;  %v6367_v38 = vpop.permute.xlu1 %6366  ;;  %v6407_v20 = vpop.permute.xlu2 %6406 }
  0xa0   : > { %418 = vmatpush.msrb.mxu2 %v269_v36  ;;  %438 = vmatpush.msrb.mxu3 %v270_v37  ;;  %v6362_v39 = vpop.permute.xlu0 %6361  ;;  %v6368_v47 = vunpack.i.l.bf16 %v6367_v38  ;;  %v6369_v49 = vunpack.i.h.bf16 %v6367_v38  ;;  %v6408_v33 = vunpack.i.l.bf16 %v6407_v20  ;;  %v6409_v41 = vunpack.i.h.bf16 %v6407_v20 }
  0xa1   : > { %481 = vmatpush.msra.mxu1 %v7056_v4  ;;  %541 = vmatpush.msrb.mxu0 %v7045_v0  ;;  %v6363_v45 = vunpack.i.l.bf16 %v6362_v39  ;;  %v6364_v48 = vunpack.i.h.bf16 %v6362_v39  ;;  %v6383_v4 = vunpack.i.l.bf16 %v6382_v52 }
  0xa2   : > { %501 = vmatpush.msra.mxu2 %v7074_v9  ;;  %521 = vmatpush.msra.mxu3 %v7077_v10  ;;  %v631_v55 = vsel %vm626_vm2, %v6368_v47, %v6369_v49  ;;  %v632_v62 = vsel %vm626_vm2, %v6369_v49, %v6373_v56 }
  0xa3   : > { %6531 = vrot.lane.b32.xlu0 %v7101_v14, %s6941_s30  ;;  %2288 = vrot.lane.b32.xlu1 %v7063_v6, %s6941_s30  ;;  %v628_v51 = vsel %vm626_vm2, %v6359_v40, %v6363_v45  ;;  %v629_v53 = vsel %vm626_vm2, %v6363_v45, %v6364_v48  ;;  %v630_v54 = vsel %vm626_vm2, %v6364_v48, %v6368_v47  ;;  %s6946_s30 = smov 8  }
  0xa4   : > { %6536 = vrot.lane.b32.xlu2 %v7083_v12, %s6942_s8 }
  0xa5   : > { %6026 = vmatmul.msk.f32.vlgmr.msrb.gmra.mxu1 %vm279_vm1, %v6020_v21 }
  0xa6   : > { %6027 = vmatmul.msk.f32.vlgmr.msrb.gmra.mxu2 %vm279_vm1, %v6020_v21  ;;  %6028 = vmatmul.msk.f32.vlgmr.msrb.gmra.mxu3 %vm279_vm1, %v6020_v21 }
  0xa7   : > { %6029 = vmatmul.msk.f32.vlgmr.msra.gmra.mxu0 %vm279_vm1, %v231_v42  ;;  %581 = vmatpush.msrb.mxu2 %v7068_v7  ;;  %v6377_v50 = vpop.permute.xlu1 %6376  ;;  %v6384_v7 = vunpack.i.h.bf16 %v6382_v52  ;;  %v6417_v35 = vpop.permute.xlu2 %6416 }
  0xa8   : > { %601 = vmatpush.msrb.mxu3 %v7071_v8  ;;  %561 = vmatpush.msrb.mxu1 %v7048_v1  ;;  %v625_v46 = vpop.permute.xlu0 %624  ;;  %v6379_v59 = vunpack.i.h.bf16 %v6377_v50  ;;  %v6378_v60 = vunpack.i.l.bf16 %v6377_v50  ;;  %v633_v1 = vsel %vm626_vm2, %v6373_v56, %v6374_v58 }
  0xa9   : > { %661 = vmatpush.msra.mxu0 %v627_v44  ;;  %v634_v0 = vsel %vm626_vm2, %v6374_v58, %v625_v46  ;;  %v837_v15 = vsel %vm834_vm3, %v6383_v4, %v6384_v7  ;;  %v6055_v46 = vld [vmem:[%s8492_s1 + $0x20] sm:$0xff]  ;;  %vm3971_vm2 = vcmask 457728  }
  0xaa   : > { %v835_v2 = vsel %vm834_vm3, %v6378_v60, %v6379_v59  ;;  %v836_v11 = vsel %vm834_vm3, %v6379_v59, %v6383_v4  ;;  %v6064_v4 = vld [vmem:[%s8492_s1 + $0x28] sm:$0xff] }
  0xab   : > { %6541 = vrot.lane.b32.xlu0 %v7060_v5, %s6942_s8  ;;  %6546 = vrot.lane.b32.xlu1 %v7094_v13, %s6942_s8 }
  0xac   : > { %6551 = vrot.lane.b32.xlu2 %v7101_v14, %s6942_s8 }
  0xad   : > { %6030 = vmatmul.msk.f32.vlgmr.msra.gmra.mxu1 %vm279_vm1, %v231_v42 }
  0xae   : > { %6031 = vmatmul.msk.f32.vlgmr.msra.gmra.mxu2 %vm279_vm1, %v231_v42  ;;  %6032 = vmatmul.msk.f32.vlgmr.msra.gmra.mxu3 %vm279_vm1, %v231_v42 }
  0xaf   : > { %6033 = vmatmul.msk.f32.vlgmr.msrb.gmra.mxu0 %vm279_vm1, %v231_v42  ;;  %681 = vmatpush.msra.mxu1 %v628_v51  ;;  %v6392_v63 = vpop.permute.xlu1 %6391  ;;  %v6432_v48 = vpop.permute.xlu2 %6431 }
  0xb0   : > { %701 = vmatpush.msra.mxu2 %v629_v53  ;;  %721 = vmatpush.msra.mxu3 %v630_v54  ;;  %v6387_v57 = vpop.permute.xlu0 %6386  ;;  %v6393_v19 = vunpack.i.l.bf16 %v6392_v63  ;;  %v6394_v21 = vunpack.i.h.bf16 %v6392_v63  ;;  %v6418_v53 = vunpack.i.l.bf16 %v6417_v35  ;;  %v6419_v54 = vunpack.i.h.bf16 %v6417_v35 }
  0xb1   : > { %741 = vmatpush.msrb.mxu0 %v631_v55  ;;  %v6388_v8 = vunpack.i.l.bf16 %v6387_v57  ;;  %v6389_v9 = vunpack.i.h.bf16 %v6387_v57  ;;  %v6434_v56 = vunpack.i.h.bf16 %v6432_v48 }
  0xb2   : > { %v842_v27 = vsel %vm834_vm3, %v6394_v21, %v833_v3  ;;  %v841_v28 = vsel %vm834_vm3, %v6393_v19, %v6394_v21  ;;  %v1253_v59 = vsel %vm1250_vm5, %v6418_v53, %v6419_v54 }
  0xb3   : > { %2496 = vrot.lane.b32.xlu0 %v7063_v6, %s6942_s8  ;;  %6556 = vrot.lane.b32.xlu1 %v7083_v12, %s6943_s12  ;;  %v838_v16 = vsel %vm834_vm3, %v6384_v7, %v6388_v8  ;;  %v839_v17 = vsel %vm834_vm3, %v6388_v8, %v6389_v9  ;;  %v840_v25 = vsel %vm834_vm3, %v6389_v9, %v6393_v19  ;;  %s6947_s8 = smov 7   ;;  %vm4179_vm3 = vcmask 449536  }
  0xb4   : > { %6561 = vrot.lane.b32.xlu2 %v7060_v5, %s6943_s12 }
  0xb5   : > { %6034 = vmatmul.msk.f32.vlgmr.msrb.gmra.mxu1 %vm279_vm1, %v231_v42 }
  0xb6   : > { %6035 = vmatmul.msk.f32.vlgmr.msrb.gmra.mxu2 %vm279_vm1, %v231_v42  ;;  %6036 = vmatmul.msk.f32.vlgmr.msrb.gmra.mxu3 %vm279_vm1, %v231_v42 }
  0xb7   : > { %6038 = vmatmul.msk.f32.vlgmr.msra.gmra.mxu0 %vm279_vm1, %v6037_v61  ;;  %761 = vmatpush.msrb.mxu1 %v632_v62  ;;  %v6402_v18 = vpop.permute.xlu1 %6401  ;;  %v6442_v62 = vpop.permute.xlu2 %6441 }
  0xb8   : > { %781 = vmatpush.msrb.mxu2 %v633_v1  ;;  %801 = vmatpush.msrb.mxu3 %v634_v0  ;;  %v6397_v10 = vpop.permute.xlu0 %6396  ;;  %v6404_v22 = vunpack.i.h.bf16 %v6402_v18  ;;  %v6403_v23 = vunpack.i.l.bf16 %v6402_v18  ;;  %v6433_v1 = vunpack.i.l.bf16 %v6432_v48  ;;  %v6443_v3 = vunpack.i.l.bf16 %v6442_v62 }
  0xb9   : > { %869 = vmatpush.msra.mxu0 %v835_v2  ;;  %v6398_v31 = vunpack.i.l.bf16 %v6397_v10  ;;  %v6399_v32 = vunpack.i.h.bf16 %v6397_v10  ;;  %v6444_v2 = vunpack.i.h.bf16 %v6442_v62 }
  0xba   : > { %v1043_v29 = vsel %vm1042_vm4, %v6403_v23, %v6404_v22 }
  0xbb   : > { %6566 = vrot.lane.b32.xlu0 %v7094_v13, %s6943_s12  ;;  %6571 = vrot.lane.b32.xlu1 %v7101_v14, %s6943_s12  ;;  %v1044_v36 = vsel %vm1042_vm4, %v6404_v22, %v6398_v31  ;;  %v1045_v37 = vsel %vm1042_vm4, %v6398_v31, %v6399_v32  ;;  %v1046_v38 = vsel %vm1042_vm4, %v6399_v32, %v6408_v33  ;;  %v6073_v31 = vld [vmem:[%s8492_s1 + $0x30] sm:$0xff] }
  0xbc   : > { %2704 = vrot.lane.b32.xlu2 %v7063_v6, %s6943_s12  ;;  %s6948_s12 = smov 6  }
  0xbd   : > { %6039 = vmatmul.msk.f32.vlgmr.msra.gmra.mxu1 %vm279_vm1, %v6037_v61 }
  0xbe   : > { %6040 = vmatmul.msk.f32.vlgmr.msra.gmra.mxu2 %vm279_vm1, %v6037_v61  ;;  %6041 = vmatmul.msk.f32.vlgmr.msra.gmra.mxu3 %vm279_vm1, %v6037_v61 }
  0xbf   : > { %6042 = vmatmul.msk.f32.vlgmr.msrb.gmra.mxu0 %vm279_vm1, %v6037_v61  ;;  %889 = vmatpush.msra.mxu1 %v836_v11  ;;  %v1041_v30 = vpop.permute.xlu1 %1040  ;;  %v1459_v11 = vsel %vm1458_vm6, %v6443_v3, %v6444_v2 }
  0xc0   : > { %909 = vmatpush.msra.mxu2 %v837_v15  ;;  %929 = vmatpush.msra.mxu3 %v838_v16  ;;  %v6412_v26 = vpop.permute.xlu0 %6411  ;;  %v1457_v15 = vpop.permute.xlu2 %1456 }
  0xc1   : > { %949 = vmatpush.msrb.mxu0 %v839_v17  ;;  %v6414_v34 = vunpack.i.h.bf16 %v6412_v26  ;;  %v6413_v43 = vunpack.i.l.bf16 %v6412_v26 }
  0xc3   : > { %6576 = vrot.lane.b32.xlu0 %v7083_v12, %s6944_s15  ;;  %v1047_v39 = vsel %vm1042_vm4, %v6408_v33, %v6414_v34  ;;  %6581 = vrot.lane.b32.xlu1 %v7060_v5, %s6944_s15  ;;  %v1048_v47 = vsel %vm1042_vm4, %v6414_v34, %v6409_v41  ;;  %v1049_v49 = vsel %vm1042_vm4, %v6409_v41, %v6413_v43 }
  0xc4   : > { %v1050_v50 = vsel %vm1042_vm4, %v6413_v43, %v1041_v30  ;;  %6586 = vrot.lane.b32.xlu2 %v7094_v13, %s6944_s15  ;;  %vm4387_vm4 = vcmask 441344  }
  0xc5   : > { %6043 = vmatmul.msk.f32.vlgmr.msrb.gmra.mxu1 %vm279_vm1, %v6037_v61 }
  0xc6   : > { %6044 = vmatmul.msk.f32.vlgmr.msrb.gmra.mxu2 %vm279_vm1, %v6037_v61  ;;  %6045 = vmatmul.msk.f32.vlgmr.msrb.gmra.mxu3 %vm279_vm1, %v6037_v61 }
  0xc7   : > { %6047 = vmatmul.msk.f32.vlgmr.msra.gmra.mxu0 %vm279_vm1, %v6046_v24  ;;  %969 = vmatpush.msrb.mxu1 %v840_v25  ;;  %v6427_v42 = vpop.permute.xlu1 %6426 }
  0xc8   : > { %989 = vmatpush.msrb.mxu2 %v841_v28  ;;  %1009 = vmatpush.msrb.mxu3 %v842_v27  ;;  %v6422_v40 = vpop.permute.xlu0 %6421  ;;  %v6428_v55 = vunpack.i.l.bf16 %v6427_v42  ;;  %v6429_v63 = vunpack.i.h.bf16 %v6427_v42  ;;  %v6467_v27 = vpop.permute.xlu2 %6466 }
  0xc9   : > { %1077 = vmatpush.msra.mxu0 %v1043_v29  ;;  %v6424_v44 = vunpack.i.h.bf16 %v6422_v40  ;;  %v6423_v45 = vunpack.i.l.bf16 %v6422_v40  ;;  %v6468_v40 = vunpack.i.l.bf16 %v6467_v27  ;;  %v6469_v48 = vunpack.i.h.bf16 %v6467_v27  ;;  %v3935_v27 = vld [vmem:[%s7042_s9 + $0x18] sm:$0xff] }
  0xca   : > { %v1254_v60 = vsel %vm1250_vm5, %v6419_v54, %v6428_v55  ;;  %v1255_v61 = vsel %vm1250_vm5, %v6428_v55, %v6434_v56  ;;  %v1256_v7 = vsel %vm1250_vm5, %v6434_v56, %v6429_v63  ;;  %v1257_v9 = vsel %vm1250_vm5, %v6429_v63, %v6433_v1 }
  0xcb   : > { %6591 = vrot.lane.b32.xlu0 %v7101_v14, %s6944_s15  ;;  %v1251_v51 = vsel %vm1250_vm5, %v6423_v45, %v6424_v44  ;;  %2912 = vrot.lane.b32.xlu1 %v7063_v6, %s6944_s15  ;;  %v1252_v58 = vsel %vm1250_vm5, %v6424_v44, %v6418_v53  ;;  %s6949_s15 = smov 56  }
  0xcc   : > { %6596 = vrot.lane.b32.xlu2 %v7083_v12, %s6945_s23 }
  0xcd   : > { %6048 = vmatmul.msk.f32.vlgmr.msra.gmra.mxu1 %vm279_vm1, %v6046_v24 }
  0xce   : > { %6049 = vmatmul.msk.f32.vlgmr.msra.gmra.mxu2 %vm279_vm1, %v6046_v24  ;;  %6050 = vmatmul.msk.f32.vlgmr.msra.gmra.mxu3 %vm279_vm1, %v6046_v24 }
  0xcf   : > { %6051 = vmatmul.msk.f32.vlgmr.msrb.gmra.mxu0 %vm279_vm1, %v6046_v24  ;;  %1097 = vmatpush.msra.mxu1 %v1044_v36  ;;  %v6437_v57 = vpop.permute.xlu1 %6436 }
  0xd0   : > { %1117 = vmatpush.msra.mxu2 %v1045_v37  ;;  %1137 = vmatpush.msra.mxu3 %v1046_v38  ;;  %v1249_v52 = vpop.permute.xlu0 %1248  ;;  %v6438_v16 = vunpack.i.l.bf16 %v6437_v57  ;;  %v6439_v17 = vunpack.i.h.bf16 %v6437_v57  ;;  %v6477_v42 = vpop.permute.xlu2 %6476 }
  0xd1   : > { %1157 = vmatpush.msrb.mxu0 %v1047_v39  ;;  %v1258_v10 = vsel %vm1250_vm5, %v6433_v1, %v1249_v52  ;;  %v6082_v52 = vld [vmem:[%s8492_s1 + $0x38] sm:$0xff]  ;;  %vm4595_vm5 = vcmask 375808  }
  0xd2   : > { %v1460_v21 = vsel %vm1458_vm6, %v6444_v2, %v6438_v16  ;;  %v1461_v22 = vsel %vm1458_vm6, %v6438_v16, %v6439_v17 }
  0xd3   : > { %6601 = vrot.lane.b32.xlu0 %v7060_v5, %s6945_s23  ;;  %6606 = vrot.lane.b32.xlu1 %v7094_v13, %s6945_s23 }
  0xd4   : > { %6611 = vrot.lane.b32.xlu2 %v7101_v14, %s6945_s23 }
  0xd5   : > { %6052 = vmatmul.msk.f32.vlgmr.msrb.gmra.mxu1 %vm279_vm1, %v6046_v24 }
  0xd6   : > { %6053 = vmatmul.msk.f32.vlgmr.msrb.gmra.mxu2 %vm279_vm1, %v6046_v24  ;;  %6054 = vmatmul.msk.f32.vlgmr.msrb.gmra.mxu3 %vm279_vm1, %v6046_v24 }
  0xd7   : > { %6056 = vmatmul.msk.f32.vlgmr.msra.gmra.mxu0 %vm279_vm1, %v6055_v46  ;;  %1177 = vmatpush.msrb.mxu1 %v1048_v47  ;;  %v6452_v8 = vpop.permute.xlu1 %6451 }
  0xd8   : > { %1197 = vmatpush.msrb.mxu2 %v1049_v49  ;;  %1217 = vmatpush.msrb.mxu3 %v1050_v50  ;;  %v6447_v0 = vpop.permute.xlu0 %6446  ;;  %v6454_v19 = vunpack.i.h.bf16 %v6452_v8  ;;  %v6453_v28 = vunpack.i.l.bf16 %v6452_v8  ;;  %v6492_v54 = vpop.permute.xlu2 %6491 }
  0xd9   : > { %1285 = vmatpush.msra.mxu0 %v1251_v51  ;;  %v6448_v18 = vunpack.i.l.bf16 %v6447_v0  ;;  %v6449_v26 = vunpack.i.h.bf16 %v6447_v0  ;;  %v6493_v8 = vunpack.i.l.bf16 %v6492_v54 }
  0xda   : > { %v1466_v35 = vsel %vm1458_vm6, %v6453_v28, %v1457_v15  ;;  %v7373_v15 = vld [vmem:[%s8492_s1 + $0x40] sm:$0xff] }
  0xdb   : > { %3120 = vrot.lane.b32.xlu0 %v7063_v6, %s6945_s23  ;;  %6616 = vrot.lane.b32.xlu1 %v7083_v12, %s6946_s30  ;;  %v1462_v23 = vsel %vm1458_vm6, %v6439_v17, %v6448_v18  ;;  %v1463_v24 = vsel %vm1458_vm6, %v6448_v18, %v6454_v19  ;;  %v1464_v32 = vsel %vm1458_vm6, %v6454_v19, %v6449_v26  ;;  %s6950_s23 = smov 55  }
  0xdc   : > { %v1465_v34 = vsel %vm1458_vm6, %v6449_v26, %v6453_v28  ;;  %6621 = vrot.lane.b32.xlu2 %v7060_v5, %s6946_s30  ;;  %v3936_v28 = vld [vmem:[%s7042_s9 + $0x20] sm:$0xff]  ;;  %vm4803_vm6 = vcmask 367616  }
  0xdd   : > { %6057 = vmatmul.msk.f32.vlgmr.msra.gmra.mxu1 %vm279_vm1, %v6055_v46 }
  0xde   : > { %6058 = vmatmul.msk.f32.vlgmr.msra.gmra.mxu2 %vm279_vm1, %v6055_v46  ;;  %6059 = vmatmul.msk.f32.vlgmr.msra.gmra.mxu3 %vm279_vm1, %v6055_v46 }
  0xdf   : > { %6060 = vmatmul.msk.f32.vlgmr.msrb.gmra.mxu0 %vm279_vm1, %v6055_v46  ;;  %1305 = vmatpush.msra.mxu1 %v1252_v58  ;;  %v6462_v25 = vpop.permute.xlu1 %6461  ;;  %v6478_v58 = vunpack.i.l.bf16 %v6477_v42 }
  0xe0   : > { %1325 = vmatpush.msra.mxu2 %v1253_v59  ;;  %1345 = vmatpush.msra.mxu3 %v1254_v60  ;;  %v6457_v20 = vpop.permute.xlu0 %6456  ;;  %v6464_v29 = vunpack.i.h.bf16 %v6462_v25  ;;  %v6463_v30 = vunpack.i.l.bf16 %v6462_v25  ;;  %v6479_v59 = vunpack.i.h.bf16 %v6477_v42  ;;  %v6502_v3 = vpop.permute.xlu2 %6501 }
  0xe1   : > { %1365 = vmatpush.msrb.mxu0 %v1255_v61  ;;  %v6458_v38 = vunpack.i.l.bf16 %v6457_v20  ;;  %v6459_v39 = vunpack.i.h.bf16 %v6457_v20  ;;  %v6494_v61 = vunpack.i.h.bf16 %v6492_v54 }
  0xe2   : > { %v1667_v36 = vsel %vm1666_vm7, %v6463_v30, %v6464_v29  ;;  %v1877_v0 = vsel %vm1874_vm8, %v6478_v58, %v6479_v59 }
  0xe3   : > { %6626 = vrot.lane.b32.xlu0 %v7094_v13, %s6946_s30  ;;  %6631 = vrot.lane.b32.xlu1 %v7101_v14, %s6946_s30  ;;  %v1668_v43 = vsel %vm1666_vm7, %v6464_v29, %v6458_v38  ;;  %v1669_v44 = vsel %vm1666_vm7, %v6458_v38, %v6459_v39  ;;  %v1670_v45 = vsel %vm1666_vm7, %v6459_v39, %v6468_v40 }
  0xe4   : > { %3328 = vrot.lane.b32.xlu2 %v7063_v6, %s6946_s30  ;;  %v7398_v29 = vpack.i.bf16 %v3936_v28, %v3935_v27  ;;  %s6951_s30 = smov 54  }
  0xe5   : > { %6061 = vmatmul.msk.f32.vlgmr.msrb.gmra.mxu1 %vm279_vm1, %v6055_v46 }
  0xe6   : > { %6062 = vmatmul.msk.f32.vlgmr.msrb.gmra.mxu2 %vm279_vm1, %v6055_v46  ;;  %6063 = vmatmul.msk.f32.vlgmr.msrb.gmra.mxu3 %vm279_vm1, %v6055_v46 }
  0xe7   : > { %6065 = vmatmul.msk.f32.vlgmr.msra.gmra.mxu0 %vm279_vm1, %v6064_v4  ;;  %1385 = vmatpush.msrb.mxu1 %v1256_v7  ;;  %v1665_v37 = vpop.permute.xlu1 %1664 }
  0xe8   : > { %1405 = vmatpush.msrb.mxu2 %v1257_v9  ;;  %1425 = vmatpush.msrb.mxu3 %v1258_v10  ;;  %v6472_v33 = vpop.permute.xlu0 %6471  ;;  %v6504_v10 = vunpack.i.h.bf16 %v6502_v3  ;;  %v2081_v20 = vpop.permute.xlu2 %2080 }
  0xe9   : > { %1493 = vmatpush.msra.mxu0 %v1459_v11  ;;  %v6474_v41 = vunpack.i.h.bf16 %v6472_v33  ;;  %v6473_v49 = vunpack.i.l.bf16 %v6472_v33  ;;  %v6503_v11 = vunpack.i.l.bf16 %v6502_v3 }
  0xeb   : > { %6636 = vrot.lane.b32.xlu0 %v7083_v12, %s6947_s8  ;;  %v1671_v46 = vsel %vm1666_vm7, %v6468_v40, %v6474_v41  ;;  %6641 = vrot.lane.b32.xlu1 %v7060_v5, %s6947_s8  ;;  %v1672_v53 = vsel %vm1666_vm7, %v6474_v41, %v6469_v48  ;;  %v1673_v55 = vsel %vm1666_vm7, %v6469_v48, %v6473_v49  ;;  %v6859_v48 = vld [vmem:[%s7042_s9 + $0x18] sm:$0xff] }
  0xec   : > { %v1674_v56 = vsel %vm1666_vm7, %v6473_v49, %v1665_v37  ;;  %v2083_v19 = vsel %vm2082_vm9, %v6503_v11, %v6504_v10  ;;  %6646 = vrot.lane.b32.xlu2 %v7094_v13, %s6947_s8  ;;  %v3933_v11 = vld [vmem:[%s7042_s9 + $0x8] sm:$0xff]  ;;  %vm5011_vm7 = vcmask 359424  }
  0xed   : > { %6066 = vmatmul.msk.f32.vlgmr.msra.gmra.mxu1 %vm279_vm1, %v6064_v4 }
  0xee   : > { %6067 = vmatmul.msk.f32.vlgmr.msra.gmra.mxu2 %vm279_vm1, %v6064_v4  ;;  %6068 = vmatmul.msk.f32.vlgmr.msra.gmra.mxu3 %vm279_vm1, %v6064_v4 }
  0xef   : > { %6069 = vmatmul.msk.f32.vlgmr.msrb.gmra.mxu0 %vm279_vm1, %v6064_v4  ;;  %1513 = vmatpush.msra.mxu1 %v1460_v21  ;;  %v6487_v12 = vpop.permute.xlu1 %6486 }
  0xf0   : > { %1533 = vmatpush.msra.mxu2 %v1461_v22  ;;  %1553 = vmatpush.msra.mxu3 %v1462_v23  ;;  %v6482_v47 = vpop.permute.xlu0 %6481  ;;  %v6488_v60 = vunpack.i.l.bf16 %v6487_v12 }
  0xf1   : > { %1573 = vmatpush.msrb.mxu0 %v1463_v24  ;;  %v6484_v50 = vunpack.i.h.bf16 %v6482_v47  ;;  %v6483_v51 = vunpack.i.l.bf16 %v6482_v47  ;;  %v7419_v37 = vpop.permute.xlu2 %6526  ;;  %v6858_v47 = vld [vmem:[%s7042_s9 + $0x10] sm:$0xff] }
  0xf2   : > { %v1878_v1 = vsel %vm1874_vm8, %v6479_v59, %v6488_v60  ;;  %v1879_v2 = vsel %vm1874_vm8, %v6488_v60, %v6494_v61 }
  0xf3   : > { %6651 = vrot.lane.b32.xlu0 %v7101_v14, %s6947_s8  ;;  %v1875_v57 = vsel %vm1874_vm8, %v6483_v51, %v6484_v50  ;;  %3535 = vrot.lane.b32.xlu1 %v7063_v6, %s6947_s8  ;;  %v1876_v63 = vsel %vm1874_vm8, %v6484_v50, %v6478_v58  ;;  %v7443_v51 = vld [vmem:[%s8492_s1 + $0x48] sm:$0xff]  ;;  %s6952_s8 = smov 46  }
  0xf5   : > { %6070 = vmatmul.msk.f32.vlgmr.msrb.gmra.mxu1 %vm279_vm1, %v6064_v4 }
  0xf6   : > { %6071 = vmatmul.msk.f32.vlgmr.msrb.gmra.mxu2 %vm279_vm1, %v6064_v4  ;;  %6072 = vmatmul.msk.f32.vlgmr.msrb.gmra.mxu3 %vm279_vm1, %v6064_v4  ;;  %v6489_v4 = vunpack.i.h.bf16 %v6487_v12  ;;  %v6655_v12 = vpack.i.bf16 %v6859_v48, %v6858_v47 }
  0xf7   : > { %6074 = vmatmul.msk.f32.vlgmr.msra.gmra.mxu0 %vm279_vm1, %v6073_v31  ;;  %1593 = vmatpush.msrb.mxu1 %v1464_v32  ;;  %v6497_v62 = vpop.permute.xlu1 %6496 }
  0xf8   : > { %1613 = vmatpush.msrb.mxu2 %v1465_v34  ;;  %1633 = vmatpush.msrb.mxu3 %v1466_v35  ;;  %v1873_v14 = vpop.permute.xlu0 %1872  ;;  %v1880_v16 = vsel %vm1874_vm8, %v6494_v61, %v6489_v4  ;;  %v6498_v21 = vunpack.i.l.bf16 %v6497_v62  ;;  %v6499_v22 = vunpack.i.h.bf16 %v6497_v62  ;;  %v3937_v34 = vld [vmem:[%s7042_s9 + $0x28] sm:$0xff]  ;;  %v3939_v35 = vld [vmem:[%s7042_s9 + $0x38] sm:$0xff]  ;;  %v6528_v61 = vunpack.i.l.bf16 %v7419_v37 }
  0xf9   : > { %1701 = vmatpush.msra.mxu0 %v1667_v36  ;;  %v1882_v18 = vsel %vm1874_vm8, %v6493_v8, %v1873_v14  ;;  %v7421_v38 = vpack.i.bf16 %v3939_v35, %v3937_v34  ;;  %6656 = vrot.lane.b32.xlu2 %v6655_v12, %s6948_s12 }
  0xfb   : > { %6661 = vrot.lane.b32.xlu0 %v7060_v5, %s6948_s12  ;;  %6666 = vrot.lane.b32.xlu1 %v7094_v13, %s6948_s12  ;;  %v1881_v5 = vsel %vm1874_vm8, %v6489_v4, %v6493_v8  ;;  %vm5219_vm8 = vcmask 293888  }
  0xfd   : > { %6075 = vmatmul.msk.f32.vlgmr.msra.gmra.mxu1 %vm279_vm1, %v6073_v31 }
  0xfe   : > { %6076 = vmatmul.msk.f32.vlgmr.msra.gmra.mxu2 %vm279_vm1, %v6073_v31  ;;  %6077 = vmatmul.msk.f32.vlgmr.msra.gmra.mxu3 %vm279_vm1, %v6073_v31 }
  0xff   : > { %6078 = vmatmul.msk.f32.vlgmr.msrb.gmra.mxu0 %vm279_vm1, %v6073_v31  ;;  %1721 = vmatpush.msra.mxu1 %v1668_v43  ;;  %v7376_v17 = vpop.permute.xlu1 %6511 }
 0x100   : > { %1741 = vmatpush.msra.mxu2 %v1669_v44  ;;  %1761 = vmatpush.msra.mxu3 %v1670_v45  ;;  %v7360_v7 = vpop.permute.xlu0 %6506  ;;  %v6514_v25 = vunpack.i.h.bf16 %v7376_v17  ;;  %v6513_v41 = vunpack.i.l.bf16 %v7376_v17  ;;  %v3938_v45 = vld [vmem:[%s7042_s9 + $0x30] sm:$0xff] }
 0x101   : > { %1781 = vmatpush.msrb.mxu0 %v1671_v46  ;;  %v6508_v23 = vunpack.i.l.bf16 %v7360_v7  ;;  %v6509_v36 = vunpack.i.h.bf16 %v7360_v7  ;;  %v3940_v46 = vld [vmem:[%s7042_s9 + $0x40] sm:$0xff] }
 0x102   : > { %v7436_v49 = vpack.i.bf16 %v3938_v45, %v3940_v46 }
 0x103   : > { %3743 = vrot.lane.b32.xlu0 %v7063_v6, %s6948_s12  ;;  %v2085_v6 = vsel %vm2082_vm9, %v6498_v21, %v6499_v22  ;;  %v2086_v32 = vsel %vm2082_vm9, %v6499_v22, %v6508_v23  ;;  %6676 = vrot.lane.b32.xlu1 %v7398_v29, %s6949_s15  ;;  %v2087_v13 = vsel %vm2082_vm9, %v6508_v23, %v6514_v25 }
 0x104   : > { %v2089_v54 = vsel %vm2082_vm9, %v6509_v36, %v6513_v41 }
 0x105   : > { %6079 = vmatmul.msk.f32.vlgmr.msrb.gmra.mxu1 %vm279_vm1, %v6073_v31 }
 0x106   : > { %6080 = vmatmul.msk.f32.vlgmr.msrb.gmra.mxu2 %vm279_vm1, %v6073_v31  ;;  %6081 = vmatmul.msk.f32.vlgmr.msrb.gmra.mxu3 %vm279_vm1, %v6073_v31  ;;  %v2084_v31 = vsel %vm2082_vm9, %v6504_v10, %v6498_v21 }
 0x107   : > { %6083 = vmatmul.msk.f32.vlgmr.msra.gmra.mxu0 %vm279_vm1, %v6082_v52  ;;  %1801 = vmatpush.msrb.mxu1 %v1672_v53  ;;  %v6522_v33 = vpop.permute.xlu1 %6521 }
 0x108   : > { %1821 = vmatpush.msrb.mxu2 %v1673_v55  ;;  %1841 = vmatpush.msrb.mxu3 %v1674_v56  ;;  %v7392_v26 = vpop.permute.xlu0 %6516  ;;  %v6524_v43 = vunpack.i.h.bf16 %v6522_v33  ;;  %v6523_v44 = vunpack.i.l.bf16 %v6522_v33  ;;  %v2090_v55 = vsel %vm2082_vm9, %v6513_v41, %v2081_v20 }
 0x109   : > { %1909 = vmatpush.msra.mxu0 %v1875_v57  ;;  %v6518_v14 = vunpack.i.l.bf16 %v7392_v26  ;;  %v6519_v60 = vunpack.i.h.bf16 %v7392_v26 }
 0x10a   : > { %v2291_v56 = vsel %vm2290_vm10, %v6523_v44, %v6524_v43 }
 0x10b   : > { %6686 = vrot.lane.b32.xlu0 %v7421_v38, %s6949_s15  ;;  %6691 = vrot.lane.b32.xlu1 %v7436_v49, %s6949_s15  ;;  %v2292_v7 = vsel %vm2290_vm10, %v6524_v43, %v6518_v14  ;;  %v2293_v8 = vsel %vm2290_vm10, %v6518_v14, %v6519_v60  ;;  %v2294_v10 = vsel %vm2290_vm10, %v6519_v60, %v6528_v61 }
 0x10d   : > { %6084 = vmatmul.msk.f32.vlgmr.msra.gmra.mxu1 %vm279_vm1, %v6082_v52 }
 0x10e   : > { %6085 = vmatmul.msk.f32.vlgmr.msra.gmra.mxu2 %vm279_vm1, %v6082_v52  ;;  %6086 = vmatmul.msk.f32.vlgmr.msra.gmra.mxu3 %vm279_vm1, %v6082_v52 }
 0x10f   : > { %6087 = vmatmul.msk.f32.vlgmr.msrb.gmra.mxu0 %vm279_vm1, %v6082_v52  ;;  %1929 = vmatpush.msra.mxu1 %v1876_v63 }
 0x110   : > { %1949 = vmatpush.msra.mxu2 %v1877_v0  ;;  %1969 = vmatpush.msra.mxu3 %v1878_v1  ;;  %v7472_v0 = vpop.permute.xlu2 %6536  ;;  %v6860_v1 = vld [vmem:[%s7042_s9 + $0x28] sm:$0xff] }
 0x111   : > { %1989 = vmatpush.msrb.mxu0 %v1879_v2  ;;  %v6861_v2 = vld [vmem:[%s7042_s9 + $0x38] sm:$0xff]  ;;  %v6539_v43 = vunpack.i.h.bf16 %v7472_v0 }
 0x112   : > { %v7364_v9 = vpop.f32.mrf.mxu0  ;;  %v6670_v3 = vpack.i.bf16 %v6860_v1, %v6861_v2 }
 0x113   : > { %6696 = vrot.lane.b32.xlu0 %v7398_v29, %s6950_s23 }
 0x114   : > { %6671 = vrot.lane.b32.xlu2 %v6670_v3, %s6948_s12  ;;  %s6953_s12 = smov 45  }
 0x115   : > { %6088 = vmatmul.msk.f32.vlgmr.msrb.gmra.mxu1 %vm279_vm1, %v6082_v52  ;;  %v7446_v53 = vpop.permute.xlu0 %6531  ;;  %v2289_v57 = vpop.permute.xlu1 %2288 }
 0x116   : > { %6089 = vmatmul.msk.f32.vlgmr.msrb.gmra.mxu2 %vm279_vm1, %v6082_v52  ;;  %6090 = vmatmul.msk.f32.vlgmr.msrb.gmra.mxu3 %vm279_vm1, %v6082_v52  ;;  %v2088_v52 = vsel %vm2082_vm9, %v6514_v25, %v6509_v36  ;;  %v6534_v63 = vunpack.i.h.bf16 %v7446_v53  ;;  %v6533_v22 = vunpack.i.l.bf16 %v7446_v53  ;;  %vm5427_vm9 = vcmask 285696  }
 0x117   : > { %6092 = vmatmul.msk.f32.vlgmr.msra.gmra.mxu0 %vm279_vm1, %v7373_v15  ;;  %2009 = vmatpush.msrb.mxu1 %v1880_v16 }
 0x118   : > { %2029 = vmatpush.msrb.mxu2 %v1881_v5  ;;  %2049 = vmatpush.msrb.mxu3 %v1882_v18  ;;  %v2295_v16 = vsel %vm2290_vm10, %v6528_v61, %v6534_v63  ;;  %v6529_v18 = vunpack.i.h.bf16 %v7419_v37  ;;  %v2298_v34 = vsel %vm2290_vm10, %v6533_v22, %v2289_v57  ;;  %v7531_v37 = vld [vmem:[%s7042_s9 + $0x48] sm:$0xff] }
 0x119   : > { %2117 = vmatpush.msra.mxu0 %v2083_v19 }
 0x11a   : > { %v7389_v24 = vpop.f32.mrf.mxu1  ;;  %v2297_v33 = vsel %vm2290_vm10, %v6529_v18, %v6533_v22 }
 0x11b   : > { %6711 = vrot.lane.b32.xlu0 %v7436_v49, %s6950_s23 }
 0x11c   : > { %v7400_v30 = vpop.f32.mrf.mxu0 }
 0x11d   : > { %6093 = vmatmul.msk.f32.vlgmr.msra.gmra.mxu1 %vm279_vm1, %v7373_v15  ;;  %v6542_v17 = vpop.permute.xlu0 %6541  ;;  %v7498_v19 = vpop.permute.xlu1 %6546 }
 0x11e   : > { %6094 = vmatmul.msk.f32.vlgmr.msra.gmra.mxu2 %vm279_vm1, %v7373_v15  ;;  %6095 = vmatmul.msk.f32.vlgmr.msra.gmra.mxu3 %vm279_vm1, %v7373_v15  ;;  %v6544_v23 = vunpack.i.h.bf16 %v6542_v17  ;;  %v6543_v28 = vunpack.i.l.bf16 %v6542_v17  ;;  %v6548_v44 = vunpack.i.l.bf16 %v7498_v19  ;;  %v6549_v57 = vunpack.i.h.bf16 %v7498_v19 }
 0x11f   : > { %6096 = vmatmul.msk.f32.vlgmr.msrb.gmra.mxu0 %vm279_vm1, %v7373_v15  ;;  %2137 = vmatpush.msra.mxu1 %v2084_v31 }
 0x120   : > { %2157 = vmatpush.msra.mxu2 %v2085_v6  ;;  %2177 = vmatpush.msra.mxu3 %v2086_v32  ;;  %v7512_v6 = vld [vmem:[%s8492_s1 + $0x50] sm:$0xff]  ;;  %v2296_v32 = vsel %vm2290_vm10, %v6534_v63, %v6529_v18  ;;  %v2499_v35 = vsel %vm2498_vm11, %v6543_v28, %v6544_v23  ;;  %vm5635_vm10 = vcmask 277504  }
 0x121   : > { %v7423_v39 = vpop.f32.mrf.mxu2  ;;  %v7425_v40 = vpop.f32.mrf.mxu3  ;;  %2197 = vmatpush.msrb.mxu0 %v2087_v13 }
 0x122   : > { %v7428_v42 = vpop.f32.mrf.mxu1  ;;  %v7515_v13 = vpop.permute.xlu2 %6551 }
 0x123   : > { %v6554_v48 = vunpack.i.h.bf16 %v7515_v13  ;;  %v6553_v60 = vunpack.i.l.bf16 %v7515_v13 }
 0x124   : > { %v7438_v50 = vpop.f32.mrf.mxu0 }
 0x125   : > { %6097 = vmatmul.msk.f32.vlgmr.msrb.gmra.mxu1 %vm279_vm1, %v7373_v15  ;;  %v2497_v36 = vpop.permute.xlu0 %2496  ;;  %v7543_v12 = vpop.permute.xlu1 %6556 }
 0x126   : > { %6098 = vmatmul.msk.f32.vlgmr.msrb.gmra.mxu2 %vm279_vm1, %v7373_v15  ;;  %6099 = vmatmul.msk.f32.vlgmr.msrb.gmra.mxu3 %vm279_vm1, %v7373_v15  ;;  %v3934_v15 = vld [vmem:[%s7042_s9 + $0x10] sm:$0xff]  ;;  %v6558_v18 = vunpack.i.l.bf16 %v7543_v12 }
 0x127   : > { %6101 = vmatmul.msk.f32.vlgmr.msra.gmra.mxu0 %vm279_vm1, %v7443_v51  ;;  %2217 = vmatpush.msrb.mxu1 %v2088_v52  ;;  %v7493_v5 = vpack.i.bf16 %v3934_v15, %v3933_v11  ;;  %v2505_v11 = vsel %vm2498_vm11, %v6549_v57, %v6553_v60  ;;  %v2506_v15 = vsel %vm2498_vm11, %v6553_v60, %v2497_v36 }
 0x128   : > { %2237 = vmatpush.msrb.mxu2 %v2089_v54  ;;  %2257 = vmatpush.msrb.mxu3 %v2090_v55  ;;  %v2502_v54 = vsel %vm2498_vm11, %v6539_v43, %v6548_v44  ;;  %v2503_v55 = vsel %vm2498_vm11, %v6548_v44, %v6554_v48 }
 0x129   : > { %v7463_v58 = vpop.f32.mrf.mxu2  ;;  %v7465_v59 = vpop.f32.mrf.mxu3  ;;  %2325 = vmatpush.msra.mxu0 %v2291_v56  ;;  %6701 = vrot.lane.b32.xlu1 %v7493_v5, %s6950_s23 }
 0x12a   : > { %v7469_v62 = vpop.f32.mrf.mxu1  ;;  %6681 = vrot.lane.b32.xlu2 %v7493_v5, %s6949_s15  ;;  %v6562_v56 = vpop.permute.xlu2 %6561  ;;  %6721 = vrot.lane.b32.xlu0 %v7493_v5, %s6951_s30 }
 0x12b   : > { %v6564_v1 = vunpack.i.h.bf16 %v6562_v56  ;;  %v6563_v2 = vunpack.i.l.bf16 %v6562_v56 }
 0x12c   : > { %v7476_v4 = vpop.f32.mrf.mxu0 }
 0x12d   : > { %6102 = vmatmul.msk.f32.vlgmr.msra.gmra.mxu1 %vm279_vm1, %v7443_v51  ;;  %v7562_v14 = vpop.permute.xlu0 %6566  ;;  %v2708_v13 = vsel %vm2706_vm12, %v6564_v1, %v6558_v18 }
 0x12e   : > { %6103 = vmatmul.msk.f32.vlgmr.msra.gmra.mxu2 %vm279_vm1, %v7443_v51  ;;  %6104 = vmatmul.msk.f32.vlgmr.msra.gmra.mxu3 %vm279_vm1, %v7443_v51  ;;  %v6568_v22 = vunpack.i.l.bf16 %v7562_v14 }
 0x12f   : > { %6105 = vmatmul.msk.f32.vlgmr.msrb.gmra.mxu0 %vm279_vm1, %v7443_v51  ;;  %2345 = vmatpush.msra.mxu1 %v2292_v7  ;;  %v7578_v7 = vld [vmem:[%s8492_s1 + $0x58] sm:$0xff] }
 0x130   : > { %2365 = vmatpush.msra.mxu2 %v2293_v8  ;;  %2385 = vmatpush.msra.mxu3 %v2294_v10  ;;  %v2504_v8 = vsel %vm2498_vm11, %v6554_v48, %v6549_v57  ;;  %v7581_v10 = vpop.permute.xlu1 %6571 }
 0x131   : > { %v503_v20 = vpop.f32.mrf.mxu2  ;;  %v523_v21 = vpop.f32.mrf.mxu3  ;;  %2405 = vmatpush.msrb.mxu0 %v2295_v16  ;;  %4177 = vrot.lane.b32.xlu1 %v7531_v37, %s6950_s23  ;;  %v2707_v16 = vsel %vm2706_vm12, %v6563_v2, %v6564_v1  ;;  %v6574_v28 = vunpack.i.h.bf16 %v7581_v10  ;;  %v6573_v44 = vunpack.i.l.bf16 %v7581_v10 }
 0x132   : > { %v504_v25 = vadd.f32 %v503_v20, %v7423_v39  ;;  %v524_v26 = vadd.f32 %v523_v21, %v7425_v40  ;;  %v7505_v27 = vpop.f32.mrf.mxu1  ;;  %v6538_v39 = vunpack.i.l.bf16 %v7472_v0  ;;  %3969 = vrot.lane.b32.xlu2 %v7531_v37, %s6949_s15  ;;  %v2705_v17 = vpop.permute.xlu2 %2704  ;;  %v6559_v21 = vunpack.i.h.bf16 %v7543_v12  ;;  %4385 = vrot.lane.b32.xlu0 %v7531_v37, %s6951_s30  ;;  %s6954_s15 = smov 44  }
 0x134   : > { %v7507_v31 = vpop.f32.mrf.mxu0  ;;  %v2500_v52 = vsel %vm2498_vm11, %v6544_v23, %v6538_v39  ;;  %v2501_v53 = vsel %vm2498_vm11, %v6538_v39, %v6539_v43  ;;  %v6569_v39 = vunpack.i.h.bf16 %v7562_v14  ;;  %v2714_v14 = vsel %vm2706_vm12, %v6573_v44, %v2705_v17 }
 0x135   : > { %6106 = vmatmul.msk.f32.vlgmr.msrb.gmra.mxu1 %vm279_vm1, %v7443_v51 }
 0x136   : > { %6107 = vmatmul.msk.f32.vlgmr.msrb.gmra.mxu2 %vm279_vm1, %v7443_v51  ;;  %6108 = vmatmul.msk.f32.vlgmr.msrb.gmra.mxu3 %vm279_vm1, %v7443_v51  ;;  %v2713_v57 = vsel %vm2706_vm12, %v6569_v39, %v6573_v44 }
 0x137   : > { %6110 = vmatmul.msk.f32.vlgmr.msra.gmra.mxu0 %vm279_vm1, %v7512_v6  ;;  %2425 = vmatpush.msrb.mxu1 %v2296_v32 }
 0x138   : > { %2445 = vmatpush.msrb.mxu2 %v2297_v33  ;;  %2465 = vmatpush.msrb.mxu3 %v2298_v34  ;;  %v2709_v33 = vsel %vm2706_vm12, %v6558_v18, %v6559_v21  ;;  %v2710_v34 = vsel %vm2706_vm12, %v6559_v21, %v6568_v22  ;;  %v6582_v36 = vpop.permute.xlu1 %6581 }
 0x139   : > { %v583_v40 = vpop.f32.mrf.mxu2  ;;  %v603_v41 = vpop.f32.mrf.mxu3  ;;  %2533 = vmatpush.msra.mxu0 %v2499_v35  ;;  %6726 = vrot.lane.b32.xlu1 %v7421_v38, %s6951_s30  ;;  %v2711_v35 = vsel %vm2706_vm12, %v6568_v22, %v6574_v28 }
 0x13a   : > { %v584_v45 = vadd.f32 %v583_v40, %v7463_v58  ;;  %v604_v46 = vadd.f32 %v603_v41, %v7465_v59  ;;  %v7540_v47 = vpop.f32.mrf.mxu1  ;;  %6706 = vrot.lane.b32.xlu2 %v7421_v38, %s6950_s23  ;;  %v7623_v40 = vpop.permute.xlu2 %6586  ;;  %6746 = vrot.lane.b32.xlu0 %v7421_v38, %s6952_s8  ;;  %s6955_s23 = smov 36  }
 0x13b   : > { %v6588_v2 = vunpack.i.l.bf16 %v7623_v40  ;;  %v6589_v22 = vunpack.i.h.bf16 %v7623_v40  ;;  %v7694_v40 = vld [vmem:[%s8492_s1 + $0x68] sm:$0xff] }
 0x13c   : > { %v7547_v51 = vpop.f32.mrf.mxu0 }
 0x13d   : > { %6111 = vmatmul.msk.f32.vlgmr.msra.gmra.mxu1 %vm279_vm1, %v7512_v6 }
 0x13e   : > { %6112 = vmatmul.msk.f32.vlgmr.msra.gmra.mxu2 %vm279_vm1, %v7512_v6  ;;  %6113 = vmatmul.msk.f32.vlgmr.msra.gmra.mxu3 %vm279_vm1, %v7512_v6 }
 0x13f   : > { %6114 = vmatmul.msk.f32.vlgmr.msrb.gmra.mxu0 %vm279_vm1, %v7512_v6  ;;  %2553 = vmatpush.msra.mxu1 %v2500_v52 }
 0x140   : > { %2573 = vmatpush.msra.mxu2 %v2501_v53  ;;  %2593 = vmatpush.msra.mxu3 %v2502_v54  ;;  %v7635_v54 = vld [vmem:[%s8492_s1 + $0x60] sm:$0xff] }
 0x141   : > { %v703_v58 = vpop.f32.mrf.mxu2  ;;  %v723_v59 = vpop.f32.mrf.mxu3  ;;  %2613 = vmatpush.msrb.mxu0 %v2503_v55  ;;  %6736 = vrot.lane.b32.xlu1 %v7398_v29, %s6952_s8  ;;  %v2712_v55 = vsel %vm2706_vm12, %v6574_v28, %v6569_v39 }
 0x142   : > { %v808_v61 = vadd.f32 %v703_v58, %v504_v25  ;;  %v809_v63 = vadd.f32 %v723_v59, %v524_v26  ;;  %v7567_v0 = vpop.f32.mrf.mxu1  ;;  %6716 = vrot.lane.b32.xlu2 %v7398_v29, %s6951_s30  ;;  %v2913_v59 = vpop.permute.xlu1 %2912  ;;  %6756 = vrot.lane.b32.xlu0 %v7398_v29, %s6953_s12 }
 0x144   : > { %v7573_v3 = vpop.f32.mrf.mxu0 }
 0x145   : > { %6115 = vmatmul.msk.f32.vlgmr.msrb.gmra.mxu1 %vm279_vm1, %v7512_v6 }
 0x146   : > { %6116 = vmatmul.msk.f32.vlgmr.msrb.gmra.mxu2 %vm279_vm1, %v7512_v6  ;;  %6117 = vmatmul.msk.f32.vlgmr.msrb.gmra.mxu3 %vm279_vm1, %v7512_v6  ;;  %v7602_v6 = vpop.permute.xlu0 %6576 }
 0x147   : > { %6119 = vmatmul.msk.f32.vlgmr.msra.gmra.mxu0 %vm279_vm1, %v7578_v7  ;;  %2633 = vmatpush.msrb.mxu1 %v2504_v8  ;;  %v6578_v60 = vunpack.i.l.bf16 %v7602_v6  ;;  %v6579_v1 = vunpack.i.h.bf16 %v7602_v6 }
 0x148   : > { %2653 = vmatpush.msrb.mxu2 %v2505_v11  ;;  %2673 = vmatpush.msrb.mxu3 %v2506_v15  ;;  %v7661_v15 = vpop.permute.xlu2 %6596 }
 0x149   : > { %v783_v19 = vpop.f32.mrf.mxu2  ;;  %v803_v20 = vpop.f32.mrf.mxu3  ;;  %2741 = vmatpush.msra.mxu0 %v2707_v16  ;;  %6751 = vrot.lane.b32.xlu1 %v7436_v49, %s6952_s8  ;;  %v2917_v18 = vsel %vm2914_vm13, %v6578_v60, %v6579_v1 }
 0x14a   : > { %v812_v23 = vadd.f32 %v783_v19, %v584_v45  ;;  %v813_v25 = vadd.f32 %v803_v20, %v604_v46  ;;  %v7599_v26 = vpop.f32.mrf.mxu1  ;;  %v6584_v45 = vunpack.i.h.bf16 %v6582_v36  ;;  %v6583_v46 = vunpack.i.l.bf16 %v6582_v36  ;;  %6731 = vrot.lane.b32.xlu2 %v7436_v49, %s6951_s30  ;;  %6771 = vrot.lane.b32.xlu0 %v7436_v49, %s6953_s12  ;;  %s6956_s30 = smov 35  }
 0x14b   : > { %v2918_v19 = vsel %vm2914_vm13, %v6579_v1, %v6588_v2 }
 0x14c   : > { %v7606_v32 = vpop.f32.mrf.mxu0  ;;  %v2915_v58 = vsel %vm2914_vm13, %v6583_v46, %v6584_v45  ;;  %v2916_v17 = vsel %vm2914_vm13, %v6584_v45, %v6578_v60 }
 0x14d   : > { %6120 = vmatmul.msk.f32.vlgmr.msra.gmra.mxu1 %vm279_vm1, %v7578_v7 }
 0x14e   : > { %6121 = vmatmul.msk.f32.vlgmr.msra.gmra.mxu2 %vm279_vm1, %v7578_v7  ;;  %6122 = vmatmul.msk.f32.vlgmr.msra.gmra.mxu3 %vm279_vm1, %v7578_v7  ;;  %v7638_v56 = vpop.permute.xlu0 %6591 }
 0x14f   : > { %6123 = vmatmul.msk.f32.vlgmr.msrb.gmra.mxu0 %vm279_vm1, %v7578_v7  ;;  %2761 = vmatpush.msra.mxu1 %v2708_v13  ;;  %v6594_v8 = vunpack.i.h.bf16 %v7638_v56  ;;  %v6593_v6 = vunpack.i.l.bf16 %v7638_v56 }
 0x150   : > { %2781 = vmatpush.msra.mxu2 %v2709_v33  ;;  %2801 = vmatpush.msra.mxu3 %v2710_v34 }
 0x151   : > { %v911_v41 = vpop.f32.mrf.mxu2  ;;  %v931_v43 = vpop.f32.mrf.mxu3  ;;  %2821 = vmatpush.msrb.mxu0 %v2711_v35  ;;  %v2919_v20 = vsel %vm2914_vm13, %v6588_v2, %v6594_v8  ;;  %6761 = vrot.lane.b32.xlu1 %v7493_v5, %s6953_s12  ;;  %v2921_v44 = vsel %vm2914_vm13, %v6589_v22, %v6593_v6  ;;  %v2922_v45 = vsel %vm2914_vm13, %v6593_v6, %v2913_v59 }
 0x152   : > { %v1016_v48 = vadd.f32 %v911_v41, %v808_v61  ;;  %v1017_v12 = vadd.f32 %v931_v43, %v809_v63  ;;  %v7628_v52 = vpop.f32.mrf.mxu1  ;;  %v2920_v41 = vsel %vm2914_vm13, %v6594_v8, %v6589_v22  ;;  %v6612_v43 = vpop.permute.xlu2 %6611  ;;  %6741 = vrot.lane.b32.xlu2 %v7493_v5, %s6952_s8  ;;  %6781 = vrot.lane.b32.xlu0 %v7493_v5, %s6954_s15 }
 0x153   : > { %v6614_v60 = vunpack.i.h.bf16 %v6612_v43 }
 0x154   : > { %v7630_v53 = vpop.f32.mrf.mxu0 }
 0x155   : > { %6124 = vmatmul.msk.f32.vlgmr.msrb.gmra.mxu1 %vm279_vm1, %v7578_v7 }
 0x156   : > { %6125 = vmatmul.msk.f32.vlgmr.msrb.gmra.mxu2 %vm279_vm1, %v7578_v7  ;;  %6126 = vmatmul.msk.f32.vlgmr.msrb.gmra.mxu3 %vm279_vm1, %v7578_v7  ;;  %v6602_v21 = vpop.permute.xlu0 %6601 }
 0x157   : > { %6128 = vmatmul.msk.f32.vlgmr.msra.gmra.mxu0 %vm279_vm1, %v7635_v54  ;;  %2841 = vmatpush.msrb.mxu1 %v2712_v55  ;;  %v6604_v13 = vunpack.i.h.bf16 %v6602_v21  ;;  %v6603_v36 = vunpack.i.l.bf16 %v6602_v21 }
 0x158   : > { %2861 = vmatpush.msrb.mxu2 %v2713_v57  ;;  %2881 = vmatpush.msrb.mxu3 %v2714_v14  ;;  %v6599_v57 = vunpack.i.h.bf16 %v7661_v15 }
 0x159   : > { %v991_v61 = vpop.f32.mrf.mxu2  ;;  %v1011_v63 = vpop.f32.mrf.mxu3  ;;  %2949 = vmatpush.msra.mxu0 %v2915_v58  ;;  %v3123_v46 = vsel %vm3122_vm14, %v6603_v36, %v6604_v13  ;;  %4801 = vrot.lane.b32.xlu1 %v7531_v37, %s6953_s12 }
 0x15a   : > { %v1020_v7 = vadd.f32 %v991_v61, %v812_v23  ;;  %v1021_v10 = vadd.f32 %v1011_v63, %v813_v25  ;;  %v7659_v11 = vpop.f32.mrf.mxu1  ;;  %v7682_v23 = vpop.permute.xlu1 %6606  ;;  %4593 = vrot.lane.b32.xlu2 %v7531_v37, %s6952_s8  ;;  %5009 = vrot.lane.b32.xlu0 %v7531_v37, %s6954_s15  ;;  %s6957_s8 = smov 34  }
 0x15b   : > { %v6608_v14 = vunpack.i.l.bf16 %v7682_v23 }
 0x15c   : > { %v7663_v16 = vpop.f32.mrf.mxu0 }
 0x15d   : > { %6129 = vmatmul.msk.f32.vlgmr.msra.gmra.mxu1 %vm279_vm1, %v7635_v54  ;;  %v3126_v8 = vsel %vm3122_vm14, %v6599_v57, %v6608_v14 }
 0x15e   : > { %6130 = vmatmul.msk.f32.vlgmr.msra.gmra.mxu2 %vm279_vm1, %v7635_v54  ;;  %6131 = vmatmul.msk.f32.vlgmr.msra.gmra.mxu3 %vm279_vm1, %v7635_v54 }
 0x15f   : > { %6132 = vmatmul.msk.f32.vlgmr.msrb.gmra.mxu0 %vm279_vm1, %v7635_v54  ;;  %2969 = vmatpush.msra.mxu1 %v2916_v17 }
 0x160   : > { %2989 = vmatpush.msra.mxu2 %v2917_v18  ;;  %3009 = vmatpush.msra.mxu3 %v2918_v19 }
 0x161   : > { %v1119_v25 = vpop.f32.mrf.mxu2  ;;  %v1139_v28 = vpop.f32.mrf.mxu3  ;;  %3029 = vmatpush.msrb.mxu0 %v2919_v20  ;;  %v6613_v20 = vunpack.i.l.bf16 %v6612_v43  ;;  %6786 = vrot.lane.b32.xlu1 %v7421_v38, %s6954_s15 }
 0x162   : > { %v1224_v33 = vadd.f32 %v1119_v25, %v1016_v48  ;;  %v1225_v34 = vadd.f32 %v1139_v28, %v1017_v12  ;;  %v7687_v35 = vpop.f32.mrf.mxu1  ;;  %v3121_v48 = vpop.permute.xlu0 %3120  ;;  %v6598_v12 = vunpack.i.l.bf16 %v7661_v15  ;;  %v6609_v15 = vunpack.i.h.bf16 %v7682_v23  ;;  %6766 = vrot.lane.b32.xlu2 %v7421_v38, %s6953_s12  ;;  %6806 = vrot.lane.b32.xlu0 %v7421_v38, %s6955_s23  ;;  %s5939_s12 = scalar_lea.sflag [#allocation3], %s215_s25 }
 0x163   : > { %v7717_v61 = vpop.permute.xlu1 %6616 }
 0x164   : > { %v7689_v39 = vpop.f32.mrf.mxu0  ;;  %v3124_v1 = vsel %vm3122_vm14, %v6604_v13, %v6598_v12  ;;  %v3125_v2 = vsel %vm3122_vm14, %v6598_v12, %v6599_v57  ;;  %v7751_v13 = vld [vmem:[%s8492_s1 + $0x70] sm:$0xff]  ;;  %v3129_v36 = vsel %vm3122_vm14, %v6609_v15, %v6613_v20 }
 0x165   : > { %6133 = vmatmul.msk.f32.vlgmr.msrb.gmra.mxu1 %vm279_vm1, %v7635_v54 }
 0x166   : > { %6134 = vmatmul.msk.f32.vlgmr.msrb.gmra.mxu2 %vm279_vm1, %v7635_v54  ;;  %6135 = vmatmul.msk.f32.vlgmr.msrb.gmra.mxu3 %vm279_vm1, %v7635_v54 }
 0x167   : > { %6137 = vmatmul.msk.f32.vlgmr.msra.gmra.mxu0 %vm279_vm1, %v7694_v40  ;;  %3049 = vmatpush.msrb.mxu1 %v2920_v41  ;;  %v3130_v41 = vsel %vm3122_vm14, %v6613_v20, %v3121_v48  ;;  %v6619_v48 = vunpack.i.h.bf16 %v7717_v61 }
 0x168   : > { %3069 = vmatpush.msrb.mxu2 %v2921_v44  ;;  %3089 = vmatpush.msrb.mxu3 %v2922_v45  ;;  %v6618_v45 = vunpack.i.l.bf16 %v7717_v61 }
 0x169   : > { %v1199_v55 = vpop.f32.mrf.mxu2  ;;  %v1219_v56 = vpop.f32.mrf.mxu3  ;;  %3157 = vmatpush.msra.mxu0 %v3123_v46  ;;  %6796 = vrot.lane.b32.xlu1 %v7398_v29, %s6955_s23 }
 0x16a   : > { %v1228_v54 = vadd.f32 %v1199_v55, %v1020_v7  ;;  %v1229_v58 = vadd.f32 %v1219_v56, %v1021_v10  ;;  %v7715_v59 = vpop.f32.mrf.mxu1  ;;  %v3127_v7 = vsel %vm3122_vm14, %v6608_v14, %v6614_v60  ;;  %v6622_v10 = vpop.permute.xlu2 %6621  ;;  %6776 = vrot.lane.b32.xlu2 %v7398_v29, %s6954_s15  ;;  %6816 = vrot.lane.b32.xlu0 %v7398_v29, %s6956_s30 }
 0x16b   : > { %v7736_v17 = vpop.permute.xlu0 %6626  ;;  %v6624_v28 = vunpack.i.h.bf16 %v6622_v10  ;;  %v6623_v6 = vunpack.i.l.bf16 %v6622_v10 }
 0x16c   : > { %v7721_v63 = vpop.f32.mrf.mxu0  ;;  %v6628_v55 = vunpack.i.l.bf16 %v7736_v17 }
 0x16d   : > { %6138 = vmatmul.msk.f32.vlgmr.msra.gmra.mxu1 %vm279_vm1, %v7694_v40  ;;  %v3330_v43 = vsel %vm279_vm1, %v6623_v6, %v6624_v28  ;;  %v3331_v61 = vsel %vm279_vm1, %v6624_v28, %v6618_v45 }
 0x16e   : > { %6139 = vmatmul.msk.f32.vlgmr.msra.gmra.mxu2 %vm279_vm1, %v7694_v40  ;;  %6140 = vmatmul.msk.f32.vlgmr.msra.gmra.mxu3 %vm279_vm1, %v7694_v40 }
 0x16f   : > { %6141 = vmatmul.msk.f32.vlgmr.msrb.gmra.mxu0 %vm279_vm1, %v7694_v40  ;;  %3177 = vmatpush.msra.mxu1 %v3124_v1 }
 0x170   : > { %3197 = vmatpush.msra.mxu2 %v3125_v2  ;;  %3217 = vmatpush.msra.mxu3 %v3126_v8 }
 0x171   : > { %v1327_v18 = vpop.f32.mrf.mxu2  ;;  %v1347_v19 = vpop.f32.mrf.mxu3  ;;  %3237 = vmatpush.msrb.mxu0 %v3127_v7  ;;  %v6629_v7 = vunpack.i.h.bf16 %v7736_v17  ;;  %6811 = vrot.lane.b32.xlu1 %v7436_v49, %s6955_s23 }
 0x172   : > { %v1432_v21 = vadd.f32 %v1327_v18, %v1224_v33  ;;  %v1433_v22 = vadd.f32 %v1347_v19, %v1225_v34  ;;  %v7740_v25 = vpop.f32.mrf.mxu1  ;;  %v3128_v33 = vsel %vm3122_vm14, %v6614_v60, %v6609_v15  ;;  %v7754_v34 = vpop.permute.xlu1 %6631  ;;  %6791 = vrot.lane.b32.xlu2 %v7436_v49, %s6954_s15  ;;  %6831 = vrot.lane.b32.xlu0 %v7436_v49, %s6956_s30 }
 0x173   : > { %v3329_v44 = vpop.permute.xlu2 %3328  ;;  %v6634_v14 = vunpack.i.h.bf16 %v7754_v34  ;;  %v7775_v60 = vpop.permute.xlu0 %6636  ;;  %v6633_v19 = vunpack.i.l.bf16 %v7754_v34 }
 0x174   : > { %v7746_v23 = vpop.f32.mrf.mxu0 }
 0x175   : > { %6142 = vmatmul.msk.f32.vlgmr.msrb.gmra.mxu1 %vm279_vm1, %v7694_v40  ;;  %v3334_v2 = vsel %vm279_vm1, %v6628_v55, %v6634_v14  ;;  %v3335_v34 = vsel %vm279_vm1, %v6634_v14, %v6629_v7 }
 0x176   : > { %6143 = vmatmul.msk.f32.vlgmr.msrb.gmra.mxu2 %vm279_vm1, %v7694_v40  ;;  %6144 = vmatmul.msk.f32.vlgmr.msrb.gmra.mxu3 %vm279_vm1, %v7694_v40 }
 0x177   : > { %6146 = vmatmul.msk.f32.vlgmr.msra.gmra.mxu0 %vm279_vm1, %v7751_v13  ;;  %3257 = vmatpush.msrb.mxu1 %v3128_v33 }
 0x178   : > { %3277 = vmatpush.msrb.mxu2 %v3129_v36  ;;  %3297 = vmatpush.msrb.mxu3 %v3130_v41  ;;  %v7808_v41 = vld [vmem:[%s8492_s1 + $0x78] sm:$0xff] }
 0x179   : > { %v1407_v46 = vpop.f32.mrf.mxu2  ;;  %v1427_v12 = vpop.f32.mrf.mxu3  ;;  %3364 = vmatpush.msra.mxu0 %v3330_v43  ;;  %6821 = vrot.lane.b32.xlu1 %v7493_v5, %s6956_s30 }
 0x17a   : > { %v1436_v40 = vadd.f32 %v1407_v46, %v1228_v54  ;;  %v1437_v56 = vadd.f32 %v1427_v12, %v1229_v58  ;;  %v7772_v57 = vpop.f32.mrf.mxu1  ;;  %v3332_v54 = vsel %vm279_vm1, %v6618_v45, %v6619_v48  ;;  %v3333_v58 = vsel %vm279_vm1, %v6619_v48, %v6628_v55  ;;  %v6642_v8 = vpop.permute.xlu1 %6641  ;;  %6801 = vrot.lane.b32.xlu2 %v7493_v5, %s6955_s23 }
 0x17b   : > { %v7796_v10 = vpop.permute.xlu2 %6646  ;;  %v6644_v20 = vunpack.i.h.bf16 %v6642_v8  ;;  %v6643_v28 = vunpack.i.l.bf16 %v6642_v8  ;;  %v7811_v43 = vpop.permute.xlu0 %6651  ;;  %v6638_v12 = vunpack.i.l.bf16 %v7775_v60  ;;  %6841 = vrot.lane.b32.xlu0 %v7493_v5, %s6957_s8  ;;  %v7928_v5 = vld [vmem:[%s8492_s1 + $0x88] sm:$0xff] }
 0x17c   : > { %v7779_v1 = vpop.f32.mrf.mxu0  ;;  %v6648_v14 = vunpack.i.l.bf16 %v7796_v10  ;;  %v6649_v29 = vunpack.i.h.bf16 %v7796_v10 }
 0x17d   : > { %6147 = vmatmul.msk.f32.vlgmr.msra.gmra.mxu1 %vm279_vm1, %v7751_v13  ;;  %v3538_v45 = vsel %vm3537_vm15, %v6643_v28, %v6644_v20  ;;  %v6653_v28 = vunpack.i.l.bf16 %v7811_v43 }
 0x17e   : > { %6148 = vmatmul.msk.f32.vlgmr.msra.gmra.mxu2 %vm279_vm1, %v7751_v13  ;;  %6149 = vmatmul.msk.f32.vlgmr.msra.gmra.mxu3 %vm279_vm1, %v7751_v13 }
 0x17f   : > { %6150 = vmatmul.msk.f32.vlgmr.msrb.gmra.mxu0 %vm279_vm1, %v7751_v13  ;;  %3384 = vmatpush.msra.mxu1 %v3331_v61  ;;  %v6654_v61 = vunpack.i.h.bf16 %v7811_v43 }
 0x180   : > { %3404 = vmatpush.msra.mxu2 %v3332_v54  ;;  %3424 = vmatpush.msra.mxu3 %v3333_v58 }
 0x181   : > { %v1535_v15 = vpop.f32.mrf.mxu2  ;;  %v1555_v18 = vpop.f32.mrf.mxu3  ;;  %3444 = vmatpush.msrb.mxu0 %v3334_v2  ;;  %v3543_v43 = vsel %vm3537_vm15, %v6654_v61, %v6649_v29  ;;  %5425 = vrot.lane.b32.xlu1 %v7531_v37, %s6956_s30 }
 0x182   : > { %v1640_v6 = vadd.f32 %v1535_v15, %v1432_v21  ;;  %v1641_v33 = vadd.f32 %v1555_v18, %v1433_v22  ;;  %v7801_v36 = vpop.f32.mrf.mxu1  ;;  %v3336_v21 = vsel %vm279_vm1, %v6629_v7, %v6633_v19  ;;  %v3337_v22 = vsel %vm279_vm1, %v6633_v19, %v3329_v44  ;;  %v3536_v46 = vpop.permute.xlu1 %3535  ;;  %5217 = vrot.lane.b32.xlu2 %v7531_v37, %s6955_s23 }
 0x183   : > { %v6639_v44 = vunpack.i.h.bf16 %v7775_v60  ;;  %v7834_v2 = vpop.permute.xlu2 %6656  ;;  %v3539_v7 = vsel %vm3537_vm15, %v6644_v20, %v6638_v12  ;;  %v3542_v60 = vsel %vm3537_vm15, %v6648_v14, %v6654_v61  ;;  %v6662_v15 = vpop.permute.xlu0 %6661  ;;  %5633 = vrot.lane.b32.xlu0 %v7531_v37, %s6957_s8 }
 0x184   : > { %v7803_v17 = vpop.f32.mrf.mxu0  ;;  %v6658_v49 = vunpack.i.l.bf16 %v7834_v2 }
 0x185   : > { %6151 = vmatmul.msk.f32.vlgmr.msrb.gmra.mxu1 %vm279_vm1, %v7751_v13 }
 0x186   : > { %6152 = vmatmul.msk.f32.vlgmr.msrb.gmra.mxu2 %vm279_vm1, %v7751_v13  ;;  %6153 = vmatmul.msk.f32.vlgmr.msrb.gmra.mxu3 %vm279_vm1, %v7751_v13 }
 0x187   : > { %6155 = vmatmul.msk.f32.vlgmr.msra.gmra.mxu0 %vm279_vm1, %v7808_v41  ;;  %3464 = vmatpush.msrb.mxu1 %v3335_v34  ;;  %v6664_v34 = vunpack.i.h.bf16 %v6662_v15 }
 0x188   : > { %3484 = vmatpush.msrb.mxu2 %v3336_v21  ;;  %3504 = vmatpush.msrb.mxu3 %v3337_v22 }
 0x189   : > { %v1615_v48 = vpop.f32.mrf.mxu2  ;;  %v1635_v55 = vpop.f32.mrf.mxu3  ;;  %3572 = vmatpush.msra.mxu0 %v3538_v45  ;;  %6846 = vrot.lane.b32.xlu1 %v7421_v38, %s6957_s8 }
 0x18a   : > { %v1644_v13 = vadd.f32 %v1615_v48, %v1436_v40  ;;  %v1645_v54 = vadd.f32 %v1635_v55, %v1437_v56  ;;  %v7832_v58 = vpop.f32.mrf.mxu1  ;;  %v3540_v40 = vsel %vm3537_vm15, %v6638_v12, %v6639_v44  ;;  %v3541_v56 = vsel %vm3537_vm15, %v6639_v44, %v6648_v14  ;;  %v7855_v18 = vpop.permute.xlu1 %6666  ;;  %v7867_v48 = vld [vmem:[%s8492_s1 + $0x80] sm:$0xff] }
 0x18b   : > { %v6663_v12 = vunpack.i.l.bf16 %v6662_v15  ;;  %v7870_v55 = vpop.permute.xlu2 %6671  ;;  %v3744_v14 = vpop.permute.xlu0 %3743 }
 0x18c   : > { %v7836_v8 = vpop.f32.mrf.mxu0  ;;  %v6674_v15 = vunpack.i.h.bf16 %v7870_v55 }
 0x18d   : > { %6156 = vmatmul.msk.f32.vlgmr.msra.gmra.mxu1 %vm279_vm1, %v7808_v41  ;;  %v3746_v44 = vsel %vm3745_vm0, %v6663_v12, %v6664_v34 }
 0x18e   : > { %6157 = vmatmul.msk.f32.vlgmr.msra.gmra.mxu2 %vm279_vm1, %v7808_v41  ;;  %6158 = vmatmul.msk.f32.vlgmr.msra.gmra.mxu3 %vm279_vm1, %v7808_v41 }
 0x18f   : > { %6159 = vmatmul.msk.f32.vlgmr.msrb.gmra.mxu0 %vm279_vm1, %v7808_v41  ;;  %3592 = vmatpush.msra.mxu1 %v3539_v7 }
 0x190   : > { %3612 = vmatpush.msra.mxu2 %v3540_v40  ;;  %3632 = vmatpush.msra.mxu3 %v3541_v56  ;;  %v6668_v40 = vunpack.i.l.bf16 %v7855_v18 }
 0x191   : > { %v1743_v19 = vpop.f32.mrf.mxu2  ;;  %v1763_v20 = vpop.f32.mrf.mxu3  ;;  %3652 = vmatpush.msrb.mxu0 %v3542_v60 }
 0x192   : > { %v1848_v21 = vadd.f32 %v1743_v19, %v1640_v6  ;;  %v1849_v22 = vadd.f32 %v1763_v20, %v1641_v33  ;;  %v7860_v45 = vpop.f32.mrf.mxu1  ;;  %v3544_v6 = vsel %vm3537_vm15, %v6649_v29, %v6653_v28  ;;  %v3545_v33 = vsel %vm3537_vm15, %v6653_v28, %v3536_v46  ;;  %v7893_v29 = vpop.permute.xlu1 %6676 }
 0x193   : > { %8499 = vst [vmem:[#allocation5_spill] sm:$0xff] %v7860_v45  ;;  %v6659_v46 = vunpack.i.h.bf16 %v7834_v2  ;;  %v3747_v2 = vsel %vm3745_vm0, %v6664_v34, %v6658_v49  ;;  %v6682_v28 = vpop.permute.xlu2 %6681  ;;  %v6669_v34 = vunpack.i.h.bf16 %v7855_v18  ;;  %v7912_v12 = vpop.permute.xlu0 %6686  ;;  %v6865_v45 = vld [vmem:[%s7042_s9 + $0x20] sm:$0xff] }
 0x194   : > { %v7862_v10 = vpop.f32.mrf.mxu0 }
 0x195   : > { %6160 = vmatmul.msk.f32.vlgmr.msrb.gmra.mxu1 %vm279_vm1, %v7808_v41  ;;  %v3748_v20 = vsel %vm3745_vm0, %v6658_v49, %v6659_v46 }
 0x196   : > { %6161 = vmatmul.msk.f32.vlgmr.msrb.gmra.mxu2 %vm279_vm1, %v7808_v41  ;;  %6162 = vmatmul.msk.f32.vlgmr.msrb.gmra.mxu3 %vm279_vm1, %v7808_v41 }
 0x197   : > { %6164 = vmatmul.msk.f32.vlgmr.msra.gmra.mxu0 %vm279_vm1, %v7867_v48  ;;  %3672 = vmatpush.msrb.mxu1 %v3543_v43 }
 0x198   : > { %3692 = vmatpush.msrb.mxu2 %v3544_v6  ;;  %3712 = vmatpush.msrb.mxu3 %v3545_v33  ;;  %v6673_v33 = vunpack.i.l.bf16 %v7870_v55 }
 0x199   : > { %v1823_v61 = vpop.f32.mrf.mxu2  ;;  %v1843_v7 = vpop.f32.mrf.mxu3  ;;  %3780 = vmatpush.msra.mxu0 %v3746_v44 }
 0x19a   : > { %v1852_v41 = vadd.f32 %v1823_v61, %v1644_v13  ;;  %v1853_v56 = vadd.f32 %v1843_v7, %v1645_v54  ;;  %v7890_v60 = vpop.f32.mrf.mxu1  ;;  %v3749_v13 = vsel %vm3745_vm0, %v6659_v46, %v6668_v40  ;;  %v3750_v54 = vsel %vm3745_vm0, %v6668_v40, %v6674_v15 }
 0x19b   : > { %v6684_v7 = vunpack.i.h.bf16 %v6682_v28  ;;  %v6683_v46 = vunpack.i.l.bf16 %v6682_v28  ;;  %v3752_v38 = vsel %vm3745_vm0, %v6669_v34, %v6673_v33  ;;  %v3753_v55 = vsel %vm3745_vm0, %v6673_v33, %v3744_v14 }
 0x19c   : > { %v7897_v19 = vpop.f32.mrf.mxu0 }
 0x19d   : > { %6165 = vmatmul.msk.f32.vlgmr.msra.gmra.mxu1 %vm279_vm1, %v7867_v48  ;;  %v3972_v40 = vsel %vm3971_vm2, %v6683_v46, %v6684_v7 }
 0x19e   : > { %6166 = vmatmul.msk.f32.vlgmr.msra.gmra.mxu2 %vm279_vm1, %v7867_v48  ;;  %6167 = vmatmul.msk.f32.vlgmr.msra.gmra.mxu3 %vm279_vm1, %v7867_v48 }
 0x19f   : > { %6168 = vmatmul.msk.f32.vlgmr.msrb.gmra.mxu0 %vm279_vm1, %v7867_v48  ;;  %3800 = vmatpush.msra.mxu1 %v3747_v2  ;;  %v3970_v2 = vpop.permute.xlu2 %3969 }
 0x1a0   : > { %3820 = vmatpush.msra.mxu2 %v3748_v20  ;;  %3840 = vmatpush.msra.mxu3 %v3749_v13  ;;  %v6862_v20 = vld [vmem:[%s7042_s9 + $0x28] sm:$0xff]  ;;  %v6863_v13 = vld [vmem:[%s7042_s9 + $0x38] sm:$0xff] }
 0x1a1   : > { %v1951_v43 = vpop.f32.mrf.mxu2  ;;  %v1971_v6 = vpop.f32.mrf.mxu3  ;;  %3860 = vmatpush.msrb.mxu0 %v3750_v54  ;;  %v6825_v14 = vpack.i.bf16 %v6863_v13, %v6862_v20 }
 0x1a2   : > { %v2056_v44 = vadd.f32 %v1951_v43, %v1848_v21  ;;  %v2057_v49 = vadd.f32 %v1971_v6, %v1849_v22  ;;  %v7917_v61 = vpop.f32.mrf.mxu1  ;;  %v3751_v21 = vsel %vm3745_vm0, %v6674_v15, %v6669_v34  ;;  %v7931_v22 = vpop.permute.xlu1 %6691  ;;  %v6678_v15 = vunpack.i.l.bf16 %v7893_v29 }
 0x1a3   : > { %8500 = vst [vmem:[#allocation6_spill] sm:$0xff] %v7917_v61  ;;  %v6679_v34 = vunpack.i.h.bf16 %v7893_v29  ;;  %v6694_v46 = vunpack.i.h.bf16 %v7931_v22  ;;  %6826 = vrot.lane.b32.xlu2 %v6825_v14, %s6956_s30  ;;  %v6693_v13 = vunpack.i.l.bf16 %v7931_v22  ;;  %v6864_v61 = vld [vmem:[%s7042_s9 + $0x18] sm:$0xff]  ;;  %s6267_s30 = sshll.u32 %s7010_s22, 6  ;;  %s5952_s22 = sshll.u32 %s217_s10, 4  ;;  %s5953_s22 = int_to_ptr.vmem [resolvable:$true] %s5952_s22 }
 0x1a4   : > { %v7923_v18 = vpop.f32.mrf.mxu0  ;;  %v3973_v29 = vsel %vm3971_vm2, %v6684_v7, %v6678_v15  ;;  %v6689_v7 = vunpack.i.h.bf16 %v7912_v12 }
 0x1a5   : > { %6169 = vmatmul.msk.f32.vlgmr.msrb.gmra.mxu1 %vm279_vm1, %v7867_v48 }
 0x1a6   : > { %6170 = vmatmul.msk.f32.vlgmr.msrb.gmra.mxu2 %vm279_vm1, %v7867_v48  ;;  %6171 = vmatmul.msk.f32.vlgmr.msrb.gmra.mxu3 %vm279_vm1, %v7867_v48  ;;  %v6688_v48 = vunpack.i.l.bf16 %v7912_v12  ;;  %v3977_v22 = vsel %vm3971_vm2, %v6694_v46, %v6689_v7 }
 0x1a7   : > { %6173 = vmatmul.msk.f32.vlgmr.msra.gmra.mxu0 %vm279_vm1, %v7928_v5  ;;  %3880 = vmatpush.msrb.mxu1 %v3751_v21  ;;  %v7954_v21 = vpop.permute.xlu0 %6696 }
 0x1a8   : > { %3900 = vmatpush.msrb.mxu2 %v3752_v38  ;;  %3920 = vmatpush.msrb.mxu3 %v3753_v55  ;;  %v3974_v55 = vsel %vm3971_vm2, %v6678_v15, %v6679_v34  ;;  %v3975_v37 = vsel %vm3971_vm2, %v6679_v34, %v6688_v48 }
 0x1a9   : > { %v2031_v54 = vpop.f32.mrf.mxu2  ;;  %v2051_v28 = vpop.f32.mrf.mxu3  ;;  %4006 = vmatpush.msra.mxu0 %v3972_v40 }
 0x1aa   : > { %v2060_v43 = vadd.f32 %v2031_v54, %v1852_v41  ;;  %v2061_v6 = vadd.f32 %v2051_v28, %v1853_v56  ;;  %v7951_v33 = vpop.f32.mrf.mxu1  ;;  %v3976_v41 = vsel %vm3971_vm2, %v6688_v48, %v6694_v46  ;;  %v6702_v56 = vpop.permute.xlu1 %6701  ;;  %v6698_v46 = vunpack.i.l.bf16 %v7954_v21 }
 0x1ab   : > { %v7972_v40 = vpop.permute.xlu2 %6706  ;;  %v6704_v14 = vunpack.i.h.bf16 %v6702_v56  ;;  %v6703_v48 = vunpack.i.l.bf16 %v6702_v56  ;;  %v6699_v56 = vunpack.i.h.bf16 %v7954_v21 }
 0x1ac   : > { %v7957_v38 = vpop.f32.mrf.mxu0 }
 0x1ad   : > { %8501 = vst [vmem:[#allocation7_spill] sm:$0xff] %v7957_v38  ;;  %6174 = vmatmul.msk.f32.vlgmr.msra.gmra.mxu1 %vm279_vm1, %v7928_v5  ;;  %v4182_v21 = vsel %vm4179_vm3, %v6698_v46, %v6699_v56 }
 0x1ae   : > { %6175 = vmatmul.msk.f32.vlgmr.msra.gmra.mxu2 %vm279_vm1, %v7928_v5  ;;  %6176 = vmatmul.msk.f32.vlgmr.msra.gmra.mxu3 %vm279_vm1, %v7928_v5 }
 0x1af   : > { %6177 = vmatmul.msk.f32.vlgmr.msrb.gmra.mxu0 %vm279_vm1, %v7928_v5  ;;  %4026 = vmatpush.msra.mxu1 %v3973_v29  ;;  %v6835_v29 = vpack.i.bf16 %v6865_v45, %v6864_v61  ;;  %v3979_v45 = vsel %vm3971_vm2, %v6693_v13, %v3970_v2 }
 0x1b0   : > { %4046 = vmatpush.msra.mxu2 %v3974_v55  ;;  %4066 = vmatpush.msra.mxu3 %v3975_v37  ;;  %v7984_v55 = vld [vmem:[%s8492_s1 + $0x90] sm:$0xff]  ;;  %v6712_v37 = vpop.permute.xlu0 %6711 }
 0x1b1   : > { %v2159_v15 = vpop.f32.mrf.mxu2  ;;  %v2179_v20 = vpop.f32.mrf.mxu3  ;;  %4086 = vmatpush.msrb.mxu0 %v3976_v41  ;;  %6836 = vrot.lane.b32.xlu2 %v6835_v29, %s6957_s8  ;;  %v6866_v29 = vld [vmem:[%s7042_s9 + $0x30] sm:$0xff] }
 0x1b2   : > { %v2264_v54 = vadd.f32 %v2159_v15, %v2056_v44  ;;  %v2265_v28 = vadd.f32 %v2179_v20, %v2057_v49  ;;  %v7975_v34 = vpop.f32.mrf.mxu1  ;;  %v3978_v44 = vsel %vm3971_vm2, %v6689_v7, %v6693_v13  ;;  %v4180_v49 = vsel %vm4179_vm3, %v6703_v48, %v6704_v14  ;;  %v4178_v61 = vpop.permute.xlu1 %4177 }
 0x1b3   : > { %8502 = vst [vmem:[#allocation8_spill] sm:$0xff] %v7975_v34  ;;  %v6708_v7 = vunpack.i.l.bf16 %v7972_v40  ;;  %v6714_v13 = vunpack.i.h.bf16 %v6712_v37  ;;  %v6717_v48 = vpop.permute.xlu2 %6716  ;;  %v6867_v34 = vld [vmem:[%s7042_s9 + $0x40] sm:$0xff] }
 0x1b4   : > { %v7979_v12 = vpop.f32.mrf.mxu0 }
 0x1b5   : > { %6178 = vmatmul.msk.f32.vlgmr.msrb.gmra.mxu1 %vm279_vm1, %v7928_v5 }
 0x1b6   : > { %6179 = vmatmul.msk.f32.vlgmr.msrb.gmra.mxu2 %vm279_vm1, %v7928_v5  ;;  %6180 = vmatmul.msk.f32.vlgmr.msrb.gmra.mxu3 %vm279_vm1, %v7928_v5 }
 0x1b7   : > { %6182 = vmatmul.msk.f32.vlgmr.msra.gmra.mxu0 %vm279_vm1, %v7984_v55  ;;  %4106 = vmatpush.msrb.mxu1 %v3977_v22  ;;  %v6850_v22 = vpack.i.bf16 %v6866_v29, %v6867_v34 }
 0x1b8   : > { %4126 = vmatpush.msrb.mxu2 %v3978_v44  ;;  %4146 = vmatpush.msrb.mxu3 %v3979_v45  ;;  %v4181_v45 = vsel %vm4179_vm3, %v6704_v14, %v6698_v46  ;;  %v6722_v34 = vpop.permute.xlu0 %6721  ;;  %v6709_v14 = vunpack.i.h.bf16 %v7972_v40  ;;  %v6190_v40 = vld [vmem:[%s8492_s1 + $0x98] sm:$0xff] }
 0x1b9   : > { %v2239_v2 = vpop.f32.mrf.mxu2  ;;  %v2259_v41 = vpop.f32.mrf.mxu3  ;;  %4214 = vmatpush.msra.mxu0 %v4180_v49  ;;  %6851 = vrot.lane.b32.xlu2 %v6850_v22, %s6957_s8  ;;  %s5950_s8 = scalar_lea.hbm %s8496_s5, %s6267_s30 }
 0x1ba   : > { %v2268_v5 = vadd.f32 %v2239_v2, %v2060_v43  ;;  %v2269_v15 = vadd.f32 %v2259_v41, %v2061_v6  ;;  %v8002_v20 = vpop.f32.mrf.mxu1  ;;  %v4183_v43 = vsel %vm4179_vm3, %v6699_v56, %v6708_v7  ;;  %v4184_v6 = vsel %vm4179_vm3, %v6708_v7, %v6714_v13  ;;  %v8022_v49 = vpop.permute.xlu1 %6726  ;;  %s5954_s11 = sshll.u32 %s5950_s8, 4  ;;  %s5955_s11 = int_to_ptr.hbm [resolvable:$true] %s5954_s11 }
 0x1bb   : > { %8503 = vst [vmem:[#allocation9_spill] sm:$0xff] %v8002_v20  ;;  %v6713_v41 = vunpack.i.l.bf16 %v6712_v37  ;;  %v6724_v7 = vunpack.i.h.bf16 %v6722_v34  ;;  %s6882_s13 = sshra.s32 %s5955_s11, 4  ;;  %s6883_s13 = int_to_ptr.hbm [resolvable:$true] %s6882_s13 }
 0x1bc   : > { %v8006_v44 = vpop.f32.mrf.mxu0  ;;  %s6884_s9 = scalar_lea.hbm %s6883_s13, 64  ;;  %p6889_p0 = scmp.lt.s32.totalorder %s6883_s13, %s8496_s5 }
 0x1bd   : > { %8504 = vst [vmem:[#allocation10_spill] sm:$0xff] %v8006_v44  ;;  %6183 = vmatmul.msk.f32.vlgmr.msra.gmra.mxu1 %vm279_vm1, %v7984_v55  ;;  %v6723_v44 = vunpack.i.l.bf16 %v6722_v34  ;;  %p6885_p11 = scmp.ne.s32.totalorder %s6883_s13, %s6884_s9  ;;  %p6890_p1 = scmp.lt.s32.totalorder %s6888_s16, %s6884_s9 }
 0x1be   : > { %6184 = vmatmul.msk.f32.vlgmr.msra.gmra.mxu2 %vm279_vm1, %v7984_v55  ;;  %6185 = vmatmul.msk.f32.vlgmr.msra.gmra.mxu3 %vm279_vm1, %v7984_v55 }
 0x1bf   : > { %6186 = vmatmul.msk.f32.vlgmr.msrb.gmra.mxu0 %vm279_vm1, %v7984_v55  ;;  %4234 = vmatpush.msra.mxu1 %v4181_v45  ;;  %v4185_v45 = vsel %vm4179_vm3, %v6714_v13, %v6709_v14  ;;  %v4388_v37 = vsel %vm4387_vm4, %v6723_v44, %v6724_v7  ;;  %v6718_v13 = vunpack.i.l.bf16 %v6717_v48  ;;  %p6886_p12 = pnand %p6885_p11, %p7027_p5  ;;  %p6891_p2 = por %p6890_p1, %p6889_p0 }
 0x1c0   : > { %4254 = vmatpush.msra.mxu2 %v4182_v21  ;;  %4274 = vmatpush.msra.mxu3 %v4183_v43  ;;  %v6732_v21 = vpop.permute.xlu2 %6731  ;;  %v4386_v43 = vpop.permute.xlu0 %4385 }
 0x1c1   : > { %v2367_v46 = vpop.f32.mrf.mxu2  ;;  %v2387_v2 = vpop.f32.mrf.mxu3  ;;  %4294 = vmatpush.msrb.mxu0 %v4184_v6  ;;  %v4389_v38 = vsel %vm4387_vm4, %v6724_v7, %v6718_v13  ;;  %p6887_p13 = pneg %p6886_p12 }
 0x1c2   : > { %v2472_v56 = vadd.f32 %v2367_v46, %v2264_v54  ;;  %v2473_v29 = vadd.f32 %v2387_v2, %v2265_v28  ;;  %v8024_v22 = vpop.f32.mrf.mxu1  ;;  %v4186_v54 = vsel %vm4179_vm3, %v6709_v14, %v6713_v41  ;;  %v4187_v28 = vsel %vm4179_vm3, %v6713_v41, %v4178_v61 }
 0x1c3   : > { %8505 = vst [vmem:[#allocation11_spill] sm:$0xff] %v8024_v22  ;;  %v6719_v14 = vunpack.i.h.bf16 %v6717_v48  ;;  %v6728_v61 = vunpack.i.l.bf16 %v8022_v49  ;;  %v6737_v22 = vpop.permute.xlu1 %6736  ;;  %v6729_v48 = vunpack.i.h.bf16 %v8022_v49  ;;  %p6892_p3 = pnand %p6891_p2, %p6887_p13 }
 0x1c4   : > { %v8026_v20 = vpop.f32.mrf.mxu0 }
 0x1c5   : > { %6187 = vmatmul.msk.f32.vlgmr.msrb.gmra.mxu1 %vm279_vm1, %v7984_v55 }
 0x1c6   : > { %6188 = vmatmul.msk.f32.vlgmr.msrb.gmra.mxu2 %vm279_vm1, %v7984_v55  ;;  %6189 = vmatmul.msk.f32.vlgmr.msrb.gmra.mxu3 %vm279_vm1, %v7984_v55  ;;  %v6734_v55 = vunpack.i.h.bf16 %v6732_v21 }
 0x1c7   : > { %6191 = vmatmul.msk.f32.vlgmr.msra.gmra.mxu0 %vm279_vm1, %v6190_v40  ;;  %4314 = vmatpush.msrb.mxu1 %v4185_v45  ;;  %v4390_v45 = vsel %vm4387_vm4, %v6718_v13, %v6719_v14  ;;  %v6733_v13 = vunpack.i.l.bf16 %v6732_v21 }
 0x1c8   : > { %4334 = vmatpush.msrb.mxu2 %v4186_v54  ;;  %4354 = vmatpush.msrb.mxu3 %v4187_v28  ;;  %v4391_v54 = vsel %vm4387_vm4, %v6719_v14, %v6728_v61  ;;  %v8056_v7 = vpop.permute.xlu0 %6746  ;;  %v4393_v49 = vsel %vm4387_vm4, %v6734_v55, %v6729_v48 }
 0x1c9   : > { %v2447_v6 = vpop.f32.mrf.mxu2  ;;  %v2467_v34 = vpop.f32.mrf.mxu3  ;;  %4422 = vmatpush.msra.mxu0 %v4388_v37  ;;  %v4394_v21 = vsel %vm4387_vm4, %v6729_v48, %v6733_v13  ;;  %v6748_v48 = vunpack.i.l.bf16 %v8056_v7 }
 0x1ca   : > { %v2476_v46 = vadd.f32 %v2447_v6, %v2268_v5  ;;  %v2477_v2 = vadd.f32 %v2467_v34, %v2269_v15  ;;  %v8043_v41 = vpop.f32.mrf.mxu1  ;;  %v4392_v5 = vsel %vm4387_vm4, %v6728_v61, %v6734_v55  ;;  %v6742_v15 = vpop.permute.xlu2 %6741 }
 0x1cb   : > { %8506 = vst [vmem:[#allocation12_spill] sm:$0xff] %v8043_v41  ;;  %v6743_v61 = vunpack.i.l.bf16 %v6742_v15 }
 0x1cc   : > { %v8045_v44 = vpop.f32.mrf.mxu0 }
 0x1cd   : > { %8507 = vst [vmem:[#allocation13_spill] sm:$0xff] %v8045_v44  ;;  %6192 = vmatmul.msk.f32.vlgmr.msra.gmra.mxu1 %vm279_vm1, %v6190_v40  ;;  %v6744_v44 = vunpack.i.h.bf16 %v6742_v15 }
 0x1ce   : > { %6193 = vmatmul.msk.f32.vlgmr.msra.gmra.mxu2 %vm279_vm1, %v6190_v40  ;;  %6194 = vmatmul.msk.f32.vlgmr.msra.gmra.mxu3 %vm279_vm1, %v6190_v40 }
 0x1cf   : > { %6195 = vmatmul.msk.f32.vlgmr.msrb.gmra.mxu0 %vm279_vm1, %v6190_v40  ;;  %4442 = vmatpush.msra.mxu1 %v4389_v38  ;;  %v6199_v38 = vld [vmem:[%s8492_s1 + $0xa0] sm:$0xff] }
 0x1d0   : > { %4462 = vmatpush.msra.mxu2 %v4390_v45  ;;  %4482 = vmatpush.msra.mxu3 %v4391_v54  ;;  %v6752_v45 = vpop.permute.xlu1 %6751 }
 0x1d1   : > { %v2575_v28 = vpop.f32.mrf.mxu2  ;;  %v2595_v37 = vpop.f32.mrf.mxu3  ;;  %4502 = vmatpush.msrb.mxu0 %v4392_v5  ;;  %v6738_v5 = vunpack.i.l.bf16 %v6737_v22 }
 0x1d2   : > { %v2680_v6 = vadd.f32 %v2575_v28, %v2472_v56  ;;  %v2681_v34 = vadd.f32 %v2595_v37, %v2473_v29  ;;  %v8058_v14 = vpop.f32.mrf.mxu1  ;;  %v4395_v56 = vsel %vm4387_vm4, %v6733_v13, %v4386_v43  ;;  %v4596_v29 = vsel %vm4595_vm5, %v6743_v61, %v6744_v44  ;;  %v4594_v54 = vpop.permute.xlu2 %4593 }
 0x1d3   : > { %8508 = vst [vmem:[#allocation14_spill] sm:$0xff] %v8058_v14  ;;  %v6739_v28 = vunpack.i.h.bf16 %v6737_v22  ;;  %v6757_v14 = vpop.permute.xlu0 %6756 }
 0x1d4   : > { %v8060_v41 = vpop.f32.mrf.mxu0 }
 0x1d5   : > { %8509 = vst [vmem:[#allocation15_spill] sm:$0xff] %v8060_v41  ;;  %6196 = vmatmul.msk.f32.vlgmr.msrb.gmra.mxu1 %vm279_vm1, %v6190_v40  ;;  %v4597_v41 = vsel %vm4595_vm5, %v6744_v44, %v6738_v5 }
 0x1d6   : > { %6197 = vmatmul.msk.f32.vlgmr.msrb.gmra.mxu2 %vm279_vm1, %v6190_v40  ;;  %6198 = vmatmul.msk.f32.vlgmr.msrb.gmra.mxu3 %vm279_vm1, %v6190_v40  ;;  %v6754_v40 = vunpack.i.h.bf16 %v6752_v45 }
 0x1d7   : > { %6200 = vmatmul.msk.f32.vlgmr.msra.gmra.mxu0 %vm279_vm1, %v6199_v38  ;;  %4522 = vmatpush.msrb.mxu1 %v4393_v49  ;;  %v4598_v49 = vsel %vm4595_vm5, %v6738_v5, %v6739_v28  ;;  %v6753_v5 = vunpack.i.l.bf16 %v6752_v45 }
 0x1d8   : > { %4542 = vmatpush.msrb.mxu2 %v4394_v21  ;;  %4562 = vmatpush.msrb.mxu3 %v4395_v56  ;;  %v4599_v21 = vsel %vm4595_vm5, %v6739_v28, %v6748_v48  ;;  %v4600_v22 = vsel %vm4595_vm5, %v6748_v48, %v6754_v40 }
 0x1d9   : > { %v2655_v55 = vpop.f32.mrf.mxu2  ;;  %v2675_v15 = vpop.f32.mrf.mxu3  ;;  %4630 = vmatpush.msra.mxu0 %v4596_v29 }
 0x1da   : > { %v2684_v43 = vadd.f32 %v2655_v55, %v2476_v46  ;;  %v2685_v37 = vadd.f32 %v2675_v15, %v2477_v2  ;;  %v8074_v13 = vpop.f32.mrf.mxu1  ;;  %v6762_v46 = vpop.permute.xlu1 %6761  ;;  %v6749_v2 = vunpack.i.h.bf16 %v8056_v7 }
 0x1db   : > { %8510 = vst [vmem:[#allocation16_spill] sm:$0xff] %v8074_v13  ;;  %v8087_v44 = vpop.permute.xlu2 %6766  ;;  %v6763_v48 = vunpack.i.l.bf16 %v6762_v46 }
 0x1dc   : > { %v8076_v61 = vpop.f32.mrf.mxu0  ;;  %v4601_v7 = vsel %vm4595_vm5, %v6754_v40, %v6749_v2  ;;  %v6758_v40 = vunpack.i.l.bf16 %v6757_v14 }
 0x1dd   : > { %8511 = vst [vmem:[#allocation17_spill] sm:$0xff] %v8076_v61  ;;  %6201 = vmatmul.msk.f32.vlgmr.msra.gmra.mxu1 %vm279_vm1, %v6199_v38  ;;  %v6764_v61 = vunpack.i.h.bf16 %v6762_v46 }
 0x1de   : > { %6202 = vmatmul.msk.f32.vlgmr.msra.gmra.mxu2 %vm279_vm1, %v6199_v38  ;;  %6203 = vmatmul.msk.f32.vlgmr.msra.gmra.mxu3 %vm279_vm1, %v6199_v38 }
 0x1df   : > { %6204 = vmatmul.msk.f32.vlgmr.msrb.gmra.mxu0 %vm279_vm1, %v6199_v38  ;;  %4650 = vmatpush.msra.mxu1 %v4597_v41  ;;  %v8096_v41 = vld [vmem:[%s8492_s1 + $0xa8] sm:$0xff]  ;;  %v4804_v45 = vsel %vm4803_vm6, %v6763_v48, %v6764_v61 }
 0x1e0   : > { %4670 = vmatpush.msra.mxu2 %v4598_v49  ;;  %4690 = vmatpush.msra.mxu3 %v4599_v21  ;;  %v8099_v49 = vpop.permute.xlu0 %6771 }
 0x1e1   : > { %v2783_v56 = vpop.f32.mrf.mxu2  ;;  %v2803_v29 = vpop.f32.mrf.mxu3  ;;  %4710 = vmatpush.msrb.mxu0 %v4600_v22  ;;  %v464_v22 = vadd.f32 %v7438_v50, %v7364_v9  ;;  %v6774_v48 = vunpack.i.h.bf16 %v8099_v49  ;;  %v4805_v9 = vsel %vm4803_vm6, %v6764_v61, %v6758_v40  ;;  %v484_v50 = vadd.f32 %v7469_v62, %v7389_v24 }
 0x1e2   : > { %v2888_v55 = vadd.f32 %v2783_v56, %v2680_v6  ;;  %v2889_v15 = vadd.f32 %v2803_v29, %v2681_v34  ;;  %v8089_v28 = vpop.f32.mrf.mxu1  ;;  %v4602_v6 = vsel %vm4595_vm5, %v6749_v2, %v6753_v5  ;;  %v4603_v34 = vsel %vm4595_vm5, %v6753_v5, %v4594_v54  ;;  %v8107_v21 = vpop.permute.xlu1 %4801 }
 0x1e3   : > { %v6759_v2 = vunpack.i.h.bf16 %v6757_v14  ;;  %v6768_v56 = vunpack.i.l.bf16 %v8087_v44  ;;  %v544_v24 = vadd.f32 %v7476_v4, %v7400_v30  ;;  %v807_v62 = vadd.f32 %v7540_v47, %v484_v50 }
 0x1e4   : > { %v8091_v13 = vpop.f32.mrf.mxu0 }
 0x1e5   : > { %6205 = vmatmul.msk.f32.vlgmr.msrb.gmra.mxu1 %vm279_vm1, %v6199_v38  ;;  %v1015_v30 = vadd.f32 %v7599_v26, %v807_v62 }
 0x1e6   : > { %6206 = vmatmul.msk.f32.vlgmr.msrb.gmra.mxu2 %vm279_vm1, %v6199_v38  ;;  %6207 = vmatmul.msk.f32.vlgmr.msrb.gmra.mxu3 %vm279_vm1, %v6199_v38 }
 0x1e7   : > { %6209 = vmatmul.msk.f32.vlgmr.msra.gmra.mxu0 %vm279_vm1, %v8096_v41  ;;  %4730 = vmatpush.msrb.mxu1 %v4601_v7  ;;  %v806_v7 = vadd.f32 %v7507_v31, %v464_v22  ;;  %v4808_v31 = vsel %vm4803_vm6, %v6768_v56, %v6774_v48 }
 0x1e8   : > { %4750 = vmatpush.msrb.mxu2 %v4602_v6  ;;  %4770 = vmatpush.msrb.mxu3 %v4603_v34  ;;  %v8122_v6 = vpop.permute.xlu2 %6776  ;;  %v8139_v61 = vpop.permute.xlu0 %6781 }
 0x1e9   : > { %v2863_v46 = vpop.f32.mrf.mxu2  ;;  %v2883_v54 = vpop.f32.mrf.mxu3  ;;  %4838 = vmatpush.msra.mxu0 %v4804_v45  ;;  %v1014_v14 = vadd.f32 %v7573_v3, %v806_v7  ;;  %v564_v45 = vadd.f32 %v7505_v27, %v7428_v42 }
 0x1ea   : > { %v8114_v38 = vadd.f32 %v2863_v46, %v2684_v43  ;;  %v8116_v29 = vadd.f32 %v2883_v54, %v2685_v37  ;;  %v8118_v5 = vpop.f32.mrf.mxu1  ;;  %v4806_v43 = vsel %vm4803_vm6, %v6758_v40, %v6759_v2  ;;  %v4807_v37 = vsel %vm4803_vm6, %v6759_v2, %v6768_v56  ;;  %v8150_v22 = vpop.permute.xlu1 %6786 }
 0x1eb   : > { %v1222_v3 = vadd.f32 %v7630_v53, %v1014_v14  ;;  %v6769_v40 = vunpack.i.h.bf16 %v8087_v44  ;;  %v810_v46 = vadd.f32 %v7547_v51, %v544_v24  ;;  %v6773_v54 = vunpack.i.l.bf16 %v8099_v49 }
 0x1ec   : > { %v8124_v34 = vpop.f32.mrf.mxu0  ;;  %v6784_v44 = vunpack.i.h.bf16 %v8139_v61  ;;  %v6783_v56 = vunpack.i.l.bf16 %v8139_v61  ;;  %v1223_v49 = vadd.f32 %v7659_v11, %v1015_v30  ;;  %v6788_v61 = vunpack.i.l.bf16 %v8150_v22 }
 0x1ed   : > { %6210 = vmatmul.msk.f32.vlgmr.msra.gmra.mxu1 %vm279_vm1, %v8096_v41  ;;  %v1430_v4 = vadd.f32 %v7689_v39, %v1222_v3  ;;  %v1018_v51 = vadd.f32 %v7606_v32, %v810_v46  ;;  %v811_v39 = vadd.f32 %v7567_v0, %v564_v45  ;;  %v4810_v0 = vsel %vm4803_vm6, %v6769_v40, %v6773_v54 }
 0x1ee   : > { %6211 = vmatmul.msk.f32.vlgmr.msra.gmra.mxu2 %vm279_vm1, %v8096_v41  ;;  %6212 = vmatmul.msk.f32.vlgmr.msra.gmra.mxu3 %vm279_vm1, %v8096_v41  ;;  %v4811_v11 = vsel %vm4803_vm6, %v6773_v54, %v8107_v21  ;;  %v1431_v14 = vadd.f32 %v7715_v59, %v1223_v49 }
 0x1ef   : > { %6213 = vmatmul.msk.f32.vlgmr.msrb.gmra.mxu0 %vm279_vm1, %v8096_v41  ;;  %4858 = vmatpush.msra.mxu1 %v4805_v9  ;;  %v1638_v26 = vadd.f32 %v7746_v23, %v1430_v4  ;;  %v1226_v9 = vadd.f32 %v7663_v16, %v1018_v51  ;;  %v1019_v50 = vadd.f32 %v7628_v52, %v811_v39  ;;  %v8513_v4 = vld [vmem:[#allocation15_spill] sm:$0xff]  ;;  %v8515_v51 = vld [vmem:[#allocation9_spill] sm:$0xff] }
 0x1f0   : > { %4878 = vmatpush.msra.mxu2 %v4806_v43  ;;  %4898 = vmatpush.msra.mxu3 %v4807_v37  ;;  %v8183_v23 = vpop.permute.xlu2 %6791  ;;  %v5012_v16 = vsel %vm5011_vm7, %v6783_v56, %v6784_v44  ;;  %v1639_v59 = vadd.f32 %v7772_v57, %v1431_v14  ;;  %v6778_v43 = vunpack.i.l.bf16 %v8122_v6 }
 0x1f1   : > { %v2991_v47 = vpop.f32.mrf.mxu2  ;;  %v3011_v53 = vpop.f32.mrf.mxu3  ;;  %4918 = vmatpush.msrb.mxu0 %v4808_v31  ;;  %v1846_v32 = vadd.f32 %v7803_v17, %v1638_v26  ;;  %v1227_v52 = vadd.f32 %v7687_v35, %v1019_v50  ;;  %v8516_v26 = vld [vmem:[#allocation10_spill] sm:$0xff] }
 0x1f2   : > { %v8156_v2 = vadd.f32 %v2991_v47, %v2888_v55  ;;  %v8158_v42 = vadd.f32 %v3011_v53, %v2889_v15  ;;  %v8160_v27 = vpop.f32.mrf.mxu1  ;;  %v8173_v55 = vld [vmem:[%s8492_s1 + $0xb0] sm:$0xff]  ;;  %v4809_v15 = vsel %vm4803_vm6, %v6774_v48, %v6769_v40  ;;  %v8192_v17 = vpop.permute.xlu0 %5009  ;;  %v1434_v48 = vadd.f32 %v7721_v63, %v1226_v9 }
 0x1f3   : > { %v2054_v21 = vadd.f32 %v7862_v10, %v1846_v32  ;;  %v6779_v10 = vunpack.i.h.bf16 %v8122_v6  ;;  %v1847_v24 = vadd.f32 %v7832_v58, %v1639_v59  ;;  %v8217_v6 = vpop.permute.xlu1 %6796  ;;  %v1435_v45 = vadd.f32 %v7740_v25, %v1227_v52 }
 0x1f4   : > { %v8168_v7 = vpop.f32.mrf.mxu0  ;;  %v6793_v32 = vunpack.i.l.bf16 %v8183_v23 }
 0x1f5   : > { %6214 = vmatmul.msk.f32.vlgmr.msrb.gmra.mxu1 %vm279_vm1, %v8096_v41  ;;  %v2262_v37 = vadd.f32 %v7923_v18, %v2054_v21  ;;  %v2055_v58 = vadd.f32 %v7890_v60, %v1847_v24  ;;  %v1643_v30 = vadd.f32 %v7801_v36, %v1435_v45  ;;  %v8514_v36 = vld [vmem:[#allocation5_spill] sm:$0xff]  ;;  %v8518_v21 = vld [vmem:[#allocation6_spill] sm:$0xff] }
 0x1f6   : > { %6215 = vmatmul.msk.f32.vlgmr.msrb.gmra.mxu2 %vm279_vm1, %v8096_v41  ;;  %6216 = vmatmul.msk.f32.vlgmr.msrb.gmra.mxu3 %vm279_vm1, %v8096_v41  ;;  %v1642_v41 = vadd.f32 %v7779_v1, %v1434_v48  ;;  %v6794_v1 = vunpack.i.h.bf16 %v8183_v23  ;;  %v8519_v23 = vld [vmem:[#allocation13_spill] sm:$0xff] }
 0x1f7   : > { %6218 = vmatmul.msk.f32.vlgmr.msra.gmra.mxu0 %vm279_vm1, %v8173_v55  ;;  %4938 = vmatpush.msrb.mxu1 %v4809_v15  ;;  %v2470_v3 = vadd.f32 %v7979_v12, %v2262_v37  ;;  %v5015_v12 = vsel %vm5011_vm7, %v6779_v10, %v6788_v61  ;;  %v2263_v60 = vadd.f32 %v7951_v33, %v2055_v58 }
 0x1f8   : > { %4958 = vmatpush.msrb.mxu2 %v4810_v0  ;;  %4978 = vmatpush.msrb.mxu3 %v4811_v11  ;;  %v1850_v18 = vadd.f32 %v7836_v8, %v1642_v41  ;;  %v5014_v8 = vsel %vm5011_vm7, %v6778_v43, %v6779_v10  ;;  %v5016_v25 = vsel %vm5011_vm7, %v6788_v61, %v6794_v1  ;;  %v8241_v53 = vpop.permute.xlu2 %6801  ;;  %v8520_v41 = vld [vmem:[#allocation16_spill] sm:$0xff] }
 0x1f9   : > { %v3071_v31 = vpop.f32.mrf.mxu2  ;;  %v3091_v63 = vpop.f32.mrf.mxu3  ;;  %5046 = vmatpush.msra.mxu0 %v5012_v16  ;;  %v2678_v46 = vadd.f32 %v8026_v20, %v2470_v3  ;;  %v1851_v54 = vadd.f32 %v8514_v36, %v1643_v30  ;;  %v2471_v33 = vadd.f32 %v8515_v51, %v2263_v60  ;;  %v6804_v50 = vunpack.i.h.bf16 %v8241_v53  ;;  %v8517_v16 = vld [vmem:[#allocation12_spill] sm:$0xff] }
 0x1fa   : > { %v8207_v35 = vadd.f32 %v3071_v31, %v8114_v38  ;;  %v8210_v57 = vadd.f32 %v3091_v63, %v8116_v29  ;;  %v8212_v62 = vpop.f32.mrf.mxu1  ;;  %v5013_v38 = vsel %vm5011_vm7, %v6784_v44, %v6778_v43  ;;  %v2058_v29 = vadd.f32 %v7897_v19, %v1850_v18  ;;  %v8512_v19 = vld [vmem:[#allocation7_spill] sm:$0xff]  ;;  %v8245_v56 = vpop.permute.xlu0 %6806  ;;  %v8521_v61 = vld [vmem:[#allocation8_spill] sm:$0xff]  ;;  %v8522_v18 = vld [vmem:[#allocation17_spill] sm:$0xff] }
 0x1fb   : > { %v2886_v47 = vadd.f32 %v8513_v4, %v2678_v46  ;;  %v6789_v44 = vunpack.i.h.bf16 %v8150_v22  ;;  %v6803_v14 = vunpack.i.l.bf16 %v8241_v53  ;;  %v2679_v48 = vadd.f32 %v8517_v16, %v2471_v33  ;;  %v8277_v10 = vpop.permute.xlu1 %6811  ;;  %v8524_v4 = vld [vmem:[#allocation14_spill] sm:$0xff] }
 0x1fc   : > { %v8221_v40 = vpop.f32.mrf.mxu0  ;;  %v2266_v20 = vadd.f32 %v8512_v19, %v2058_v29  ;;  %v2059_v52 = vadd.f32 %v8518_v21, %v1851_v54  ;;  %v5019_v63 = vsel %vm5011_vm7, %v6793_v32, %v8192_v17  ;;  %v8523_v17 = vld [vmem:[#allocation11_spill] sm:$0xff]  ;;  %v6799_v30 = vunpack.i.h.bf16 %v8217_v6 }
 0x1fd   : > { %6219 = vmatmul.msk.f32.vlgmr.msra.gmra.mxu1 %vm279_vm1, %v8173_v55  ;;  %v3094_v49 = vadd.f32 %v8091_v13, %v2886_v47  ;;  %v2887_v37 = vadd.f32 %v8520_v41, %v2679_v48  ;;  %v6809_v33 = vunpack.i.h.bf16 %v8245_v56 }
 0x1fe   : > { %6220 = vmatmul.msk.f32.vlgmr.msra.gmra.mxu2 %vm279_vm1, %v8173_v55  ;;  %6221 = vmatmul.msk.f32.vlgmr.msra.gmra.mxu3 %vm279_vm1, %v8173_v55  ;;  %v2474_v39 = vadd.f32 %v8516_v26, %v2266_v20  ;;  %v2267_v24 = vadd.f32 %v8521_v61, %v2059_v52  ;;  %v6814_v20 = vunpack.i.h.bf16 %v8277_v10 }
 0x1ff   : > { %6222 = vmatmul.msk.f32.vlgmr.msrb.gmra.mxu0 %vm279_vm1, %v8173_v55  ;;  %5066 = vmatpush.msra.mxu1 %v5013_v38  ;;  %v3302_v13 = vadd.f32 %v8168_v7, %v3094_v49  ;;  %v5018_v7 = vsel %vm5011_vm7, %v6789_v44, %v6793_v32  ;;  %v3095_v45 = vadd.f32 %v8118_v5, %v2887_v37  ;;  %v6798_v38 = vunpack.i.l.bf16 %v8217_v6 }
 0x200   : > { %5086 = vmatpush.msra.mxu2 %v5014_v8  ;;  %5106 = vmatpush.msra.mxu3 %v5015_v12  ;;  %v2682_v59 = vadd.f32 %v8519_v23, %v2474_v39  ;;  %v2475_v58 = vadd.f32 %v8523_v17, %v2267_v24  ;;  %v5218_v29 = vpop.permute.xlu2 %5217  ;;  %v6808_v5 = vunpack.i.l.bf16 %v8245_v56 }
 0x201   : > { %v3199_v15 = vpop.f32.mrf.mxu2  ;;  %v3219_v9 = vpop.f32.mrf.mxu3  ;;  %5126 = vmatpush.msrb.mxu0 %v5016_v25  ;;  %v5221_v6 = vsel %vm5219_vm8, %v6804_v50, %v6798_v38 }
 0x202   : > { %v8252_v0 = vadd.f32 %v3199_v15, %v8156_v2  ;;  %v8255_v22 = vadd.f32 %v3219_v9, %v8158_v42  ;;  %v3259_v11 = vpop.f32.mrf.mxu1  ;;  %v8266_v2 = vld [vmem:[%s8492_s1 + $0xb8] sm:$0xff]  ;;  %v5017_v42 = vsel %vm5011_vm7, %v6794_v1, %v6789_v44  ;;  %v5220_v1 = vsel %vm5219_vm8, %v6803_v14, %v6804_v50 }
 0x203   : > { %v2890_v3 = vadd.f32 %v8522_v18, %v2682_v59  ;;  %v2683_v47 = vadd.f32 %v8524_v4, %v2475_v58  ;;  %v6813_v15 = vunpack.i.l.bf16 %v8277_v10  ;;  %v6244_v4 = vld [vmem:[%s8492_s1 + $0xc8] sm:$0xff] }
 0x204   : > { %v3366_v43 = vpop.f32.mrf.mxu0 }
 0x205   : > { %v8270_v31 = vadd.f32 %v3366_v43, %v3302_v13  ;;  %6223 = vmatmul.msk.f32.vlgmr.msrb.gmra.mxu1 %vm279_vm1, %v8173_v55  ;;  %v3098_v46 = vadd.f32 %v8124_v34, %v2890_v3  ;;  %v2891_v54 = vadd.f32 %v8089_v28, %v2683_v47  ;;  %v6822_v28 = vpop.permute.xlu1 %6821  ;;  %v5225_v13 = vsel %vm5219_vm8, %v6814_v20, %v6809_v33 }
 0x206   : > { %6224 = vmatmul.msk.f32.vlgmr.msrb.gmra.mxu2 %vm279_vm1, %v8173_v55  ;;  %6225 = vmatmul.msk.f32.vlgmr.msrb.gmra.mxu3 %vm279_vm1, %v8173_v55  ;;  %v3303_v55 = vadd.f32 %v8212_v62, %v3095_v45  ;;  %v8300_v62 = vpop.permute.xlu0 %6816  ;;  %v6824_v50 = vunpack.i.h.bf16 %v6822_v28  ;;  %v6823_v14 = vunpack.i.l.bf16 %v6822_v28 }
 0x207   : > { %6227 = vmatmul.msk.f32.vlgmr.msra.gmra.mxu0 %vm279_vm1, %v8266_v2  ;;  %5146 = vmatpush.msrb.mxu1 %v5017_v42  ;;  %v3306_v34 = vadd.f32 %v8221_v40, %v3098_v46  ;;  %v5224_v40 = vsel %vm5219_vm8, %v6808_v5, %v6814_v20  ;;  %v3099_v51 = vadd.f32 %v8160_v27, %v2891_v54  ;;  %v6818_v59 = vunpack.i.l.bf16 %v8300_v62 }
 0x208   : > { %5166 = vmatpush.msrb.mxu2 %v5018_v7  ;;  %5186 = vmatpush.msrb.mxu3 %v5019_v63  ;;  %v8320_v48 = vpop.permute.xlu2 %6826  ;;  %v5428_v23 = vsel %vm5427_vm9, %v6823_v14, %v6824_v50  ;;  %v6819_v41 = vunpack.i.h.bf16 %v8300_v62 }
 0x209   : > { %v3279_v8 = vpop.f32.mrf.mxu2  ;;  %v3299_v12 = vpop.f32.mrf.mxu3  ;;  %5254 = vmatpush.msra.mxu0 %v5220_v1  ;;  %v3307_v26 = vadd.f32 %v3259_v11, %v3099_v51  ;;  %v6235_v11 = vld [vmem:[%s8492_s1 + $0xc0] sm:$0xff]  ;;  %v6828_v37 = vunpack.i.l.bf16 %v8320_v48  ;;  %v5429_v24 = vsel %vm5427_vm9, %v6824_v50, %v6818_v59 }
 0x20a   : > { %v3308_v25 = vadd.f32 %v3279_v8, %v8207_v35  ;;  %v3309_v60 = vadd.f32 %v3299_v12, %v8210_v57  ;;  %v3386_v19 = vpop.f32.mrf.mxu1  ;;  %v5222_v35 = vsel %vm5219_vm8, %v6798_v38, %v6799_v30  ;;  %v5223_v57 = vsel %vm5219_vm8, %v6799_v30, %v6808_v5 }
 0x20b   : > { %v3510_v53 = vadd.f32 %v3386_v19, %v3303_v55  ;;  %v5430_v3 = vsel %vm5427_vm9, %v6818_v59, %v6819_v41  ;;  %v5431_v45 = vsel %vm5427_vm9, %v6819_v41, %v6828_v37  ;;  %v6253_v59 = vld [vmem:[%s8492_s1 + $0xd0] sm:$0xff] }
 0x20c   : > { %v3446_v36 = vpop.f32.mrf.mxu0 }
 0x20d   : > { %v3513_v44 = vadd.f32 %v3446_v36, %v3306_v34  ;;  %6228 = vmatmul.msk.f32.vlgmr.msra.gmra.mxu1 %vm279_vm1, %v8266_v2  ;;  %v5426_v1 = vpop.permute.xlu1 %5425 }
 0x20e   : > { %6229 = vmatmul.msk.f32.vlgmr.msra.gmra.mxu2 %vm279_vm1, %v8266_v2  ;;  %6230 = vmatmul.msk.f32.vlgmr.msra.gmra.mxu3 %vm279_vm1, %v8266_v2  ;;  %v6832_v52 = vpop.permute.xlu0 %6831 }
 0x20f   : > { %6231 = vmatmul.msk.f32.vlgmr.msrb.gmra.mxu0 %vm279_vm1, %v8266_v2  ;;  %5274 = vmatpush.msra.mxu1 %v5221_v6  ;;  %v6833_v8 = vunpack.i.l.bf16 %v6832_v52 }
 0x210   : > { %5294 = vmatpush.msra.mxu2 %v5222_v35  ;;  %5314 = vmatpush.msra.mxu3 %v5223_v57  ;;  %v6837_v17 = vpop.permute.xlu2 %6836 }
 0x211   : > { %v3406_v39 = vpop.f32.mrf.mxu2  ;;  %v3426_v49 = vpop.f32.mrf.mxu3  ;;  %5334 = vmatpush.msrb.mxu0 %v5224_v40  ;;  %v5435_v62 = vsel %vm5427_vm9, %v6833_v8, %v5426_v1  ;;  %v6839_v40 = vunpack.i.h.bf16 %v6837_v17 }
 0x212   : > { %v3511_v9 = vadd.f32 %v3406_v39, %v8252_v0  ;;  %v3512_v32 = vadd.f32 %v3426_v49, %v8255_v22  ;;  %v3466_v27 = vpop.f32.mrf.mxu1  ;;  %v5226_v0 = vsel %vm5219_vm8, %v6809_v33, %v6813_v15  ;;  %v5227_v22 = vsel %vm5219_vm8, %v6813_v15, %v5218_v29 }
 0x213   : > { %v3514_v16 = vadd.f32 %v3466_v27, %v3307_v26  ;;  %v6829_v29 = vunpack.i.h.bf16 %v8320_v48 }
 0x214   : > { %v3574_v56 = vpop.f32.mrf.mxu0 }
 0x215   : > { %v3717_v21 = vadd.f32 %v3574_v56, %v8270_v31  ;;  %6232 = vmatmul.msk.f32.vlgmr.msrb.gmra.mxu1 %vm279_vm1, %v8266_v2  ;;  %v6847_v36 = vpop.permute.xlu1 %6846 }
 0x216   : > { %6233 = vmatmul.msk.f32.vlgmr.msrb.gmra.mxu2 %vm279_vm1, %v8266_v2  ;;  %6234 = vmatmul.msk.f32.vlgmr.msrb.gmra.mxu3 %vm279_vm1, %v8266_v2  ;;  %v6834_v2 = vunpack.i.h.bf16 %v6832_v52  ;;  %v6842_v38 = vpop.permute.xlu0 %6841  ;;  %v6848_v51 = vunpack.i.l.bf16 %v6847_v36 }
 0x217   : > { %6236 = vmatmul.msk.f32.vlgmr.msra.gmra.mxu0 %vm279_vm1, %v6235_v11  ;;  %5354 = vmatpush.msrb.mxu1 %v5225_v13 }
 0x218   : > { %5374 = vmatpush.msrb.mxu2 %v5226_v0  ;;  %5394 = vmatpush.msrb.mxu3 %v5227_v22  ;;  %v5432_v58 = vsel %vm5427_vm9, %v6828_v37, %v6834_v2  ;;  %v5433_v47 = vsel %vm5427_vm9, %v6834_v2, %v6829_v29  ;;  %v6852_v54 = vpop.permute.xlu2 %6851  ;;  %v5639_v50 = vsel %vm5635_vm10, %v6839_v40, %v6848_v51 }
 0x219   : > { %v3486_v43 = vpop.f32.mrf.mxu2  ;;  %v3506_v42 = vpop.f32.mrf.mxu3  ;;  %5462 = vmatpush.msra.mxu0 %v5428_v23  ;;  %v6854_v39 = vunpack.i.h.bf16 %v6852_v54 }
 0x21a   : > { %v3515_v31 = vadd.f32 %v3486_v43, %v3308_v25  ;;  %v3516_v7 = vadd.f32 %v3506_v42, %v3309_v60  ;;  %v3594_v63 = vpop.f32.mrf.mxu1  ;;  %v6844_v25 = vunpack.i.h.bf16 %v6842_v38  ;;  %v6843_v60 = vunpack.i.l.bf16 %v6842_v38 }
 0x21b   : > { %v3718_v10 = vadd.f32 %v3594_v63, %v3510_v53  ;;  %v5434_v53 = vsel %vm5427_vm9, %v6829_v29, %v6833_v8  ;;  %v5640_v14 = vsel %vm5635_vm10, %v6848_v51, %v6854_v39 }
 0x21c   : > { %v3654_v61 = vpop.f32.mrf.mxu0  ;;  %v5636_v6 = vsel %vm5635_vm10, %v6843_v60, %v6844_v25 }
 0x21d   : > { %v3721_v18 = vadd.f32 %v3654_v61, %v3513_v44  ;;  %6237 = vmatmul.msk.f32.vlgmr.msra.gmra.mxu1 %vm279_vm1, %v6235_v11  ;;  %v6838_v44 = vunpack.i.l.bf16 %v6837_v17 }
 0x21e   : > { %6238 = vmatmul.msk.f32.vlgmr.msra.gmra.mxu2 %vm279_vm1, %v6235_v11  ;;  %6239 = vmatmul.msk.f32.vlgmr.msra.gmra.mxu3 %vm279_vm1, %v6235_v11  ;;  %v5634_v22 = vpop.permute.xlu0 %5633 }
 0x21f   : > { %6240 = vmatmul.msk.f32.vlgmr.msrb.gmra.mxu0 %vm279_vm1, %v6235_v11  ;;  %5482 = vmatpush.msra.mxu1 %v5429_v24  ;;  %v5638_v27 = vsel %vm5635_vm10, %v6838_v44, %v6839_v40 }
 0x220   : > { %5502 = vmatpush.msra.mxu2 %v5430_v3  ;;  %5522 = vmatpush.msra.mxu3 %v5431_v45 }
 0x221   : > { %v3614_v46 = vpop.f32.mrf.mxu2  ;;  %v3634_v55 = vpop.f32.mrf.mxu3  ;;  %5542 = vmatpush.msrb.mxu0 %v5432_v58 }
 0x222   : > { %v3719_v12 = vadd.f32 %v3614_v46, %v3511_v9  ;;  %v3720_v30 = vadd.f32 %v3634_v55, %v3512_v32  ;;  %v3674_v5 = vpop.f32.mrf.mxu1  ;;  %v5637_v9 = vsel %vm5635_vm10, %v6844_v25, %v6838_v44 }
 0x223   : > { %v3722_v19 = vadd.f32 %v3674_v5, %v3514_v16  ;;  %v6849_v16 = vunpack.i.h.bf16 %v6847_v36 }
 0x224   : > { %v3782_v20 = vpop.f32.mrf.mxu0 }
 0x225   : > { %v3925_v34 = vadd.f32 %v3782_v20, %v3717_v21  ;;  %6241 = vmatmul.msk.f32.vlgmr.msrb.gmra.mxu1 %vm279_vm1, %v6235_v11  ;;  %v5641_v43 = vsel %vm5635_vm10, %v6854_v39, %v6849_v16 }
 0x226   : > { %6242 = vmatmul.msk.f32.vlgmr.msrb.gmra.mxu2 %vm279_vm1, %v6235_v11  ;;  %6243 = vmatmul.msk.f32.vlgmr.msrb.gmra.mxu3 %vm279_vm1, %v6235_v11  ;;  %v6853_v11 = vunpack.i.l.bf16 %v6852_v54 }
 0x227   : > { %6245 = vmatmul.msk.f32.vlgmr.msra.gmra.mxu0 %vm279_vm1, %v6244_v4  ;;  %5562 = vmatpush.msrb.mxu1 %v5433_v47 }
 0x228   : > { %5582 = vmatpush.msrb.mxu2 %v5434_v53  ;;  %5602 = vmatpush.msrb.mxu3 %v5435_v62  ;;  %v5642_v41 = vsel %vm5635_vm10, %v6849_v16, %v6853_v11  ;;  %v5643_v37 = vsel %vm5635_vm10, %v6853_v11, %v5634_v22 }
 0x229   : > { %v3694_v35 = vpop.f32.mrf.mxu2  ;;  %v3714_v57 = vpop.f32.mrf.mxu3  ;;  %5670 = vmatpush.msra.mxu0 %v5636_v6 }
 0x22a   : > { %v3723_v28 = vadd.f32 %v3694_v35, %v3515_v31  ;;  %v3724_v33 = vadd.f32 %v3714_v57, %v3516_v7  ;;  %v3802_v26 = vpop.f32.mrf.mxu1 }
 0x22b   : > { %v3926_v49 = vadd.f32 %v3802_v26, %v3718_v10 }
 0x22c   : > { %v3862_v15 = vpop.f32.mrf.mxu0 }
 0x22d   : > { %v3929_v32 = vadd.f32 %v3862_v15, %v3721_v18  ;;  %6246 = vmatmul.msk.f32.vlgmr.msra.gmra.mxu1 %vm279_vm1, %v6244_v4 }
 0x22e   : > { %6247 = vmatmul.msk.f32.vlgmr.msra.gmra.mxu2 %vm279_vm1, %v6244_v4  ;;  %6248 = vmatmul.msk.f32.vlgmr.msra.gmra.mxu3 %vm279_vm1, %v6244_v4 }
 0x22f   : > { %6249 = vmatmul.msk.f32.vlgmr.msrb.gmra.mxu0 %vm279_vm1, %v6244_v4  ;;  %5690 = vmatpush.msra.mxu1 %v5637_v9 }
 0x230   : > { %5710 = vmatpush.msra.mxu2 %v5638_v27  ;;  %5730 = vmatpush.msra.mxu3 %v5639_v50 }
 0x231   : > { %v3822_v48 = vpop.f32.mrf.mxu2  ;;  %v3842_v56 = vpop.f32.mrf.mxu3  ;;  %5750 = vmatpush.msrb.mxu0 %v5640_v14 }
 0x232   : > { %v3927_v13 = vadd.f32 %v3822_v48, %v3719_v12  ;;  %v3928_v21 = vadd.f32 %v3842_v56, %v3720_v30  ;;  %v3882_v0 = vpop.f32.mrf.mxu1 }
 0x233   : > { %v3930_v52 = vadd.f32 %v3882_v0, %v3722_v19 }
 0x234   : > { %v4008_v23 = vpop.f32.mrf.mxu0 }
 0x235   : > { %v4151_v42 = vadd.f32 %v4008_v23, %v3925_v34  ;;  %6250 = vmatmul.msk.f32.vlgmr.msrb.gmra.mxu1 %vm279_vm1, %v6244_v4 }
 0x236   : > { %6251 = vmatmul.msk.f32.vlgmr.msrb.gmra.mxu2 %vm279_vm1, %v6244_v4  ;;  %6252 = vmatmul.msk.f32.vlgmr.msrb.gmra.mxu3 %vm279_vm1, %v6244_v4 }
 0x237   : > { %6254 = vmatmul.msk.f32.vlgmr.msra.gmra.mxu0 %vm279_vm1, %v6253_v59  ;;  %5770 = vmatpush.msrb.mxu1 %v5641_v43 }
 0x238   : > { %5790 = vmatpush.msrb.mxu2 %v5642_v41  ;;  %5810 = vmatpush.msrb.mxu3 %v5643_v37 }
 0x239   : > { %v3902_v31 = vpop.f32.mrf.mxu2  ;;  %v3922_v7 = vpop.f32.mrf.mxu3 }
 0x23a   : > { %v3931_v63 = vadd.f32 %v3902_v31, %v3723_v28  ;;  %v3932_v2 = vadd.f32 %v3922_v7, %v3724_v33  ;;  %v4028_v10 = vpop.f32.mrf.mxu1 }
 0x23b   : > { %v4152_v61 = vadd.f32 %v4028_v10, %v3926_v49 }
 0x23c   : > { %v4088_v24 = vpop.f32.mrf.mxu0 }
 0x23d   : > { %v4155_v1 = vadd.f32 %v4088_v24, %v3929_v32  ;;  %6255 = vmatmul.msk.f32.vlgmr.msra.gmra.mxu1 %vm279_vm1, %v6253_v59 }
 0x23e   : > { %6256 = vmatmul.msk.f32.vlgmr.msra.gmra.mxu2 %vm279_vm1, %v6253_v59  ;;  %6257 = vmatmul.msk.f32.vlgmr.msra.gmra.mxu3 %vm279_vm1, %v6253_v59 }
 0x23f   : > { %6258 = vmatmul.msk.f32.vlgmr.msrb.gmra.mxu0 %vm279_vm1, %v6253_v59 }
 0x241   : > { %v4048_v18 = vpop.f32.mrf.mxu2  ;;  %v4068_v3 = vpop.f32.mrf.mxu3 }
 0x242   : > { %v4153_v45 = vadd.f32 %v4048_v18, %v3927_v13  ;;  %v4154_v17 = vadd.f32 %v4068_v3, %v3928_v21  ;;  %v4108_v58 = vpop.f32.mrf.mxu1 }
 0x243   : > { %v4156_v38 = vadd.f32 %v4108_v58, %v3930_v52 }
 0x244   : > { %v4216_v29 = vpop.f32.mrf.mxu0 }
 0x245   : > { %v4359_v46 = vadd.f32 %v4216_v29, %v4151_v42  ;;  %6259 = vmatmul.msk.f32.vlgmr.msrb.gmra.mxu1 %vm279_vm1, %v6253_v59 }
 0x246   : > { %6260 = vmatmul.msk.f32.vlgmr.msrb.gmra.mxu2 %vm279_vm1, %v6253_v59  ;;  %6261 = vmatmul.msk.f32.vlgmr.msrb.gmra.mxu3 %vm279_vm1, %v6253_v59 }
 0x249   : > { %v4128_v55 = vpop.f32.mrf.mxu2  ;;  %v4148_v8 = vpop.f32.mrf.mxu3 }
 0x24a   : > { %v4157_v12 = vadd.f32 %v4128_v55, %v3931_v63  ;;  %v4158_v30 = vadd.f32 %v4148_v8, %v3932_v2  ;;  %v4236_v5 = vpop.f32.mrf.mxu1 }
 0x24b   : > { %v4360_v25 = vadd.f32 %v4236_v5, %v4152_v61 }
 0x24c   : > { %v4296_v60 = vpop.f32.mrf.mxu0 }
 0x24d   : > { %v4363_v19 = vadd.f32 %v4296_v60, %v4155_v1 }
 0x251   : > { %v4256_v20 = vpop.f32.mrf.mxu2  ;;  %v4276_v4 = vpop.f32.mrf.mxu3 }
 0x252   : > { %v4361_v47 = vadd.f32 %v4256_v20, %v4153_v45  ;;  %v4362_v34 = vadd.f32 %v4276_v4, %v4154_v17  ;;  %v4316_v53 = vpop.f32.mrf.mxu1 }
 0x253   : > { %v4364_v62 = vadd.f32 %v4316_v53, %v4156_v38 }
 0x254   : > { %v4424_v36 = vpop.f32.mrf.mxu0 }
 0x255   : > { %v4567_v6 = vadd.f32 %v4424_v36, %v4359_v46 }
 0x259   : > { %v4336_v54 = vpop.f32.mrf.mxu2  ;;  %v4356_v44 = vpop.f32.mrf.mxu3 }
 0x25a   : > { %v4365_v35 = vadd.f32 %v4336_v54, %v4157_v12  ;;  %v4366_v57 = vadd.f32 %v4356_v44, %v4158_v30  ;;  %v4444_v40 = vpop.f32.mrf.mxu1 }
 0x25b   : > { %v4568_v51 = vadd.f32 %v4444_v40, %v4360_v25 }
 0x25c   : > { %v4504_v28 = vpop.f32.mrf.mxu0 }
 0x25d   : > { %v4571_v33 = vadd.f32 %v4504_v28, %v4363_v19 }
 0x261   : > { %v4464_v26 = vpop.f32.mrf.mxu2  ;;  %v4484_v39 = vpop.f32.mrf.mxu3 }
 0x262   : > { %v4569_v49 = vadd.f32 %v4464_v26, %v4361_v47  ;;  %v4570_v15 = vadd.f32 %v4484_v39, %v4362_v34  ;;  %v4524_v9 = vpop.f32.mrf.mxu1  ;;  %v8398_v39 = vld [vmem:[%s8493_s2] sm:$0xff] }
 0x263   : > { %v4572_v32 = vadd.f32 %v4524_v9, %v4364_v62 }
 0x264   : > { %v4632_v27 = vpop.f32.mrf.mxu0 }
 0x265   : > { %v4775_v50 = vadd.f32 %v4632_v27, %v4567_v6 }
 0x269   : > { %v4544_v14 = vpop.f32.mrf.mxu2  ;;  %v4564_v16 = vpop.f32.mrf.mxu3 }
 0x26a   : > { %v4573_v48 = vadd.f32 %v4544_v14, %v4365_v35  ;;  %v4574_v56 = vadd.f32 %v4564_v16, %v4366_v57  ;;  %v4652_v11 = vpop.f32.mrf.mxu1 }
 0x26b   : > { %v4776_v13 = vadd.f32 %v4652_v11, %v4568_v51 }
 0x26c   : > { %v4712_v21 = vpop.f32.mrf.mxu0 }
 0x26d   : > { %v4779_v0 = vadd.f32 %v4712_v21, %v4571_v33 }
 0x271   : > { %v4672_v22 = vpop.f32.mrf.mxu2  ;;  %v4692_v52 = vpop.f32.mrf.mxu3 }
 0x272   : > { %v4777_v23 = vadd.f32 %v4672_v22, %v4569_v49  ;;  %v4778_v59 = vadd.f32 %v4692_v52, %v4570_v15  ;;  %v4732_v43 = vpop.f32.mrf.mxu1 }
 0x273   : > { %v4780_v42 = vadd.f32 %v4732_v43, %v4572_v32 }
 0x274   : > { %v4840_v41 = vpop.f32.mrf.mxu0 }
 0x275   : > { %v4983_v44 = vadd.f32 %v4840_v41, %v4775_v50  ;;  %v5826_v50 = vperm.slane %v8398_v39, 1 }
 0x279   : > { %v4752_v37 = vpop.f32.mrf.mxu2  ;;  %v4772_v31 = vpop.f32.mrf.mxu3 }
 0x27a   : > { %v4781_v7 = vadd.f32 %v4752_v37, %v4573_v48  ;;  %v8385_v63 = vadd.f32 %v4772_v31, %v4574_v56  ;;  %v4860_v2 = vpop.f32.mrf.mxu1 }
 0x27b   : > { %v4984_v54 = vadd.f32 %v4860_v2, %v4776_v13 }
 0x27c   : > { %v4920_v10 = vpop.f32.mrf.mxu0 }
 0x27d   : > { %v4987_v33 = vadd.f32 %v4920_v10, %v4779_v0  ;;  %v5825_v0 = vperm.slane %v8398_v39, 0  ;;  %v5827_v10 = vperm.slane %v8398_v39, 2 }
 0x281   : > { %v4880_v61 = vpop.f32.mrf.mxu2  ;;  %v4900_v24 = vpop.f32.mrf.mxu3 }
 0x282   : > { %v4940_v1 = vpop.f32.mrf.mxu1  ;;  %v4985_v9 = vadd.f32 %v4880_v61, %v4777_v23  ;;  %v4986_v32 = vadd.f32 %v4900_v24, %v4778_v59 }
 0x283   : > { %v4988_v16 = vadd.f32 %v4940_v1, %v4780_v42  ;;  %v5828_v1 = vperm.slane %v8398_v39, 3 }
 0x284   : > { %v5048_v18 = vpop.f32.mrf.mxu0 }
 0x285   : > { %v5191_v40 = vadd.f32 %v5048_v18, %v4983_v44 }
 0x289   : > { %v4960_v3 = vpop.f32.mrf.mxu2  ;;  %v4980_v45 = vpop.f32.mrf.mxu3 }
 0x28a   : > { %v5068_v17 = vpop.f32.mrf.mxu1  ;;  %v4989_v59 = vadd.f32 %v4960_v3, %v4781_v7  ;;  %v4990_v18 = vadd.f32 %v4980_v45, %v8385_v63 }
 0x28b   : > { %v5192_v57 = vadd.f32 %v5068_v17, %v4984_v54 }
 0x28c   : > { %v5128_v58 = vpop.f32.mrf.mxu0 }
 0x28d   : > { %v5195_v48 = vadd.f32 %v5128_v58, %v4987_v33 }
 0x291   : > { %v5088_v38 = vpop.f32.mrf.mxu2  ;;  %v5108_v29 = vpop.f32.mrf.mxu3 }
 0x292   : > { %v5148_v46 = vpop.f32.mrf.mxu1  ;;  %v5193_v11 = vadd.f32 %v5088_v38, %v4985_v9  ;;  %v5194_v13 = vadd.f32 %v5108_v29, %v4986_v32  ;;  %v5829_v38 = vperm.slane %v8398_v39, 4 }
 0x293   : > { %v5196_v22 = vadd.f32 %v5148_v46, %v4988_v16 }
 0x294   : > { %v5256_v55 = vpop.f32.mrf.mxu0 }
 0x295   : > { %v5399_v28 = vadd.f32 %v5256_v55, %v5191_v40 }
 0x299   : > { %v8387_v8 = vpop.f32.mrf.mxu2  ;;  %v8389_v12 = vpop.f32.mrf.mxu3 }
 0x29a   : > { %v5276_v30 = vpop.f32.mrf.mxu1 }
 0x29b   : > { %v5400_v51 = vadd.f32 %v5276_v30, %v5192_v57  ;;  %v5832_v57 = vperm.slane %v8398_v39, 7 }
 0x29c   : > { %v5336_v5 = vpop.f32.mrf.mxu0 }
 0x29d   : > { %v5403_v52 = vadd.f32 %v5336_v5, %v5195_v48  ;;  %v5197_v5 = vadd.f32 %v8387_v8, %v4989_v59 }
 0x2a1   : > { %v5296_v25 = vpop.f32.mrf.mxu2  ;;  %v5316_v60 = vpop.f32.mrf.mxu3 }
 0x2a2   : > { %v5356_v19 = vpop.f32.mrf.mxu1  ;;  %v5401_v43 = vadd.f32 %v5296_v25, %v5193_v11  ;;  %v5402_v41 = vadd.f32 %v5316_v60, %v5194_v13  ;;  %v5198_v25 = vadd.f32 %v8389_v12, %v4990_v18 }
 0x2a3   : > { %v5404_v31 = vadd.f32 %v5356_v19, %v5196_v22  ;;  %v5830_v19 = vperm.slane %v8398_v39, 5 }
 0x2a4   : > { %v5464_v20 = vpop.f32.mrf.mxu0 }
 0x2a5   : > { %v5607_v27 = vadd.f32 %v5464_v20, %v5399_v28 }
 0x2a9   : > { %v8391_v4 = vpop.f32.mrf.mxu2  ;;  %v8393_v47 = vpop.f32.mrf.mxu3 }
 0x2aa   : > { %v5484_v34 = vpop.f32.mrf.mxu1  ;;  %v5406_v8 = vadd.f32 %v8393_v47, %v5198_v25 }
 0x2ab   : > { %v5608_v26 = vadd.f32 %v5484_v34, %v5400_v51 }
 0x2ac   : > { %v5544_v53 = vpop.f32.mrf.mxu0 }
 0x2ad   : > { %v5611_v2 = vadd.f32 %v5544_v53, %v5403_v52  ;;  %v5405_v53 = vadd.f32 %v8391_v4, %v5197_v5  ;;  %v6958_v52 = vmov 0  }
 0x2ae   : > { %6855 = vset.pattern.permute.xlu0 %v6958_v52 }
 0x2b1   : > { %v5504_v62 = vpop.f32.mrf.mxu2  ;;  %v5524_v36 = vpop.f32.mrf.mxu3 }
 0x2b2   : > { %v5564_v6 = vpop.f32.mrf.mxu1  ;;  %v5609_v42 = vadd.f32 %v5504_v62, %v5401_v43  ;;  %v5610_v61 = vadd.f32 %v5524_v36, %v5402_v41 }
 0x2b3   : > { %v5612_v17 = vadd.f32 %v5564_v6, %v5404_v31 }
 0x2b4   : > { %v5672_v35 = vpop.f32.mrf.mxu0 }
 0x2b5   : > { %v5815_v21 = vadd.f32 %v5672_v35, %v5607_v27  ;;  %v5831_v35 = vperm.slane %v8398_v39, 6 }
 0x2b7   : > { %v8405_v24 = vmul.f32 %v5825_v0, %v5815_v21 }
 0x2b9   : > { %v5584_v49 = vpop.f32.mrf.mxu2  ;;  %v5604_v15 = vpop.f32.mrf.mxu3  ;;  %v5858_v63 = vmul.f32 %v8405_v24, %v8405_v24 }
 0x2ba   : > { %v5692_v14 = vpop.f32.mrf.mxu1  ;;  %v5613_v54 = vadd.f32 %v5584_v49, %v5405_v53  ;;  %v5614_v40 = vadd.f32 %v5604_v15, %v5406_v8 }
 0x2bb   : > { %v5816_v56 = vadd.f32 %v5692_v14, %v5608_v26 }
 0x2bc   : > { %v5752_v23 = vpop.f32.mrf.mxu0 }
 0x2bd   : > { %v8402_v37 = vmul.f32 %v5826_v50, %v5816_v56  ;;  %v5819_v58 = vadd.f32 %v5752_v23, %v5611_v2 }
 0x2bf   : > { %v5859_v7 = vmul.f32 %v8402_v37, %v8402_v37  ;;  %v5849_v45 = vadd.f32 %v8402_v37, %v8405_v24  ;;  %v8424_v62 = vmul.f32 %v5829_v38, %v5819_v58 }
 0x2c1   : > { %v5712_v29 = vpop.f32.mrf.mxu2  ;;  %v5732_v46 = vpop.f32.mrf.mxu3  ;;  %v5866_v12 = vadd.f32 %v5859_v7, %v5858_v63  ;;  %v5862_v28 = vmul.f32 %v8424_v62, %v8424_v62 }
 0x2c2   : > { %v5817_v3 = vadd.f32 %v5712_v29, %v5609_v42  ;;  %v5818_v55 = vadd.f32 %v5732_v46, %v5610_v61  ;;  %v5772_v30 = vpop.f32.mrf.mxu1  ;;  %v5891_v29 = vld [vmem:[%s8494_s3] sm:$0xff] }
 0x2c3   : > { %v5820_v60 = vadd.f32 %v5772_v30, %v5612_v17 }
 0x2c4   : > { %v8419_v20 = vmul.f32 %v5827_v10, %v5817_v3  ;;  %v8421_v34 = vmul.f32 %v5828_v1, %v5818_v55  ;;  %v5893_v55 = vld [vmem:[%s8495_s4] sm:$0xff] }
 0x2c5   : > { %v8430_v44 = vmul.f32 %v5830_v19, %v5820_v60 }
 0x2c6   : > { %v5850_v36 = vadd.f32 %v5849_v45, %v8419_v20  ;;  %v5860_v6 = vmul.f32 %v8419_v20, %v8419_v20  ;;  %v5861_v47 = vmul.f32 %v8421_v34, %v8421_v34 }
 0x2c7   : > { %v5863_v39 = vmul.f32 %v8430_v44, %v8430_v44 }
 0x2c8   : > { %v5867_v51 = vadd.f32 %v5866_v12, %v5860_v6  ;;  %v5851_v4 = vadd.f32 %v5850_v36, %v8421_v34 }
 0x2c9   : > { %v5792_v33 = vpop.f32.mrf.mxu2  ;;  %v5812_v26 = vpop.f32.mrf.mxu3 }
 0x2ca   : > { %v5868_v9 = vadd.f32 %v5867_v51, %v5861_v47  ;;  %v5821_v49 = vadd.f32 %v5792_v33, %v5613_v54  ;;  %v5822_v32 = vadd.f32 %v5812_v26, %v5614_v40  ;;  %v5852_v27 = vadd.f32 %v5851_v4, %v8424_v62 }
 0x2cc   : > { %v5847_v15 = vmul.f32 %v5831_v35, %v5821_v49  ;;  %v5848_v14 = vmul.f32 %v5832_v57, %v5822_v32  ;;  %v5853_v50 = vadd.f32 %v5852_v27, %v8430_v44  ;;  %v5869_v16 = vadd.f32 %v5868_v9, %v5862_v28 }
 0x2ce   : > { %v5854_v48 = vadd.f32 %v5853_v50, %v5847_v15  ;;  %v5864_v56 = vmul.f32 %v5847_v15, %v5847_v15  ;;  %v5870_v11 = vadd.f32 %v5869_v16, %v5863_v39  ;;  %v5865_v21 = vmul.f32 %v5848_v14, %v5848_v14 }
 0x2d0   : > { %v5855_v13 = vadd.f32 %v5854_v48, %v5848_v14  ;;  %v5871_v0 = vadd.f32 %v5870_v11, %v5864_v56 }
 0x2d2   : > { %5856 = vadd.xlane.f32.xlu1 %v5855_v13  ;;  %v5872_v22 = vadd.f32 %v5871_v0, %v5865_v21 }
 0x2d4   : > { %5873 = vadd.xlane.f32.xlu2 %v5872_v22 }
 0x345   : > { %v5857_v43 = vpop.xlane.xlu1 %5856 }
 0x346   : > { %v5875_v41 = vmul.f32 0.001953125, %v5857_v43 }
 0x347   : > { %v5874_v23 = vpop.xlane.xlu2 %5873 }
 0x348   : > { %v5877_v59 = vmul.f32 %v5875_v41, %v5875_v41  ;;  %v5876_v31 = vmul.f32 0.001953125, %v5874_v23 }
 0x34a   : > { %v5878_v2 = vsub.f32 %v5876_v31, %v5877_v59 }
 0x34c   : > { %v5879_v10 = vmax.f32 %v5878_v2, 0.0 }
 0x34e   : > { %v5880_v42 = vadd.f32 1e-05, %v5879_v10 }
 0x350   : > { %6856 = vrsqrt.f32 %v5880_v42  ;;  %vm5887_vm11 = vweird.f32 %v5880_v42 }
 0x356   : > { %v6857_v61 = vpop.eup %6856 }
 0x357   : > { %v5882_v1 = vmul.f32 %v6857_v61, %v5880_v42  ;;  %vm5888_vm1 = vweird.f32 %v6857_v61 }
 0x358   : > { %vm5889_vm12 = vmor %vm5887_vm11, %vm5888_vm1 }
 0x359   : > { %v5883_v18 = vmul.f32 %v6857_v61, %v5882_v1 }
 0x35b   : > { %v5884_v17 = vmul.f32 0.5, %v5883_v18 }
 0x35d   : > { %v5885_v58 = vsub.f32 1.5, %v5884_v17 }
 0x35f   : > { %v5886_v38 = vmul.f32 %v6857_v61, %v5885_v58 }
 0x361   : > { %v5890_v46 = vsel %vm5889_vm12, %v6857_v61, %v5886_v38 }
 0x362   : > { %v5892_v7 = vmul.f32 %v5891_v29, %v5890_v46 }
 0x364   : > { %5898 = vperm.xlu0 %6855, %v5892_v7   ;;  %v5894_v3 = vmul.f32 %v5892_v7, %v5875_v41 }
 0x366   : > { %v5895_v30 = vsub.f32 %v5893_v55, %v5894_v3 }
 0x36c   : > { %5911 = vperm.xlu0 %6855, %v5895_v30  }
 0x3d6   : > { %v5899_v5 = vpop.permute.xlu0 %5898 }
 0x3d7   : > { %v5901_v25 = vmul.f32 %v5899_v5, %v8405_v24  ;;  %v5902_v60 = vmul.f32 %v5899_v5, %v8402_v37  ;;  %v5903_v19 = vmul.f32 %v5899_v5, %v8419_v20  ;;  %v5904_v63 = vmul.f32 %v5899_v5, %v8421_v34 }
 0x3d8   : > { %v5905_v45 = vmul.f32 %v5899_v5, %v8424_v62  ;;  %v5906_v53 = vmul.f32 %v5899_v5, %v8430_v44  ;;  %v5907_v8 = vmul.f32 %v5899_v5, %v5847_v15  ;;  %v5908_v24 = vmul.f32 %v5899_v5, %v5848_v14 }
 0x3de   : > { %v5912_v12 = vpop.permute.xlu0 %5911 }
 0x3df   : > { %v5914_v36 = vadd.f32 %v5912_v12, %v5901_v25  ;;  %v5915_v6 = vadd.f32 %v5912_v12, %v5902_v60  ;;  %v5916_v54 = vadd.f32 %v5912_v12, %v5903_v19  ;;  %v5917_v35 = vadd.f32 %v5912_v12, %v5904_v63 }
 0x3e0   : > { %v5918_v57 = vadd.f32 %v5912_v12, %v5905_v45  ;;  %v5919_v37 = vadd.f32 %v5912_v12, %v5906_v53  ;;  %v5920_v40 = vadd.f32 %v5912_v12, %v5907_v8  ;;  %v5921_v4 = vadd.f32 %v5912_v12, %v5908_v24 }
 0x3e1   : > { %v5922_v20 = vmax.f32 %v5914_v36, 0.0  ;;  %v5923_v51 = vmax.f32 %v5915_v6, 0.0  ;;  %v5924_v34 = vmax.f32 %v5916_v54, 0.0  ;;  %v5925_v47 = vmax.f32 %v5917_v35, 0.0 }
 0x3e2   : > { %v5926_v62 = vmax.f32 %v5918_v57, 0.0  ;;  %v5927_v44 = vmax.f32 %v5919_v37, 0.0  ;;  %v5928_v28 = vmax.f32 %v5920_v40, 0.0  ;;  %v5929_v33 = vmax.f32 %v5921_v4, 0.0 }
 0x3e3   : > { %5930 = vst [vmem:[%s217_s10] sm:$0xff] %v5922_v20 }
 0x3e4   : > { %5931 = vst [vmem:[%s217_s10 + $0x8] sm:$0xff] %v5923_v51 }
 0x3e5   : > { %5932 = vst [vmem:[%s217_s10 + $0x10] sm:$0xff] %v5924_v34 }
 0x3e6   : > { %5933 = vst [vmem:[%s217_s10 + $0x18] sm:$0xff] %v5925_v47 }
 0x3e7   : > { %5934 = vst [vmem:[%s217_s10 + $0x20] sm:$0xff] %v5926_v62 }
 0x3e8   : > { %5935 = vst [vmem:[%s217_s10 + $0x28] sm:$0xff] %v5927_v44 }
 0x3e9   : > { %5936 = vst [vmem:[%s217_s10 + $0x30] sm:$0xff] %v5928_v28 }
 0x3ea   : > { %5937 = vst [vmem:[%s217_s10 + $0x38] sm:$0xff] %v5929_v33 }
 0x3eb   : > { %6895 = shalt.err (!%p6892_p3)
}
 0x3ec   : > { %6269 = dma.vmem_to_hbm [thread:$0]  (%p7027_p5), %s5953_s22, 1024, %s5955_s11, %s5939_s12  }
 0x3ed PF: > { %p6275_p4 = scmp.ge.s32.totalorder %s6930_s21, 2  ;;  %s5966_s25 = sand.u32 1, %s6918_s18  }
 0x3ee   : > { %s5967_s26 = scalar_lea.sflag [#allocation3], %s5966_s25 }
 0x3ef   : > { %p6272_p7 = pnand %p6275_p4, %p7031_p6 }
 0x3f1   : > { %p6273_p8 = pneg %p6272_p7 }
 0x3f3   : > { %6913 = dma.done.wait (%p6273_p8), %s5967_s26, 1024  }
 0x3f4   : > { %6915 = vsyncadd (%p6273_p8), %s5967_s26, 4294966272  ;;  %p15_p9 = scmp.ge.s32.totalorder %s7014_s24, 4   ;;  %s8525_s18 = smov %s6922_s19 }
 0x3f5   : > { %s8526_s19 = smov %s6926_s20  ;;  %s8527_s20 = smov %s7025_s27 }
 0x3f6   : > { %s8528_s21 = smov %s7014_s24  ;;  %17 = sbr.rel (!%p15_p9) target bundleno = 3 (0x3), region = 101 }
 0x3fb   :  { %5973 = vsyncpa [#allocation3], 1 }
 0x3fc   :  { %5975 = vsyncpa [#allocation3 + $0x1], 1 }

</bundles_post_ra>
